<compile_context>
chip_gen: v7x
topology: tpu7x:2x2x1
jax: 0.10.0
libtpu: 0.0.40
codegen_flags: <defaults>
</compile_context>

<pallas_src>
import jax
import jax.numpy as jnp
from jax.experimental import pallas as pl
from jax.experimental.pallas import tpu as pltpu

EPS = 1e-5
SLOPE = 0.01
LANES = 128
VMEM_LIMIT = 48 * 1024 * 1024      # safe on v5e/v6e (128 MiB) and v7x (64 MiB) VMEM
STATS_ROW_TILE = 1024              # rows per stats-reduction tile (multiple of 8)
CONV_ROW_CAP = 1024                # max TH*W output rows per fused conv tile


# ------------------------------- kernels ----------------------------------- #

def bn_stats_kernel(x_ref, sum_ref, sq_ref):
    """Accumulate per-channel sum / sum-of-squares across row tiles (reduction grid)."""
    @pl.when(pl.program_id(0) == 0)
    def _init():
        sum_ref[...] = jnp.zeros_like(sum_ref)
        sq_ref[...] = jnp.zeros_like(sq_ref)

    x = x_ref[...].astype(jnp.float32)
    sum_ref[...] += jnp.sum(x, axis=0, keepdims=True)
    sq_ref[...] += jnp.sum(x * x, axis=0, keepdims=True)


def _make_conv_kernel(TH, H, W, Cp, *, with_residual, emit_stats, compute_dtype):
    """Fused BN(scale/shift) + LeakyReLU + 3x3 conv with in-kernel halo.

    x_ref     : (H, W, Cp)      unpadded, channels-last image of one batch element (resident)
    w3_ref    : (3, 3*Cp, Cp)   conv weight packed as (kh, kw*c_in, c_out)
    scale/shift : (1, 1, Cp)    folded BN affine (f32)
    res_ref   : (TH, W, Cp)     residual rows (optional)
    out_ref   : (TH, W, Cp)     output rows
    stats_ref : (8, Cp)         [sum; sumsq; 0...] partials of this tile's conv output (optional)
    """
    TW = TH * W
    HB = H // TH

    def kernel(x_ref, w3_ref, scale_ref, shift_ref, *rest):
        i = 0
        if with_residual:
            res_ref = rest[i]; i += 1
        out_ref = rest[i]; i += 1
        if emit_stats:
            stats_ref = rest[i]

        h = pl.program_id(1)
        h0 = pl.multiple_of(h * TH, TH)

        scale = scale_ref[...]                       # (1, 1, Cp) f32
        shift = shift_ref[...]

        def act(v):                                  # BN affine + LeakyReLU (f32 VPU)
            a = v * scale + shift
            return jnp.where(a >= 0, a, SLOPE * a)

        # ----- activation window with in-kernel halo (post-activation zero padding) -----
        body = act(x_ref[pl.ds(h0, TH), :, :])                               # (TH, W, Cp)
        top_row = x_ref[pl.ds(jnp.maximum(h0 - 1, 0), 1), :, :]              # clamped read
        bot_row = x_ref[pl.ds(jnp.minimum(h0 + TH, H - 1), 1), :, :]
        top = jnp.where(h > 0, act(top_row), 0.0)                            # zero at image top
        bot = jnp.where(h < HB - 1, act(bot_row), 0.0)                       # zero at image bottom
        awin = jnp.concatenate([top, body, bot], axis=0)                     # (TH+2, W, Cp) f32

        # zero columns for the W halo, then pack the 3 kw taps along the lane axis
        zcol = jnp.zeros((TH + 2, 1, Cp), jnp.float32)
        ap = jnp.concatenate([zcol, awin, zcol], axis=1)                     # (TH+2, W+2, Cp)
        a3 = jnp.concatenate([ap[:, 0:W, :], ap[:, 1:W + 1, :], ap[:, 2:W + 2, :]],
                             axis=-1)                                        # (TH+2, W, 3Cp)
        a3 = a3.astype(compute_dtype).reshape((TH + 2) * W, 3 * Cp)

        # ----- 3 MXU dots, one per kh, contraction K = 3*Cp -----
        acc = jnp.zeros((TW, Cp), jnp.float32)
        for kh in range(3):
            lhs = a3[kh * W: kh * W + TW, :]                                 # aligned row slice
            acc = acc + jnp.dot(lhs, w3_ref[kh],
                                preferred_element_type=jnp.float32)

        # fused partial BN statistics of the conv output (consumed by stage 2)
        if emit_stats:
            srow = jnp.sum(acc, axis=0, keepdims=True)
            qrow = jnp.sum(acc * acc, axis=0, keepdims=True)
            stats_ref[...] = jnp.concatenate(
                [srow, qrow, jnp.zeros((6, Cp), jnp.float32)], axis=0)

        out = acc.reshape(TH, W, Cp)
        if with_residual:
            out = out + res_ref[...]
        out_ref[...] = out.astype(out_ref.dtype)

    return kernel


# --------------------------- pallas_call wrappers --------------------------- #

def _bn_batch_stats(x2d):
    """Per-channel sum and sum-of-squares over ALL rows (cross-tile Pallas reduction)."""
    M, Cp = x2d.shape
    tm = M                                        # fallback: full block (always legal)
    for t in range(8, min(M, STATS_ROW_TILE) + 1, 8):
        if M % t == 0:
            tm = t
    s, q = pl.pallas_call(
        bn_stats_kernel,
        out_shape=(jax.ShapeDtypeStruct((1, Cp), jnp.float32),
                   jax.ShapeDtypeStruct((1, Cp), jnp.float32)),
        grid=(M // tm,),
        in_specs=[pl.BlockSpec((tm, Cp), lambda i: (i, 0))],
        out_specs=(pl.BlockSpec((1, Cp), lambda i: (0, 0)),
                   pl.BlockSpec((1, Cp), lambda i: (0, 0))),
        compiler_params=pltpu.CompilerParams(
            dimension_semantics=("arbitrary",),
            vmem_limit_bytes=VMEM_LIMIT),
    )(x2d)
    return s, q


def _bn_affine(s, q, gamma, beta, m):
    """Fold training-mode batch statistics (biased variance) into scale/shift, shaped (1,1,Cp)."""
    mean = s / m
    var = jnp.maximum(q / m - mean * mean, 0.0)        # single-pass; clamped at 0
    scale = gamma * jax.lax.rsqrt(var + EPS)
    shift = beta - mean * scale
    Cp = s.shape[-1]
    return scale.reshape(1, 1, Cp), shift.reshape(1, 1, Cp)


def _pick_row_tile(H, W):
    TH = 1                                         # always a valid divisor
    for t in range(1, H + 1):
        if H % t == 0 and t * W <= CONV_ROW_CAP:
            TH = t
    return TH


def _norm_act_conv(x4d, w3, scale, shift, residual4d, *, emit_stats, compute_dtype):
    """Fused BN + LeakyReLU + 3x3 conv (+ residual / + BN-stat partials) over an (N, H-tiles) grid."""
    N, H, W, Cp = x4d.shape
    TH = _pick_row_tile(H, W)
    HB = H // TH
    with_res = residual4d is not None

    kernel = _make_conv_kernel(TH, H, W, Cp, with_residual=with_res,
                               emit_stats=emit_stats, compute_dtype=compute_dtype)

    in_specs = [
        # whole (unpadded) image of one batch element; re-DMA'd only when n changes
        pl.BlockSpec((None, H, W, Cp), lambda n, h: (n, 0, 0, 0)),
        # grid-invariant operands: loaded once, stay VMEM-resident
        pl.BlockSpec((3, 3 * Cp, Cp), lambda n, h: (0, 0, 0)),
        pl.BlockSpec((1, 1, Cp), lambda n, h: (0, 0, 0)),
        pl.BlockSpec((1, 1, Cp), lambda n, h: (0, 0, 0)),
    ]
    args = [x4d, w3, scale, shift]
    if with_res:
        in_specs.append(pl.BlockSpec((None, TH, W, Cp), lambda n, h: (n, h, 0, 0)))
        args.append(residual4d)

    out_shapes = [jax.ShapeDtypeStruct((N, H, W, Cp), jnp.float32)]
    out_specs = [pl.BlockSpec((None, TH, W, Cp), lambda n, h: (n, h, 0, 0))]
    if emit_stats:
        # per-grid-step (megacore-safe) partials: row 0 = sum, row 1 = sumsq
        out_shapes.append(jax.ShapeDtypeStruct((N * HB, 8, Cp), jnp.float32))
        out_specs.append(pl.BlockSpec((None, 8, Cp), lambda n, h: (n * HB + h, 0, 0)))

    out = pl.pallas_call(
        kernel,
        out_shape=tuple(out_shapes) if emit_stats else out_shapes[0],
        grid=(N, HB),
        in_specs=in_specs,
        out_specs=tuple(out_specs) if emit_stats else out_specs[0],
        compiler_params=pltpu.CompilerParams(
            dimension_semantics=("parallel", "parallel"),
            vmem_limit_bytes=VMEM_LIMIT),
    )(*args)
    return out


# ------------------------------ forward pass -------------------------------- #

def res_forward(params, img_in, *, compute_dtype=jnp.bfloat16):
    """Forward pass of `Res` (training-mode BatchNorm) on an NCHW input.

    compute_dtype controls only the MXU operand dtype (bf16 by default); BN statistics,
    affine, LeakyReLU and matmul accumulation stay in f32."""
    N, F, H, W = img_in.shape
    assert W % 8 == 0, "W must be a multiple of 8 for the lane/sublane-aligned row tiling"
    Cp = ((F + LANES - 1) // LANES) * LANES
    M = N * H * W

    # NCHW -> channels-last, channels zero-padded to a multiple of 128 lanes.
    x = jnp.transpose(img_in, (0, 2, 3, 1)).astype(jnp.float32)
    if Cp != F:
        x = jnp.pad(x, ((0, 0), (0, 0), (0, 0), (0, Cp - F)))

    # Conv weights: PyTorch (out, in, 3, 3) -> (kh, kw, in, out) -> packed (kh, kw*in, out).
    def prep_w(wt):
        wk = jnp.transpose(wt, (2, 3, 1, 0))
        wk = jnp.pad(wk, ((0, 0), (0, 0), (0, Cp - F), (0, Cp - F)))
        return wk.reshape(3, 3 * Cp, Cp).astype(compute_dtype)

    def prep_vec(v, fill):
        return jnp.pad(v.astype(jnp.float32), (0, Cp - F),
                       constant_values=fill).reshape(1, Cp)

    w1 = prep_w(params["w_conv1"])
    w2 = prep_w(params["w_conv2"])
    g1, b1 = prep_vec(params["bn1_g"], 1.0), prep_vec(params["bn1_b"], 0.0)
    g2, b2 = prep_vec(params["bn2_g"], 1.0), prep_vec(params["bn2_b"], 0.0)

    # ---- stage 1: BN1 stats (tiled reduction) -> fused BN1+LeakyReLU+conv1 (+ BN2 partials)
    s1, q1 = _bn_batch_stats(x.reshape(M, Cp))
    scale1, shift1 = _bn_affine(s1, q1, g1, b1, M)
    c1, stats2 = _norm_act_conv(x, w1, scale1, shift1, None,
                                emit_stats=True, compute_dtype=compute_dtype)

    # ---- stage 2: BN2 stats from fused partials -> fused BN2+LeakyReLU+conv2 + residual add
    part = jnp.sum(stats2, axis=0)                 # (8, Cp); row 0 = sum, row 1 = sumsq
    scale2, shift2 = _bn_affine(part[0:1, :], part[1:2, :], g2, b2, M)
    y = _norm_act_conv(c1, w2, scale2, shift2, x,
                       emit_stats=False, compute_dtype=compute_dtype)

    # channels-last -> NCHW, strip channel padding.
    return jnp.transpose(y[..., :F], (0, 3, 1, 2))


# ------------------------------- reference ---------------------------------- #

def init_params(key, filters):
    k1, k2 = jax.random.split(key)
    f = filters
    return {
        "bn1_g": jnp.ones((f,), jnp.float32),
        "bn1_b": jnp.zeros((f,), jnp.float32),
        "w_conv1": 0.1 * jax.random.normal(k1, (f, f, 3, 3), jnp.float32),
        "bn2_g": jnp.ones((f,), jnp.float32),
        "bn2_b": jnp.zeros((f,), jnp.float32),
        "w_conv2": 0.1 * jax.random.normal(k2, (f, f, 3, 3), jnp.float32),
    }


def res_reference(params, img_in):
    """Pure-JAX reference (training-mode BN), used only for a correctness check."""
    def bn_lrelu(x, gamma, beta):
        mean = jnp.mean(x, axis=(0, 2, 3), keepdims=True)
        var = jnp.mean((x - mean) ** 2, axis=(0, 2, 3), keepdims=True)
        y = (x - mean) * jax.lax.rsqrt(var + EPS)
        y = y * gamma.reshape(1, -1, 1, 1) + beta.reshape(1, -1, 1, 1)
        return jnp.where(y >= 0, y, SLOPE * y)

    def conv3(x, wt):
        return jax.lax.conv_general_dilated(
            x, wt, window_strides=(1, 1), padding=((1, 1), (1, 1)),
            dimension_numbers=("NCHW", "OIHW", "NCHW"),
            precision=jax.lax.Precision.HIGHEST)

    a1 = bn_lrelu(img_in, params["bn1_g"], params["bn1_b"])
    c1 = conv3(a1, params["w_conv1"])
    a2 = bn_lrelu(c1, params["bn2_g"], params["bn2_b"])
    c2 = conv3(a2, params["w_conv2"])
    return img_in + c2


# ---------------------------------- main ------------------------------------ #

if __name__ == "__main__":
    key = jax.random.PRNGKey(0)
    kp, kx = jax.random.split(key)

    filters, N, H, W = 4, 2, 16, 16
    params = init_params(kp, filters)
    img_in = jax.random.normal(kx, (N, filters, H, W), jnp.float32)

    out = jax.jit(res_forward)(params, img_in)
    jax.block_until_ready(out)

    assert out.shape == (N, filters, H, W)
    assert out.dtype == jnp.float32

    ref = res_reference(params, img_in)
    err = float(jnp.max(jnp.abs(out - ref)))
    # bf16 MXU operands (f32 accumulation) -> loose-ish tolerance; real bugs give O(1) errors.
    assert err < 5e-2, f"mismatch vs JAX reference: max|err|={err}"

    print("KERNEL_OK")
</pallas_src>

<mosaic_0001>
module attributes {stable_mosaic.version = 11 : i64} {
  func.func @bn_stats_kernel(%arg0: i32, %arg1: memref<512x128xf32, #tpu.memory_space<vmem>>, %arg2: memref<1x128xf32, #tpu.memory_space<vmem>>, %arg3: memref<1x128xf32, #tpu.memory_space<vmem>>) attributes {dimension_semantics = [#tpu.dimension_semantics<arbitrary>], iteration_bounds = array<i64: 1>, scalar_prefetch = 0 : i64, scratch_operands = 0 : i64, tpu.core_type = #tpu.core_type<tc>, window_params = [{transform_indices = @transform_0, window_bounds = array<i64: 512, 128>}, {pipeline_mode = #tpu.pipeline_mode<synchronous>, transform_indices = @transform_1, window_bounds = array<i64: 1, 128>}, {pipeline_mode = #tpu.pipeline_mode<synchronous>, transform_indices = @transform_2, window_bounds = array<i64: 1, 128>}]} {
    %c0_i32 = arith.constant 0 : i32
    %0 = arith.cmpi eq, %arg0, %c0_i32 : i32
    %1 = arith.extui %0 : i1 to i32
    %c0_i32_0 = arith.constant 0 : i32
    %2 = arith.cmpi ne, %1, %c0_i32_0 : i32
    scf.if %2 {
      %cst_11 = arith.constant 0.000000e+00 : f32
      %15 = vector.broadcast %cst_11 : f32 to vector<1x128xf32>
      %c0_12 = arith.constant 0 : index
      %c0_13 = arith.constant 0 : index
      %16 = vector.load %arg2[%c0_12, %c0_13] : memref<1x128xf32, #tpu.memory_space<vmem>>, vector<1x128xf32>
      tpu.vector_store %arg2[%c0_12, %c0_13], %15 {strides = array<i32>} : memref<1x128xf32, #tpu.memory_space<vmem>>, vector<1x128xf32>,
      %cst_14 = arith.constant 0.000000e+00 : f32
      %17 = vector.broadcast %cst_14 : f32 to vector<1x128xf32>
      %c0_15 = arith.constant 0 : index
      %c0_16 = arith.constant 0 : index
      %18 = vector.load %arg3[%c0_15, %c0_16] : memref<1x128xf32, #tpu.memory_space<vmem>>, vector<1x128xf32>
      tpu.vector_store %arg3[%c0_15, %c0_16], %17 {strides = array<i32>} : memref<1x128xf32, #tpu.memory_space<vmem>>, vector<1x128xf32>,
    } else {
    }
    %c0 = arith.constant 0 : index
    %c0_1 = arith.constant 0 : index
    %3 = vector.load %arg1[%c0, %c0_1] : memref<512x128xf32, #tpu.memory_space<vmem>>, vector<512x128xf32>
    %c0_2 = arith.constant 0 : index
    %c0_3 = arith.constant 0 : index
    %4 = vector.load %arg2[%c0_2, %c0_3] : memref<1x128xf32, #tpu.memory_space<vmem>>, vector<1x128xf32>
    %cst = arith.constant dense<0.000000e+00> : vector<128xf32>
    %5 = vector.multi_reduction <add>, %3, %cst [0] : vector<512x128xf32> to vector<128xf32>
    %6 = vector.shape_cast %5 : vector<128xf32> to vector<1x128xf32>
    %7 = arith.addf %4, %6 : vector<1x128xf32>
    %c0_4 = arith.constant 0 : index
    %c0_5 = arith.constant 0 : index
    %8 = vector.load %arg2[%c0_4, %c0_5] : memref<1x128xf32, #tpu.memory_space<vmem>>, vector<1x128xf32>
    tpu.vector_store %arg2[%c0_4, %c0_5], %7 {strides = array<i32>} : memref<1x128xf32, #tpu.memory_space<vmem>>, vector<1x128xf32>,
    %c0_6 = arith.constant 0 : index
    %c0_7 = arith.constant 0 : index
    %9 = vector.load %arg3[%c0_6, %c0_7] : memref<1x128xf32, #tpu.memory_space<vmem>>, vector<1x128xf32>
    %10 = arith.mulf %3, %3 : vector<512x128xf32>
    %cst_8 = arith.constant dense<0.000000e+00> : vector<128xf32>
    %11 = vector.multi_reduction <add>, %10, %cst_8 [0] : vector<512x128xf32> to vector<128xf32>
    %12 = vector.shape_cast %11 : vector<128xf32> to vector<1x128xf32>
    %13 = arith.addf %9, %12 : vector<1x128xf32>
    %c0_9 = arith.constant 0 : index
    %c0_10 = arith.constant 0 : index
    %14 = vector.load %arg3[%c0_9, %c0_10] : memref<1x128xf32, #tpu.memory_space<vmem>>, vector<1x128xf32>
    tpu.vector_store %arg3[%c0_9, %c0_10], %13 {strides = array<i32>} : memref<1x128xf32, #tpu.memory_space<vmem>>, vector<1x128xf32>,
    return
  }
  func.func @transform_0(%arg0: i32) -> (i32, i32) {
    %c0_i32 = arith.constant 0 : i32
    %c0_i32_0 = arith.constant 0 : i32
    return %arg0, %c0_i32 : i32, i32
  }
  func.func @transform_1(%arg0: i32) -> (i32, i32) {
    %c0_i32 = arith.constant 0 : i32
    %c0_i32_0 = arith.constant 0 : i32
    %c0_i32_1 = arith.constant 0 : i32
    return %c0_i32, %c0_i32_0 : i32, i32
  }
  func.func @transform_2(%arg0: i32) -> (i32, i32) {
    %c0_i32 = arith.constant 0 : i32
    %c0_i32_0 = arith.constant 0 : i32
    %c0_i32_1 = arith.constant 0 : i32
    return %c0_i32, %c0_i32_0 : i32, i32
  }
}

module attributes {stable_mosaic.version = 11 : i64} {
  func.func @kernel(%arg0: i32, %arg1: i32, %arg2: memref<1x16x16x128xf32, #tpu.memory_space<vmem>>, %arg3: memref<3x384x128xbf16, #tpu.memory_space<vmem>>, %arg4: memref<1x1x128xf32, #tpu.memory_space<vmem>>, %arg5: memref<1x1x128xf32, #tpu.memory_space<vmem>>, %arg6: memref<1x16x16x128xf32, #tpu.memory_space<vmem>>, %arg7: memref<1x16x16x128xf32, #tpu.memory_space<vmem>>) attributes {dimension_semantics = [#tpu.dimension_semantics<parallel>, #tpu.dimension_semantics<parallel>], iteration_bounds = array<i64: 2, 1>, scalar_prefetch = 0 : i64, scratch_operands = 0 : i64, tpu.core_type = #tpu.core_type<tc>, window_params = [{transform_indices = @transform_0, window_bounds = array<i64: 1, 16, 16, 128>}, {pipeline_mode = #tpu.pipeline_mode<synchronous>, transform_indices = @transform_1, window_bounds = array<i64: 3, 384, 128>}, {pipeline_mode = #tpu.pipeline_mode<synchronous>, transform_indices = @transform_2, window_bounds = array<i64: 1, 1, 128>}, {pipeline_mode = #tpu.pipeline_mode<synchronous>, transform_indices = @transform_3, window_bounds = array<i64: 1, 1, 128>}, {transform_indices = @transform_4, window_bounds = array<i64: 1, 16, 16, 128>}, {transform_indices = @transform_5, window_bounds = array<i64: 1, 16, 16, 128>}]} {
    %c16_i32 = arith.constant 16 : i32
    %0 = arith.muli %arg1, %c16_i32 : i32
    %1 = tpu.assume_multiple %0, 16 : i32
    %c0 = arith.constant 0 : index
    %c0_0 = arith.constant 0 : index
    %c0_1 = arith.constant 0 : index
    %2 = vector.load %arg4[%c0, %c0_0, %c0_1] : memref<1x1x128xf32, #tpu.memory_space<vmem>>, vector<1x1x128xf32>
    %c0_2 = arith.constant 0 : index
    %c0_3 = arith.constant 0 : index
    %c0_4 = arith.constant 0 : index
    %3 = vector.load %arg5[%c0_2, %c0_3, %c0_4] : memref<1x1x128xf32, #tpu.memory_space<vmem>>, vector<1x1x128xf32>
    %c0_5 = arith.constant 0 : index
    %4 = arith.index_cast %1 : i32 to index
    %c0_6 = arith.constant 0 : index
    %c0_7 = arith.constant 0 : index
    %5 = vector.load %arg2[%c0_5, %4, %c0_6, %c0_7] : memref<1x16x16x128xf32, #tpu.memory_space<vmem>>, vector<1x16x16x128xf32>
    %6 = vector.shape_cast %5 : vector<1x16x16x128xf32> to vector<16x16x128xf32>
    %7 = vector.broadcast %2 : vector<1x1x128xf32> to vector<16x16x128xf32>
    %8 = arith.mulf %6, %7 : vector<16x16x128xf32>
    %9 = vector.broadcast %3 : vector<1x1x128xf32> to vector<16x16x128xf32>
    %10 = arith.addf %8, %9 : vector<16x16x128xf32>
    %cst = arith.constant 0.000000e+00 : f32
    %11 = vector.broadcast %cst : f32 to vector<16x16x128xf32>
    %12 = arith.cmpf oge, %10, %11 : vector<16x16x128xf32>
    %cst_8 = arith.constant 0.00999999977 : f32
    %13 = vector.broadcast %cst_8 : f32 to vector<16x16x128xf32>
    %14 = arith.mulf %13, %10 : vector<16x16x128xf32>
    %15 = arith.select %12, %10, %14 : vector<16x16x128xi1>, vector<16x16x128xf32>
    %c1_i32 = arith.constant 1 : i32
    %16 = arith.subi %1, %c1_i32 : i32
    %c0_i32 = arith.constant 0 : i32
    %17 = arith.maxsi %16, %c0_i32 : i32
    %c0_9 = arith.constant 0 : index
    %18 = arith.index_cast %17 : i32 to index
    %c0_10 = arith.constant 0 : index
    %c0_11 = arith.constant 0 : index
    %19 = vector.load %arg2[%c0_9, %18, %c0_10, %c0_11] : memref<1x16x16x128xf32, #tpu.memory_space<vmem>>, vector<1x1x16x128xf32>
    %20 = vector.shape_cast %19 : vector<1x1x16x128xf32> to vector<1x16x128xf32>
    %c16_i32_12 = arith.constant 16 : i32
    %21 = arith.addi %1, %c16_i32_12 : i32
    %c15_i32 = arith.constant 15 : i32
    %22 = arith.minsi %21, %c15_i32 : i32
    %c0_13 = arith.constant 0 : index
    %23 = arith.index_cast %22 : i32 to index
    %c0_14 = arith.constant 0 : index
    %c0_15 = arith.constant 0 : index
    %24 = vector.load %arg2[%c0_13, %23, %c0_14, %c0_15] : memref<1x16x16x128xf32, #tpu.memory_space<vmem>>, vector<1x1x16x128xf32>
    %25 = vector.shape_cast %24 : vector<1x1x16x128xf32> to vector<1x16x128xf32>
    %c0_i32_16 = arith.constant 0 : i32
    %26 = arith.cmpi sgt, %arg1, %c0_i32_16 : i32
    %27 = vector.broadcast %2 : vector<1x1x128xf32> to vector<1x16x128xf32>
    %28 = arith.mulf %20, %27 : vector<1x16x128xf32>
    %29 = vector.broadcast %3 : vector<1x1x128xf32> to vector<1x16x128xf32>
    %30 = arith.addf %28, %29 : vector<1x16x128xf32>
    %cst_17 = arith.constant 0.000000e+00 : f32
    %31 = vector.broadcast %cst_17 : f32 to vector<1x16x128xf32>
    %32 = arith.cmpf oge, %30, %31 : vector<1x16x128xf32>
    %cst_18 = arith.constant 0.00999999977 : f32
    %33 = vector.broadcast %cst_18 : f32 to vector<1x16x128xf32>
    %34 = arith.mulf %33, %30 : vector<1x16x128xf32>
    %35 = arith.select %32, %30, %34 : vector<1x16x128xi1>, vector<1x16x128xf32>
    %cst_19 = arith.constant 0.000000e+00 : f32
    %36 = vector.broadcast %cst_19 : f32 to vector<1x16x128xf32>
    %37 = arith.select %26, %35, %36 : vector<1x16x128xf32>
    %c0_i32_20 = arith.constant 0 : i32
    %38 = arith.cmpi slt, %arg1, %c0_i32_20 : i32
    %39 = vector.broadcast %2 : vector<1x1x128xf32> to vector<1x16x128xf32>
    %40 = arith.mulf %25, %39 : vector<1x16x128xf32>
    %41 = vector.broadcast %3 : vector<1x1x128xf32> to vector<1x16x128xf32>
    %42 = arith.addf %40, %41 : vector<1x16x128xf32>
    %cst_21 = arith.constant 0.000000e+00 : f32
    %43 = vector.broadcast %cst_21 : f32 to vector<1x16x128xf32>
    %44 = arith.cmpf oge, %42, %43 : vector<1x16x128xf32>
    %cst_22 = arith.constant 0.00999999977 : f32
    %45 = vector.broadcast %cst_22 : f32 to vector<1x16x128xf32>
    %46 = arith.mulf %45, %42 : vector<1x16x128xf32>
    %47 = arith.select %44, %42, %46 : vector<1x16x128xi1>, vector<1x16x128xf32>
    %cst_23 = arith.constant 0.000000e+00 : f32
    %48 = vector.broadcast %cst_23 : f32 to vector<1x16x128xf32>
    %49 = arith.select %38, %47, %48 : vector<1x16x128xf32>
    %50 = tpu.concatenate %37, %15, %49 in 0 : vector<1x16x128xf32>, vector<16x16x128xf32>, vector<1x16x128xf32> -> vector<18x16x128xf32>
    %cst_24 = arith.constant 0.000000e+00 : f32
    %51 = vector.broadcast %cst_24 : f32 to vector<18x1x128xf32>
    %52 = tpu.concatenate %51, %50, %51 in 1 : vector<18x1x128xf32>, vector<18x16x128xf32>, vector<18x1x128xf32> -> vector<18x18x128xf32>
    %53 = vector.extract_strided_slice %52 {offsets = [0, 0, 0], sizes = [18, 16, 128], strides = [1, 1, 1]} : vector<18x18x128xf32> to vector<18x16x128xf32>
    %54 = vector.extract_strided_slice %52 {offsets = [0, 1, 0], sizes = [18, 16, 128], strides = [1, 1, 1]} : vector<18x18x128xf32> to vector<18x16x128xf32>
    %55 = vector.extract_strided_slice %52 {offsets = [0, 2, 0], sizes = [18, 16, 128], strides = [1, 1, 1]} : vector<18x18x128xf32> to vector<18x16x128xf32>
    %56 = tpu.concatenate %53, %54, %55 in 2 : vector<18x16x128xf32>, vector<18x16x128xf32>, vector<18x16x128xf32> -> vector<18x16x384xf32>
    %57 = arith.truncf %56 : vector<18x16x384xf32> to vector<18x16x384xbf16>
    %58 = vector.shape_cast %57 : vector<18x16x384xbf16> to vector<288x384xbf16>
    %cst_25 = arith.constant 0.000000e+00 : f32
    %59 = vector.broadcast %cst_25 : f32 to vector<256x128xf32>
    %60 = vector.extract_strided_slice %58 {offsets = [0, 0], sizes = [256, 384], strides = [1, 1]} : vector<288x384xbf16> to vector<256x384xbf16>
    %c0_26 = arith.constant 0 : index
    %c0_27 = arith.constant 0 : index
    %c0_28 = arith.constant 0 : index
    %61 = vector.load %arg3[%c0_26, %c0_27, %c0_28] : memref<3x384x128xbf16, #tpu.memory_space<vmem>>, vector<1x384x128xbf16>
    %62 = vector.shape_cast %61 : vector<1x384x128xbf16> to vector<384x128xbf16>
    %cst_29 = arith.constant dense<0.000000e+00> : vector<256x128xf32>
    %63 = tpu.matmul %60, %62, %cst_29 {dimension_numbers = #tpu.dot_dimension_numbers<[1], [0], [0], [1], [0, 0, 1, 1], [], []>} : vector<256x384xbf16>, vector<384x128xbf16>, vector<256x128xf32> -> vector<256x128xf32>
    %64 = arith.addf %59, %63 : vector<256x128xf32>
    %65 = vector.extract_strided_slice %58 {offsets = [16, 0], sizes = [256, 384], strides = [1, 1]} : vector<288x384xbf16> to vector<256x384xbf16>
    %c1 = arith.constant 1 : index
    %c0_30 = arith.constant 0 : index
    %c0_31 = arith.constant 0 : index
    %66 = vector.load %arg3[%c1, %c0_30, %c0_31] : memref<3x384x128xbf16, #tpu.memory_space<vmem>>, vector<1x384x128xbf16>
    %67 = vector.shape_cast %66 : vector<1x384x128xbf16> to vector<384x128xbf16>
    %cst_32 = arith.constant dense<0.000000e+00> : vector<256x128xf32>
    %68 = tpu.matmul %65, %67, %cst_32 {dimension_numbers = #tpu.dot_dimension_numbers<[1], [0], [0], [1], [0, 0, 1, 1], [], []>} : vector<256x384xbf16>, vector<384x128xbf16>, vector<256x128xf32> -> vector<256x128xf32>
    %69 = arith.addf %64, %68 : vector<256x128xf32>
    %70 = vector.extract_strided_slice %58 {offsets = [32, 0], sizes = [256, 384], strides = [1, 1]} : vector<288x384xbf16> to vector<256x384xbf16>
    %c2 = arith.constant 2 : index
    %c0_33 = arith.constant 0 : index
    %c0_34 = arith.constant 0 : index
    %71 = vector.load %arg3[%c2, %c0_33, %c0_34] : memref<3x384x128xbf16, #tpu.memory_space<vmem>>, vector<1x384x128xbf16>
    %72 = vector.shape_cast %71 : vector<1x384x128xbf16> to vector<384x128xbf16>
    %cst_35 = arith.constant dense<0.000000e+00> : vector<256x128xf32>
    %73 = tpu.matmul %70, %72, %cst_35 {dimension_numbers = #tpu.dot_dimension_numbers<[1], [0], [0], [1], [0, 0, 1, 1], [], []>} : vector<256x384xbf16>, vector<384x128xbf16>, vector<256x128xf32> -> vector<256x128xf32>
    %74 = arith.addf %69, %73 : vector<256x128xf32>
    %75 = vector.shape_cast %74 : vector<256x128xf32> to vector<16x16x128xf32>
    %c0_36 = arith.constant 0 : index
    %c0_37 = arith.constant 0 : index
    %c0_38 = arith.constant 0 : index
    %c0_39 = arith.constant 0 : index
    %76 = vector.load %arg6[%c0_36, %c0_37, %c0_38, %c0_39] : memref<1x16x16x128xf32, #tpu.memory_space<vmem>>, vector<1x16x16x128xf32>
    %77 = vector.shape_cast %76 : vector<1x16x16x128xf32> to vector<16x16x128xf32>
    %78 = arith.addf %75, %77 : vector<16x16x128xf32>
    %c0_40 = arith.constant 0 : index
    %c0_41 = arith.constant 0 : index
    %c0_42 = arith.constant 0 : index
    %c0_43 = arith.constant 0 : index
    %79 = vector.load %arg7[%c0_40, %c0_41, %c0_42, %c0_43] : memref<1x16x16x128xf32, #tpu.memory_space<vmem>>, vector<1x16x16x128xf32>
    %80 = vector.shape_cast %79 : vector<1x16x16x128xf32> to vector<16x16x128xf32>
    %81 = vector.shape_cast %78 : vector<16x16x128xf32> to vector<1x16x16x128xf32>
    tpu.vector_store %arg7[%c0_40, %c0_41, %c0_42, %c0_43], %81 {strides = array<i32>} : memref<1x16x16x128xf32, #tpu.memory_space<vmem>>, vector<1x16x16x128xf32>,
    return
  }
  func.func @transform_0(%arg0: i32, %arg1: i32) -> (i32, i32, i32, i32) {
    %c0_i32 = arith.constant 0 : i32
    %c0_i32_0 = arith.constant 0 : i32
    %c0_i32_1 = arith.constant 0 : i32
    %c0_i32_2 = arith.constant 0 : i32
    return %arg0, %c0_i32, %c0_i32_0, %c0_i32_1 : i32, i32, i32, i32
  }
  func.func @transform_1(%arg0: i32, %arg1: i32) -> (i32, i32, i32) {
    %c0_i32 = arith.constant 0 : i32
    %c0_i32_0 = arith.constant 0 : i32
    %c0_i32_1 = arith.constant 0 : i32
    %c0_i32_2 = arith.constant 0 : i32
    return %c0_i32, %c0_i32_0, %c0_i32_1 : i32, i32, i32
  }
  func.func @transform_2(%arg0: i32, %arg1: i32) -> (i32, i32, i32) {
    %c0_i32 = arith.constant 0 : i32
    %c0_i32_0 = arith.constant 0 : i32
    %c0_i32_1 = arith.constant 0 : i32
    %c0_i32_2 = arith.constant 0 : i32
    return %c0_i32, %c0_i32_0, %c0_i32_1 : i32, i32, i32
  }
  func.func @transform_3(%arg0: i32, %arg1: i32) -> (i32, i32, i32) {
    %c0_i32 = arith.constant 0 : i32
    %c0_i32_0 = arith.constant 0 : i32
    %c0_i32_1 = arith.constant 0 : i32
    %c0_i32_2 = arith.constant 0 : i32
    return %c0_i32, %c0_i32_0, %c0_i32_1 : i32, i32, i32
  }
  func.func @transform_4(%arg0: i32, %arg1: i32) -> (i32, i32, i32, i32) {
    %c0_i32 = arith.constant 0 : i32
    %c0_i32_0 = arith.constant 0 : i32
    %c0_i32_1 = arith.constant 0 : i32
    return %arg0, %arg1, %c0_i32, %c0_i32_0 : i32, i32, i32, i32
  }
  func.func @transform_5(%arg0: i32, %arg1: i32) -> (i32, i32, i32, i32) {
    %c0_i32 = arith.constant 0 : i32
    %c0_i32_0 = arith.constant 0 : i32
    %c0_i32_1 = arith.constant 0 : i32
    return %arg0, %arg1, %c0_i32, %c0_i32_0 : i32, i32, i32, i32
  }
}

module attributes {stable_mosaic.version = 11 : i64} {
  func.func @kernel(%arg0: i32, %arg1: i32, %arg2: memref<1x16x16x128xf32, #tpu.memory_space<vmem>>, %arg3: memref<3x384x128xbf16, #tpu.memory_space<vmem>>, %arg4: memref<1x1x128xf32, #tpu.memory_space<vmem>>, %arg5: memref<1x1x128xf32, #tpu.memory_space<vmem>>, %arg6: memref<1x16x16x128xf32, #tpu.memory_space<vmem>>, %arg7: memref<1x8x128xf32, #tpu.memory_space<vmem>>) attributes {dimension_semantics = [#tpu.dimension_semantics<parallel>, #tpu.dimension_semantics<parallel>], iteration_bounds = array<i64: 2, 1>, scalar_prefetch = 0 : i64, scratch_operands = 0 : i64, tpu.core_type = #tpu.core_type<tc>, window_params = [{transform_indices = @transform_0, window_bounds = array<i64: 1, 16, 16, 128>}, {pipeline_mode = #tpu.pipeline_mode<synchronous>, transform_indices = @transform_1, window_bounds = array<i64: 3, 384, 128>}, {pipeline_mode = #tpu.pipeline_mode<synchronous>, transform_indices = @transform_2, window_bounds = array<i64: 1, 1, 128>}, {pipeline_mode = #tpu.pipeline_mode<synchronous>, transform_indices = @transform_3, window_bounds = array<i64: 1, 1, 128>}, {transform_indices = @transform_4, window_bounds = array<i64: 1, 16, 16, 128>}, {transform_indices = @transform_5, window_bounds = array<i64: 1, 8, 128>}]} {
    %c16_i32 = arith.constant 16 : i32
    %0 = arith.muli %arg1, %c16_i32 : i32
    %1 = tpu.assume_multiple %0, 16 : i32
    %c0 = arith.constant 0 : index
    %c0_0 = arith.constant 0 : index
    %c0_1 = arith.constant 0 : index
    %2 = vector.load %arg4[%c0, %c0_0, %c0_1] : memref<1x1x128xf32, #tpu.memory_space<vmem>>, vector<1x1x128xf32>
    %c0_2 = arith.constant 0 : index
    %c0_3 = arith.constant 0 : index
    %c0_4 = arith.constant 0 : index
    %3 = vector.load %arg5[%c0_2, %c0_3, %c0_4] : memref<1x1x128xf32, #tpu.memory_space<vmem>>, vector<1x1x128xf32>
    %c0_5 = arith.constant 0 : index
    %4 = arith.index_cast %1 : i32 to index
    %c0_6 = arith.constant 0 : index
    %c0_7 = arith.constant 0 : index
    %5 = vector.load %arg2[%c0_5, %4, %c0_6, %c0_7] : memref<1x16x16x128xf32, #tpu.memory_space<vmem>>, vector<1x16x16x128xf32>
    %6 = vector.shape_cast %5 : vector<1x16x16x128xf32> to vector<16x16x128xf32>
    %7 = vector.broadcast %2 : vector<1x1x128xf32> to vector<16x16x128xf32>
    %8 = arith.mulf %6, %7 : vector<16x16x128xf32>
    %9 = vector.broadcast %3 : vector<1x1x128xf32> to vector<16x16x128xf32>
    %10 = arith.addf %8, %9 : vector<16x16x128xf32>
    %cst = arith.constant 0.000000e+00 : f32
    %11 = vector.broadcast %cst : f32 to vector<16x16x128xf32>
    %12 = arith.cmpf oge, %10, %11 : vector<16x16x128xf32>
    %cst_8 = arith.constant 0.00999999977 : f32
    %13 = vector.broadcast %cst_8 : f32 to vector<16x16x128xf32>
    %14 = arith.mulf %13, %10 : vector<16x16x128xf32>
    %15 = arith.select %12, %10, %14 : vector<16x16x128xi1>, vector<16x16x128xf32>
    %c1_i32 = arith.constant 1 : i32
    %16 = arith.subi %1, %c1_i32 : i32
    %c0_i32 = arith.constant 0 : i32
    %17 = arith.maxsi %16, %c0_i32 : i32
    %c0_9 = arith.constant 0 : index
    %18 = arith.index_cast %17 : i32 to index
    %c0_10 = arith.constant 0 : index
    %c0_11 = arith.constant 0 : index
    %19 = vector.load %arg2[%c0_9, %18, %c0_10, %c0_11] : memref<1x16x16x128xf32, #tpu.memory_space<vmem>>, vector<1x1x16x128xf32>
    %20 = vector.shape_cast %19 : vector<1x1x16x128xf32> to vector<1x16x128xf32>
    %c16_i32_12 = arith.constant 16 : i32
    %21 = arith.addi %1, %c16_i32_12 : i32
    %c15_i32 = arith.constant 15 : i32
    %22 = arith.minsi %21, %c15_i32 : i32
    %c0_13 = arith.constant 0 : index
    %23 = arith.index_cast %22 : i32 to index
    %c0_14 = arith.constant 0 : index
    %c0_15 = arith.constant 0 : index
    %24 = vector.load %arg2[%c0_13, %23, %c0_14, %c0_15] : memref<1x16x16x128xf32, #tpu.memory_space<vmem>>, vector<1x1x16x128xf32>
    %25 = vector.shape_cast %24 : vector<1x1x16x128xf32> to vector<1x16x128xf32>
    %c0_i32_16 = arith.constant 0 : i32
    %26 = arith.cmpi sgt, %arg1, %c0_i32_16 : i32
    %27 = vector.broadcast %2 : vector<1x1x128xf32> to vector<1x16x128xf32>
    %28 = arith.mulf %20, %27 : vector<1x16x128xf32>
    %29 = vector.broadcast %3 : vector<1x1x128xf32> to vector<1x16x128xf32>
    %30 = arith.addf %28, %29 : vector<1x16x128xf32>
    %cst_17 = arith.constant 0.000000e+00 : f32
    %31 = vector.broadcast %cst_17 : f32 to vector<1x16x128xf32>
    %32 = arith.cmpf oge, %30, %31 : vector<1x16x128xf32>
    %cst_18 = arith.constant 0.00999999977 : f32
    %33 = vector.broadcast %cst_18 : f32 to vector<1x16x128xf32>
    %34 = arith.mulf %33, %30 : vector<1x16x128xf32>
    %35 = arith.select %32, %30, %34 : vector<1x16x128xi1>, vector<1x16x128xf32>
    %cst_19 = arith.constant 0.000000e+00 : f32
    %36 = vector.broadcast %cst_19 : f32 to vector<1x16x128xf32>
    %37 = arith.select %26, %35, %36 : vector<1x16x128xf32>
    %c0_i32_20 = arith.constant 0 : i32
    %38 = arith.cmpi slt, %arg1, %c0_i32_20 : i32
    %39 = vector.broadcast %2 : vector<1x1x128xf32> to vector<1x16x128xf32>
    %40 = arith.mulf %25, %39 : vector<1x16x128xf32>
    %41 = vector.broadcast %3 : vector<1x1x128xf32> to vector<1x16x128xf32>
    %42 = arith.addf %40, %41 : vector<1x16x128xf32>
    %cst_21 = arith.constant 0.000000e+00 : f32
    %43 = vector.broadcast %cst_21 : f32 to vector<1x16x128xf32>
    %44 = arith.cmpf oge, %42, %43 : vector<1x16x128xf32>
    %cst_22 = arith.constant 0.00999999977 : f32
    %45 = vector.broadcast %cst_22 : f32 to vector<1x16x128xf32>
    %46 = arith.mulf %45, %42 : vector<1x16x128xf32>
    %47 = arith.select %44, %42, %46 : vector<1x16x128xi1>, vector<1x16x128xf32>
    %cst_23 = arith.constant 0.000000e+00 : f32
    %48 = vector.broadcast %cst_23 : f32 to vector<1x16x128xf32>
    %49 = arith.select %38, %47, %48 : vector<1x16x128xf32>
    %50 = tpu.concatenate %37, %15, %49 in 0 : vector<1x16x128xf32>, vector<16x16x128xf32>, vector<1x16x128xf32> -> vector<18x16x128xf32>
    %cst_24 = arith.constant 0.000000e+00 : f32
    %51 = vector.broadcast %cst_24 : f32 to vector<18x1x128xf32>
    %52 = tpu.concatenate %51, %50, %51 in 1 : vector<18x1x128xf32>, vector<18x16x128xf32>, vector<18x1x128xf32> -> vector<18x18x128xf32>
    %53 = vector.extract_strided_slice %52 {offsets = [0, 0, 0], sizes = [18, 16, 128], strides = [1, 1, 1]} : vector<18x18x128xf32> to vector<18x16x128xf32>
    %54 = vector.extract_strided_slice %52 {offsets = [0, 1, 0], sizes = [18, 16, 128], strides = [1, 1, 1]} : vector<18x18x128xf32> to vector<18x16x128xf32>
    %55 = vector.extract_strided_slice %52 {offsets = [0, 2, 0], sizes = [18, 16, 128], strides = [1, 1, 1]} : vector<18x18x128xf32> to vector<18x16x128xf32>
    %56 = tpu.concatenate %53, %54, %55 in 2 : vector<18x16x128xf32>, vector<18x16x128xf32>, vector<18x16x128xf32> -> vector<18x16x384xf32>
    %57 = arith.truncf %56 : vector<18x16x384xf32> to vector<18x16x384xbf16>
    %58 = vector.shape_cast %57 : vector<18x16x384xbf16> to vector<288x384xbf16>
    %cst_25 = arith.constant 0.000000e+00 : f32
    %59 = vector.broadcast %cst_25 : f32 to vector<256x128xf32>
    %60 = vector.extract_strided_slice %58 {offsets = [0, 0], sizes = [256, 384], strides = [1, 1]} : vector<288x384xbf16> to vector<256x384xbf16>
    %c0_26 = arith.constant 0 : index
    %c0_27 = arith.constant 0 : index
    %c0_28 = arith.constant 0 : index
    %61 = vector.load %arg3[%c0_26, %c0_27, %c0_28] : memref<3x384x128xbf16, #tpu.memory_space<vmem>>, vector<1x384x128xbf16>
    %62 = vector.shape_cast %61 : vector<1x384x128xbf16> to vector<384x128xbf16>
    %cst_29 = arith.constant dense<0.000000e+00> : vector<256x128xf32>
    %63 = tpu.matmul %60, %62, %cst_29 {dimension_numbers = #tpu.dot_dimension_numbers<[1], [0], [0], [1], [0, 0, 1, 1], [], []>} : vector<256x384xbf16>, vector<384x128xbf16>, vector<256x128xf32> -> vector<256x128xf32>
    %64 = arith.addf %59, %63 : vector<256x128xf32>
    %65 = vector.extract_strided_slice %58 {offsets = [16, 0], sizes = [256, 384], strides = [1, 1]} : vector<288x384xbf16> to vector<256x384xbf16>
    %c1 = arith.constant 1 : index
    %c0_30 = arith.constant 0 : index
    %c0_31 = arith.constant 0 : index
    %66 = vector.load %arg3[%c1, %c0_30, %c0_31] : memref<3x384x128xbf16, #tpu.memory_space<vmem>>, vector<1x384x128xbf16>
    %67 = vector.shape_cast %66 : vector<1x384x128xbf16> to vector<384x128xbf16>
    %cst_32 = arith.constant dense<0.000000e+00> : vector<256x128xf32>
    %68 = tpu.matmul %65, %67, %cst_32 {dimension_numbers = #tpu.dot_dimension_numbers<[1], [0], [0], [1], [0, 0, 1, 1], [], []>} : vector<256x384xbf16>, vector<384x128xbf16>, vector<256x128xf32> -> vector<256x128xf32>
    %69 = arith.addf %64, %68 : vector<256x128xf32>
    %70 = vector.extract_strided_slice %58 {offsets = [32, 0], sizes = [256, 384], strides = [1, 1]} : vector<288x384xbf16> to vector<256x384xbf16>
    %c2 = arith.constant 2 : index
    %c0_33 = arith.constant 0 : index
    %c0_34 = arith.constant 0 : index
    %71 = vector.load %arg3[%c2, %c0_33, %c0_34] : memref<3x384x128xbf16, #tpu.memory_space<vmem>>, vector<1x384x128xbf16>
    %72 = vector.shape_cast %71 : vector<1x384x128xbf16> to vector<384x128xbf16>
    %cst_35 = arith.constant dense<0.000000e+00> : vector<256x128xf32>
    %73 = tpu.matmul %70, %72, %cst_35 {dimension_numbers = #tpu.dot_dimension_numbers<[1], [0], [0], [1], [0, 0, 1, 1], [], []>} : vector<256x384xbf16>, vector<384x128xbf16>, vector<256x128xf32> -> vector<256x128xf32>
    %74 = arith.addf %69, %73 : vector<256x128xf32>
    %cst_36 = arith.constant dense<0.000000e+00> : vector<128xf32>
    %75 = vector.multi_reduction <add>, %74, %cst_36 [0] : vector<256x128xf32> to vector<128xf32>
    %76 = vector.shape_cast %75 : vector<128xf32> to vector<1x128xf32>
    %77 = arith.mulf %74, %74 : vector<256x128xf32>
    %cst_37 = arith.constant dense<0.000000e+00> : vector<128xf32>
    %78 = vector.multi_reduction <add>, %77, %cst_37 [0] : vector<256x128xf32> to vector<128xf32>
    %79 = vector.shape_cast %78 : vector<128xf32> to vector<1x128xf32>
    %cst_38 = arith.constant 0.000000e+00 : f32
    %80 = vector.broadcast %cst_38 : f32 to vector<6x128xf32>
    %81 = tpu.concatenate %76, %79, %80 in 0 : vector<1x128xf32>, vector<1x128xf32>, vector<6x128xf32> -> vector<8x128xf32>
    %c0_39 = arith.constant 0 : index
    %c0_40 = arith.constant 0 : index
    %c0_41 = arith.constant 0 : index
    %82 = vector.load %arg7[%c0_39, %c0_40, %c0_41] : memref<1x8x128xf32, #tpu.memory_space<vmem>>, vector<1x8x128xf32>
    %83 = vector.shape_cast %82 : vector<1x8x128xf32> to vector<8x128xf32>
    %84 = vector.shape_cast %81 : vector<8x128xf32> to vector<1x8x128xf32>
    tpu.vector_store %arg7[%c0_39, %c0_40, %c0_41], %84 {strides = array<i32>} : memref<1x8x128xf32, #tpu.memory_space<vmem>>, vector<1x8x128xf32>,
    %85 = vector.shape_cast %74 : vector<256x128xf32> to vector<16x16x128xf32>
    %c0_42 = arith.constant 0 : index
    %c0_43 = arith.constant 0 : index
    %c0_44 = arith.constant 0 : index
    %c0_45 = arith.constant 0 : index
    %86 = vector.load %arg6[%c0_42, %c0_43, %c0_44, %c0_45] : memref<1x16x16x128xf32, #tpu.memory_space<vmem>>, vector<1x16x16x128xf32>
    %87 = vector.shape_cast %86 : vector<1x16x16x128xf32> to vector<16x16x128xf32>
    %88 = vector.shape_cast %85 : vector<16x16x128xf32> to vector<1x16x16x128xf32>
    tpu.vector_store %arg6[%c0_42, %c0_43, %c0_44, %c0_45], %88 {strides = array<i32>} : memref<1x16x16x128xf32, #tpu.memory_space<vmem>>, vector<1x16x16x128xf32>,
    return
  }
  func.func @transform_0(%arg0: i32, %arg1: i32) -> (i32, i32, i32, i32) {
    %c0_i32 = arith.constant 0 : i32
    %c0_i32_0 = arith.constant 0 : i32
    %c0_i32_1 = arith.constant 0 : i32
    %c0_i32_2 = arith.constant 0 : i32
    return %arg0, %c0_i32, %c0_i32_0, %c0_i32_1 : i32, i32, i32, i32
  }
  func.func @transform_1(%arg0: i32, %arg1: i32) -> (i32, i32, i32) {
    %c0_i32 = arith.constant 0 : i32
    %c0_i32_0 = arith.constant 0 : i32
    %c0_i32_1 = arith.constant 0 : i32
    %c0_i32_2 = arith.constant 0 : i32
    return %c0_i32, %c0_i32_0, %c0_i32_1 : i32, i32, i32
  }
  func.func @transform_2(%arg0: i32, %arg1: i32) -> (i32, i32, i32) {
    %c0_i32 = arith.constant 0 : i32
    %c0_i32_0 = arith.constant 0 : i32
    %c0_i32_1 = arith.constant 0 : i32
    %c0_i32_2 = arith.constant 0 : i32
    return %c0_i32, %c0_i32_0, %c0_i32_1 : i32, i32, i32
  }
  func.func @transform_3(%arg0: i32, %arg1: i32) -> (i32, i32, i32) {
    %c0_i32 = arith.constant 0 : i32
    %c0_i32_0 = arith.constant 0 : i32
    %c0_i32_1 = arith.constant 0 : i32
    %c0_i32_2 = arith.constant 0 : i32
    return %c0_i32, %c0_i32_0, %c0_i32_1 : i32, i32, i32
  }
  func.func @transform_4(%arg0: i32, %arg1: i32) -> (i32, i32, i32, i32) {
    %c0_i32 = arith.constant 0 : i32
    %c0_i32_0 = arith.constant 0 : i32
    %c0_i32_1 = arith.constant 0 : i32
    return %arg0, %arg1, %c0_i32, %c0_i32_0 : i32, i32, i32, i32
  }
  func.func @transform_5(%arg0: i32, %arg1: i32) -> (i32, i32, i32) {
    %c1_i32 = arith.constant 1 : i32
    %0 = arith.muli %arg0, %c1_i32 : i32
    %1 = arith.addi %0, %arg1 : i32
    %c0_i32 = arith.constant 0 : i32
    %c0_i32_0 = arith.constant 0 : i32
    %c0_i32_1 = arith.constant 0 : i32
    return %1, %c0_i32, %c0_i32_0 : i32, i32, i32
  }
}

</mosaic_0001>

<bundles_post_ra>
// kernel: res_forward.3
= control target key start
LH: loop header
LB: loop body
LE: loop exit
PB: predicated region body
PF: predicated region fallthrough
CT: control target
= control target key end

     0   :  { %v297_v0 = vmov 0.0   ;;  %s523_s0 = inlined_call_operand.vmem [shape: f32[512,128], index: 0, kind: input, shape index: {}]   ;;  %s524_s1 = inlined_call_operand.vmem [shape: f32[1,128], index: 1, kind: output, shape index: {0}]   ;;  %s525_s2 = inlined_call_operand.vmem [shape: f32[1,128], index: 2, kind: output, shape index: {1}]  }
   0x1   :  { %14 = vst [vmem:[%s524_s1] sm:$0x1] %v297_v0  ;;  %15 = vst [vmem:[%s525_s2] sm:$0x1] %v297_v0  ;;  %v16_v1 = vld [vmem:[%s523_s0] sm:$0xff]  ;;  %v17_v2 = vld [vmem:[%s523_s0 + $0x8] sm:$0xff] }
   0x2   :  { %v18_v3 = vld [vmem:[%s523_s0 + $0x10] sm:$0xff]  ;;  %v19_v4 = vld [vmem:[%s523_s0 + $0x18] sm:$0xff]  ;;  %v81_v5 = vadd.f32 %v17_v2, %v16_v1  ;;  %v153_v6 = vmul.f32 %v16_v1, %v16_v1  ;;  %v154_v7 = vmul.f32 %v17_v2, %v17_v2  ;;  %v20_v9 = vld [vmem:[%s523_s0 + $0x20] sm:$0xff] }
   0x3   :  { %v155_v8 = vmul.f32 %v18_v3, %v18_v3  ;;  %v156_v11 = vmul.f32 %v19_v4, %v19_v4  ;;  %v21_v13 = vld [vmem:[%s523_s0 + $0x28] sm:$0xff]  ;;  %v157_v15 = vmul.f32 %v20_v9, %v20_v9  ;;  %v22_v17 = vld [vmem:[%s523_s0 + $0x30] sm:$0xff]  ;;  %v23_v21 = vld [vmem:[%s523_s0 + $0x38] sm:$0xff] }
   0x4   :  { %v82_v10 = vadd.f32 %v81_v5, %v18_v3  ;;  %v217_v12 = vadd.f32 %v154_v7, %v153_v6  ;;  %v158_v19 = vmul.f32 %v21_v13, %v21_v13  ;;  %v159_v23 = vmul.f32 %v22_v17, %v22_v17  ;;  %v24_v25 = vld [vmem:[%s523_s0 + $0x40] sm:$0xff]  ;;  %v25_v29 = vld [vmem:[%s523_s0 + $0x48] sm:$0xff]  ;;  %v26_v33 = vld [vmem:[%s523_s0 + $0x50] sm:$0xff] }
   0x5   :  { %v160_v27 = vmul.f32 %v23_v21, %v23_v21  ;;  %v161_v31 = vmul.f32 %v24_v25, %v24_v25  ;;  %v162_v35 = vmul.f32 %v25_v29, %v25_v29  ;;  %v27_v37 = vld [vmem:[%s523_s0 + $0x58] sm:$0xff]  ;;  %v163_v39 = vmul.f32 %v26_v33, %v26_v33  ;;  %v28_v41 = vld [vmem:[%s523_s0 + $0x60] sm:$0xff]  ;;  %v29_v45 = vld [vmem:[%s523_s0 + $0x68] sm:$0xff] }
   0x6   :  { %v83_v14 = vadd.f32 %v82_v10, %v19_v4  ;;  %v218_v16 = vadd.f32 %v217_v12, %v155_v8  ;;  %v164_v43 = vmul.f32 %v27_v37, %v27_v37  ;;  %v165_v47 = vmul.f32 %v28_v41, %v28_v41  ;;  %v30_v49 = vld [vmem:[%s523_s0 + $0x70] sm:$0xff]  ;;  %v31_v53 = vld [vmem:[%s523_s0 + $0x78] sm:$0xff]  ;;  %v32_v57 = vld [vmem:[%s523_s0 + $0x80] sm:$0xff] }
   0x7   :  { %v166_v51 = vmul.f32 %v29_v45, %v29_v45  ;;  %v167_v55 = vmul.f32 %v30_v49, %v30_v49  ;;  %v168_v59 = vmul.f32 %v31_v53, %v31_v53  ;;  %v33_v61 = vld [vmem:[%s523_s0 + $0x88] sm:$0xff]  ;;  %v169_v63 = vmul.f32 %v32_v57, %v32_v57  ;;  %v34_v1 = vld [vmem:[%s523_s0 + $0x90] sm:$0xff]  ;;  %v35_v5 = vld [vmem:[%s523_s0 + $0x98] sm:$0xff] }
   0x8   :  { %v84_v18 = vadd.f32 %v83_v14, %v20_v9  ;;  %v219_v20 = vadd.f32 %v218_v16, %v156_v11  ;;  %v170_v3 = vmul.f32 %v33_v61, %v33_v61  ;;  %v171_v7 = vmul.f32 %v34_v1, %v34_v1  ;;  %v36_v9 = vld [vmem:[%s523_s0 + $0xa0] sm:$0xff] }
   0x9   :  { %v172_v11 = vmul.f32 %v35_v5, %v35_v5 }
   0xa   :  { %v85_v22 = vadd.f32 %v84_v18, %v21_v13  ;;  %v220_v24 = vadd.f32 %v219_v20, %v157_v15  ;;  %v37_v13 = vld [vmem:[%s523_s0 + $0xa8] sm:$0xff]  ;;  %v173_v15 = vmul.f32 %v36_v9, %v36_v9 }
   0xc   :  { %v86_v26 = vadd.f32 %v85_v22, %v22_v17  ;;  %v221_v28 = vadd.f32 %v220_v24, %v158_v19  ;;  %v38_v17 = vld [vmem:[%s523_s0 + $0xb0] sm:$0xff]  ;;  %v174_v19 = vmul.f32 %v37_v13, %v37_v13 }
   0xe   :  { %v87_v30 = vadd.f32 %v86_v26, %v23_v21  ;;  %v222_v32 = vadd.f32 %v221_v28, %v159_v23  ;;  %v39_v21 = vld [vmem:[%s523_s0 + $0xb8] sm:$0xff]  ;;  %v175_v23 = vmul.f32 %v38_v17, %v38_v17 }
  0x10   :  { %v88_v34 = vadd.f32 %v87_v30, %v24_v25  ;;  %v223_v36 = vadd.f32 %v222_v32, %v160_v27  ;;  %v40_v25 = vld [vmem:[%s523_s0 + $0xc0] sm:$0xff]  ;;  %v176_v27 = vmul.f32 %v39_v21, %v39_v21 }
  0x12   :  { %v89_v38 = vadd.f32 %v88_v34, %v25_v29  ;;  %v224_v40 = vadd.f32 %v223_v36, %v161_v31  ;;  %v41_v29 = vld [vmem:[%s523_s0 + $0xc8] sm:$0xff]  ;;  %v177_v31 = vmul.f32 %v40_v25, %v40_v25 }
  0x14   :  { %v90_v42 = vadd.f32 %v89_v38, %v26_v33  ;;  %v225_v44 = vadd.f32 %v224_v40, %v162_v35  ;;  %v42_v33 = vld [vmem:[%s523_s0 + $0xd0] sm:$0xff]  ;;  %v178_v35 = vmul.f32 %v41_v29, %v41_v29 }
  0x16   :  { %v91_v46 = vadd.f32 %v90_v42, %v27_v37  ;;  %v226_v48 = vadd.f32 %v225_v44, %v163_v39  ;;  %v43_v37 = vld [vmem:[%s523_s0 + $0xd8] sm:$0xff]  ;;  %v179_v39 = vmul.f32 %v42_v33, %v42_v33 }
  0x18   :  { %v92_v50 = vadd.f32 %v91_v46, %v28_v41  ;;  %v227_v52 = vadd.f32 %v226_v48, %v164_v43  ;;  %v44_v41 = vld [vmem:[%s523_s0 + $0xe0] sm:$0xff]  ;;  %v180_v43 = vmul.f32 %v43_v37, %v43_v37 }
  0x1a   :  { %v93_v54 = vadd.f32 %v92_v50, %v29_v45  ;;  %v228_v56 = vadd.f32 %v227_v52, %v165_v47  ;;  %v45_v45 = vld [vmem:[%s523_s0 + $0xe8] sm:$0xff]  ;;  %v181_v47 = vmul.f32 %v44_v41, %v44_v41 }
  0x1c   :  { %v94_v58 = vadd.f32 %v93_v54, %v30_v49  ;;  %v229_v60 = vadd.f32 %v228_v56, %v166_v51  ;;  %v46_v49 = vld [vmem:[%s523_s0 + $0xf0] sm:$0xff]  ;;  %v182_v51 = vmul.f32 %v45_v45, %v45_v45 }
  0x1e   :  { %v95_v62 = vadd.f32 %v94_v58, %v31_v53  ;;  %v230_v0 = vadd.f32 %v229_v60, %v167_v55  ;;  %v47_v53 = vld [vmem:[%s523_s0 + $0xf8] sm:$0xff]  ;;  %v183_v55 = vmul.f32 %v46_v49, %v46_v49 }
  0x20   :  { %v96_v2 = vadd.f32 %v95_v62, %v32_v57  ;;  %v231_v4 = vadd.f32 %v230_v0, %v168_v59  ;;  %v48_v57 = vld [vmem:[%s523_s0 + $0x100] sm:$0xff]  ;;  %v184_v59 = vmul.f32 %v47_v53, %v47_v53 }
  0x22   :  { %v97_v6 = vadd.f32 %v96_v2, %v33_v61  ;;  %v232_v8 = vadd.f32 %v231_v4, %v169_v63  ;;  %v49_v61 = vld [vmem:[%s523_s0 + $0x108] sm:$0xff]  ;;  %v185_v63 = vmul.f32 %v48_v57, %v48_v57 }
  0x24   :  { %v98_v10 = vadd.f32 %v97_v6, %v34_v1  ;;  %v233_v12 = vadd.f32 %v232_v8, %v170_v3  ;;  %v50_v1 = vld [vmem:[%s523_s0 + $0x110] sm:$0xff]  ;;  %v186_v3 = vmul.f32 %v49_v61, %v49_v61 }
  0x26   :  { %v99_v14 = vadd.f32 %v98_v10, %v35_v5  ;;  %v234_v16 = vadd.f32 %v233_v12, %v171_v7  ;;  %v51_v5 = vld [vmem:[%s523_s0 + $0x118] sm:$0xff]  ;;  %v187_v7 = vmul.f32 %v50_v1, %v50_v1 }
  0x28   :  { %v100_v18 = vadd.f32 %v99_v14, %v36_v9  ;;  %v235_v20 = vadd.f32 %v234_v16, %v172_v11  ;;  %v52_v9 = vld [vmem:[%s523_s0 + $0x120] sm:$0xff]  ;;  %v188_v11 = vmul.f32 %v51_v5, %v51_v5 }
  0x2a   :  { %v101_v22 = vadd.f32 %v100_v18, %v37_v13  ;;  %v236_v24 = vadd.f32 %v235_v20, %v173_v15  ;;  %v53_v13 = vld [vmem:[%s523_s0 + $0x128] sm:$0xff]  ;;  %v189_v15 = vmul.f32 %v52_v9, %v52_v9 }
  0x2c   :  { %v102_v26 = vadd.f32 %v101_v22, %v38_v17  ;;  %v237_v28 = vadd.f32 %v236_v24, %v174_v19  ;;  %v54_v17 = vld [vmem:[%s523_s0 + $0x130] sm:$0xff]  ;;  %v190_v19 = vmul.f32 %v53_v13, %v53_v13 }
  0x2e   :  { %v103_v30 = vadd.f32 %v102_v26, %v39_v21  ;;  %v238_v32 = vadd.f32 %v237_v28, %v175_v23  ;;  %v55_v21 = vld [vmem:[%s523_s0 + $0x138] sm:$0xff]  ;;  %v191_v23 = vmul.f32 %v54_v17, %v54_v17 }
  0x30   :  { %v104_v34 = vadd.f32 %v103_v30, %v40_v25  ;;  %v239_v36 = vadd.f32 %v238_v32, %v176_v27  ;;  %v56_v25 = vld [vmem:[%s523_s0 + $0x140] sm:$0xff]  ;;  %v192_v27 = vmul.f32 %v55_v21, %v55_v21 }
  0x32   :  { %v105_v38 = vadd.f32 %v104_v34, %v41_v29  ;;  %v240_v40 = vadd.f32 %v239_v36, %v177_v31  ;;  %v57_v29 = vld [vmem:[%s523_s0 + $0x148] sm:$0xff]  ;;  %v193_v31 = vmul.f32 %v56_v25, %v56_v25 }
  0x34   :  { %v106_v42 = vadd.f32 %v105_v38, %v42_v33  ;;  %v241_v44 = vadd.f32 %v240_v40, %v178_v35  ;;  %v58_v33 = vld [vmem:[%s523_s0 + $0x150] sm:$0xff]  ;;  %v194_v35 = vmul.f32 %v57_v29, %v57_v29 }
  0x36   :  { %v107_v46 = vadd.f32 %v106_v42, %v43_v37  ;;  %v242_v48 = vadd.f32 %v241_v44, %v179_v39  ;;  %v59_v37 = vld [vmem:[%s523_s0 + $0x158] sm:$0xff]  ;;  %v195_v39 = vmul.f32 %v58_v33, %v58_v33 }
  0x38   :  { %v108_v50 = vadd.f32 %v107_v46, %v44_v41  ;;  %v243_v52 = vadd.f32 %v242_v48, %v180_v43  ;;  %v60_v41 = vld [vmem:[%s523_s0 + $0x160] sm:$0xff]  ;;  %v196_v43 = vmul.f32 %v59_v37, %v59_v37 }
  0x3a   :  { %v109_v54 = vadd.f32 %v108_v50, %v45_v45  ;;  %v244_v56 = vadd.f32 %v243_v52, %v181_v47  ;;  %v61_v45 = vld [vmem:[%s523_s0 + $0x168] sm:$0xff]  ;;  %v197_v47 = vmul.f32 %v60_v41, %v60_v41 }
  0x3c   :  { %v110_v58 = vadd.f32 %v109_v54, %v46_v49  ;;  %v245_v60 = vadd.f32 %v244_v56, %v182_v51  ;;  %v62_v49 = vld [vmem:[%s523_s0 + $0x170] sm:$0xff]  ;;  %v198_v51 = vmul.f32 %v61_v45, %v61_v45 }
  0x3e   :  { %v111_v62 = vadd.f32 %v110_v58, %v47_v53  ;;  %v246_v0 = vadd.f32 %v245_v60, %v183_v55  ;;  %v63_v53 = vld [vmem:[%s523_s0 + $0x178] sm:$0xff]  ;;  %v199_v55 = vmul.f32 %v62_v49, %v62_v49 }
  0x40   :  { %v112_v2 = vadd.f32 %v111_v62, %v48_v57  ;;  %v247_v4 = vadd.f32 %v246_v0, %v184_v59  ;;  %v64_v57 = vld [vmem:[%s523_s0 + $0x180] sm:$0xff]  ;;  %v200_v59 = vmul.f32 %v63_v53, %v63_v53 }
  0x42   :  { %v113_v6 = vadd.f32 %v112_v2, %v49_v61  ;;  %v248_v8 = vadd.f32 %v247_v4, %v185_v63  ;;  %v65_v61 = vld [vmem:[%s523_s0 + $0x188] sm:$0xff]  ;;  %v201_v63 = vmul.f32 %v64_v57, %v64_v57 }
  0x44   :  { %v114_v10 = vadd.f32 %v113_v6, %v50_v1  ;;  %v249_v12 = vadd.f32 %v248_v8, %v186_v3  ;;  %v66_v1 = vld [vmem:[%s523_s0 + $0x190] sm:$0xff]  ;;  %v202_v3 = vmul.f32 %v65_v61, %v65_v61 }
  0x46   :  { %v115_v14 = vadd.f32 %v114_v10, %v51_v5  ;;  %v250_v16 = vadd.f32 %v249_v12, %v187_v7  ;;  %v67_v5 = vld [vmem:[%s523_s0 + $0x198] sm:$0xff]  ;;  %v203_v7 = vmul.f32 %v66_v1, %v66_v1 }
  0x48   :  { %v116_v18 = vadd.f32 %v115_v14, %v52_v9  ;;  %v251_v20 = vadd.f32 %v250_v16, %v188_v11  ;;  %v68_v9 = vld [vmem:[%s523_s0 + $0x1a0] sm:$0xff]  ;;  %v204_v11 = vmul.f32 %v67_v5, %v67_v5 }
  0x4a   :  { %v117_v22 = vadd.f32 %v116_v18, %v53_v13  ;;  %v252_v24 = vadd.f32 %v251_v20, %v189_v15  ;;  %v69_v13 = vld [vmem:[%s523_s0 + $0x1a8] sm:$0xff]  ;;  %v205_v15 = vmul.f32 %v68_v9, %v68_v9 }
  0x4c   :  { %v118_v26 = vadd.f32 %v117_v22, %v54_v17  ;;  %v253_v28 = vadd.f32 %v252_v24, %v190_v19  ;;  %v70_v17 = vld [vmem:[%s523_s0 + $0x1b0] sm:$0xff]  ;;  %v206_v19 = vmul.f32 %v69_v13, %v69_v13 }
  0x4e   :  { %v119_v30 = vadd.f32 %v118_v26, %v55_v21  ;;  %v254_v32 = vadd.f32 %v253_v28, %v191_v23  ;;  %v71_v21 = vld [vmem:[%s523_s0 + $0x1b8] sm:$0xff]  ;;  %v207_v23 = vmul.f32 %v70_v17, %v70_v17 }
  0x50   :  { %v120_v34 = vadd.f32 %v119_v30, %v56_v25  ;;  %v255_v36 = vadd.f32 %v254_v32, %v192_v27  ;;  %v72_v25 = vld [vmem:[%s523_s0 + $0x1c0] sm:$0xff]  ;;  %v208_v27 = vmul.f32 %v71_v21, %v71_v21 }
  0x52   :  { %v121_v38 = vadd.f32 %v120_v34, %v57_v29  ;;  %v256_v40 = vadd.f32 %v255_v36, %v193_v31  ;;  %v73_v29 = vld [vmem:[%s523_s0 + $0x1c8] sm:$0xff]  ;;  %v209_v31 = vmul.f32 %v72_v25, %v72_v25 }
  0x54   :  { %v122_v42 = vadd.f32 %v121_v38, %v58_v33  ;;  %v257_v44 = vadd.f32 %v256_v40, %v194_v35  ;;  %v74_v33 = vld [vmem:[%s523_s0 + $0x1d0] sm:$0xff]  ;;  %v210_v35 = vmul.f32 %v73_v29, %v73_v29 }
  0x56   :  { %v123_v46 = vadd.f32 %v122_v42, %v59_v37  ;;  %v258_v48 = vadd.f32 %v257_v44, %v195_v39  ;;  %v75_v37 = vld [vmem:[%s523_s0 + $0x1d8] sm:$0xff]  ;;  %v211_v39 = vmul.f32 %v74_v33, %v74_v33 }
  0x58   :  { %v124_v50 = vadd.f32 %v123_v46, %v60_v41  ;;  %v259_v52 = vadd.f32 %v258_v48, %v196_v43  ;;  %v76_v41 = vld [vmem:[%s523_s0 + $0x1e0] sm:$0xff]  ;;  %v212_v43 = vmul.f32 %v75_v37, %v75_v37 }
  0x5a   :  { %v125_v54 = vadd.f32 %v124_v50, %v61_v45  ;;  %v260_v56 = vadd.f32 %v259_v52, %v197_v47  ;;  %v77_v45 = vld [vmem:[%s523_s0 + $0x1e8] sm:$0xff]  ;;  %v213_v47 = vmul.f32 %v76_v41, %v76_v41 }
  0x5c   :  { %v126_v58 = vadd.f32 %v125_v54, %v62_v49  ;;  %v261_v60 = vadd.f32 %v260_v56, %v198_v51  ;;  %v78_v49 = vld [vmem:[%s523_s0 + $0x1f0] sm:$0xff]  ;;  %v214_v51 = vmul.f32 %v77_v45, %v77_v45 }
  0x5e   :  { %v127_v62 = vadd.f32 %v126_v58, %v63_v53  ;;  %v262_v0 = vadd.f32 %v261_v60, %v199_v55  ;;  %v79_v53 = vld [vmem:[%s523_s0 + $0x1f8] sm:$0xff]  ;;  %v215_v55 = vmul.f32 %v78_v49, %v78_v49 }
  0x5f   :  { %v216_v58 = vmul.f32 %v79_v53, %v79_v53 }
  0x60   :  { %v128_v2 = vadd.f32 %v127_v62, %v64_v57  ;;  %v263_v4 = vadd.f32 %v262_v0, %v200_v59 }
  0x62   :  { %v129_v6 = vadd.f32 %v128_v2, %v65_v61  ;;  %v264_v8 = vadd.f32 %v263_v4, %v201_v63 }
  0x64   :  { %v130_v10 = vadd.f32 %v129_v6, %v66_v1  ;;  %v265_v12 = vadd.f32 %v264_v8, %v202_v3 }
  0x66   :  { %v131_v14 = vadd.f32 %v130_v10, %v67_v5  ;;  %v266_v16 = vadd.f32 %v265_v12, %v203_v7  ;;  %v80_v7 = vld [vmem:[%s524_s1] sm:$0x1] }
  0x67   :  { %v152_v12 = vld [vmem:[%s525_s2] sm:$0x1] }
  0x68   :  { %v132_v18 = vadd.f32 %v131_v14, %v68_v9  ;;  %v267_v20 = vadd.f32 %v266_v16, %v204_v11 }
  0x6a   :  { %v133_v22 = vadd.f32 %v132_v18, %v69_v13  ;;  %v268_v24 = vadd.f32 %v267_v20, %v205_v15 }
  0x6c   :  { %v134_v26 = vadd.f32 %v133_v22, %v70_v17  ;;  %v269_v28 = vadd.f32 %v268_v24, %v206_v19 }
  0x6e   :  { %v135_v30 = vadd.f32 %v134_v26, %v71_v21  ;;  %v270_v32 = vadd.f32 %v269_v28, %v207_v23 }
  0x70   :  { %v136_v34 = vadd.f32 %v135_v30, %v72_v25  ;;  %v271_v36 = vadd.f32 %v270_v32, %v208_v27 }
  0x72   :  { %v137_v38 = vadd.f32 %v136_v34, %v73_v29  ;;  %v272_v40 = vadd.f32 %v271_v36, %v209_v31 }
  0x74   :  { %v138_v42 = vadd.f32 %v137_v38, %v74_v33  ;;  %v273_v44 = vadd.f32 %v272_v40, %v210_v35 }
  0x76   :  { %v139_v46 = vadd.f32 %v138_v42, %v75_v37  ;;  %v274_v48 = vadd.f32 %v273_v44, %v211_v39 }
  0x78   :  { %v140_v50 = vadd.f32 %v139_v46, %v76_v41  ;;  %v275_v52 = vadd.f32 %v274_v48, %v212_v43 }
  0x7a   :  { %v141_v54 = vadd.f32 %v140_v50, %v77_v45  ;;  %v276_v56 = vadd.f32 %v275_v52, %v213_v47 }
  0x7c   :  { %v142_v57 = vadd.f32 %v141_v54, %v78_v49  ;;  %v277_v59 = vadd.f32 %v276_v56, %v214_v51 }
  0x7e   :  { %v143_v60 = vadd.f32 %v142_v57, %v79_v53  ;;  %v278_v61 = vadd.f32 %v277_v59, %v215_v55 }
  0x80   :  { %v144_v62 = vrot.slane %v143_v60, 4  ;;  %v279_v63 = vadd.f32 %v278_v61, %v216_v58 }
  0x82   :  { %v145_v0 = vadd.f32 %v144_v62, %v143_v60  ;;  %v280_v1 = vrot.slane %v279_v63, 4 }
  0x84   :  { %v146_v2 = vrot.slane %v145_v0, 2  ;;  %v281_v3 = vadd.f32 %v280_v1, %v279_v63 }
  0x86   :  { %v147_v4 = vadd.f32 %v146_v2, %v145_v0  ;;  %v282_v5 = vrot.slane %v281_v3, 2 }
  0x88   :  { %v148_v6 = vrot.slane %v147_v4, 1  ;;  %v283_v8 = vadd.f32 %v282_v5, %v281_v3 }
  0x8a   :  { %v149_v9 = vadd.f32 %v148_v6, %v147_v4  ;;  %v284_v10 = vrot.slane %v283_v8, 1 }
  0x8c   :  { %v150_v11 = vadd.f32 %v149_v9, %v80_v7  ;;  %v285_v13 = vadd.f32 %v284_v10, %v283_v8 }
  0x8e   :  { %151 = vst [vmem:[%s524_s1] sm:$0x1] %v150_v11  ;;  %v286_v14 = vadd.f32 %v285_v13, %v152_v12 }
  0x90   :  { %287 = vst [vmem:[%s525_s2] sm:$0x1] %v286_v14 }

// kernel: res_forward.5
= control target key start
LH: loop header
LB: loop body
LE: loop exit
PB: predicated region body
PF: predicated region fallthrough
CT: control target
= control target key end

     0   :  { %s4120_s18 = smov 0   ;;  %s4122_s19 = smov 0   ;;  %s5640_s0 = inlined_call_operand.vmem [shape: f32[2,16,16,128], index: 0, kind: input, shape index: {}]   ;;  %s5641_s1 = inlined_call_operand.vmem [shape: bf16[3,384,128], index: 1, kind: input, shape index: {}]   ;;  %s5642_s2 = inlined_call_operand.vmem [shape: f32[1,1,128], index: 2, kind: input, shape index: {}]   ;;  %s5643_s3 = inlined_call_operand.vmem [shape: f32[1,1,128], index: 3, kind: input, shape index: {}]   ;;  %s5644_s4 = inlined_call_operand.vmem [shape: f32[2,16,16,128], index: 4, kind: input, shape index: {}]   ;;  %s5645_s5 = inlined_call_operand.vmem [shape: f32[2,16,16,128], index: 5, kind: output, shape index: {}]  }
   0x1   :  { %s4124_s20 = smov 0  }
   0x2 LB: > { %s27_s21 = sadd.s32 1, %s4082_s19  ;;  %p2860_p0 = scmp.ge.s32.totalorder %s4086_s20, 1  ;;  %s4086_s20 = sphi %s4124_s20, %s15_s20   ;;  %s4082_s19 = sphi %s4122_s19, %s5773_s19   ;;  %s4078_s18 = sphi %s4120_s18, %s5772_s18  }
   0x3   : > { %p29_p1 = scmp.ge.s32.totalorder %s27_s21, 2  ;;  %p219_p2 = scmp.lt.s32.totalorder %s4086_s20, 3 }
   0x5   : > { %s5775_s21 = smov (%p29_p1, %s27_s21), 0  ;;  %p220_p3 = pnand %p2860_p0, %p219_p2 }
   0x7   : > { %223 = sbr.rel (%p220_p3) target bundleno = 580 (0x244), region = 40 }
   0xe   : > { %v3990_v0 = vld [vmem:[%s5641_s1 + $0x100] sm:$0xff]   ;;  %v3993_v3 = vld [vmem:[%s5641_s1 + $0x108] sm:$0xff]   ;;  %v3996_v6 = vld [vmem:[%s5641_s1 + $0x110] sm:$0xff]   ;;  %p262_p4 = scmp.lt.s32.totalorder %s4078_s18, 1  ;;  %v4088_v12 = vmov 0.0   ;;  %vm581_vm0 = vcmask 1040384  }
   0xf   : > { %v4146_v1 = vld [vmem:[%s5641_s1 + $0x140] sm:$0xff]   ;;  %3236 = vmatprep.subr.bf16.mxu0 %v3990_v0  ;;  %v4159_v4 = vld [vmem:[%s5641_s1 + $0x148] sm:$0xff]   ;;  %v4171_v7 = vld [vmem:[%s5641_s1 + $0x150] sm:$0xff]   ;;  %v4190_v13 = vrot.slane %v4088_v12, 7  ;;  %vm762_vm1 = vcmask 1046528   ;;  %vm889_vm3 = vcmask 1045504  }
  0x10   : > { %v3992_v2 = vld [vmem:[%s5641_s1 + $0xc0] sm:$0xff]   ;;  %3788 = vmatprep.subr.bf16.mxu1 %v4146_v1  ;;  %v3995_v5 = vld [vmem:[%s5641_s1 + $0xc8] sm:$0xff]   ;;  %v3998_v8 = vld [vmem:[%s5641_s1 + $0xd0] sm:$0xff]   ;;  %s5777_s18 = smov (!%p262_p4, %s4078_s18), 1  ;;  %vm4089_vm10 = vmmov 1  }
  0x11   : > { %3237 = vmatpush3.bf16.msra.mxu0 %v3992_v2  ;;  %3796 = vmatpush3.bf16.msra.mxu1 %v4146_v1  ;;  %v3999_v9 = vld [vmem:[%s5641_s1 + $0x118] sm:$0xff]   ;;  %5694 = vst [vmem:[#allocation2_spill] sm:$0xff] %v4190_v13  ;;  %v4002_v14 = vld [vmem:[%s5641_s1 + $0x120] sm:$0xff]   ;;  %v4208_v17 = vsel %vm581_vm0, 0.0, %v4190_v13  ;;  %v4005_v18 = vld [vmem:[%s5641_s1 + $0x128] sm:$0xff]   ;;  %v4222_v20 = vsel %vm581_vm0, %v4190_v13, 0.0  ;;  %v4285_v44 = vpack.c.bf16 %v4190_v13, %v4190_v13 }
  0x12   : > { %3238 = vmatprep.subr.bf16.mxu0 %v3993_v3  ;;  %3789 = vmatprep.subr.bf16.mxu1 %v4159_v4  ;;  %v4184_v10 = vld [vmem:[%s5641_s1 + $0x158] sm:$0xff]   ;;  %v4200_v15 = vld [vmem:[%s5641_s1 + $0x160] sm:$0xff]   ;;  %5695 = vst [vmem:[#allocation3_spill] sm:$0xff] %v4208_v17  ;;  %v4218_v19 = vld [vmem:[%s5641_s1 + $0x168] sm:$0xff]   ;;  %s4224_s10 = sshll.u32 %s5777_s18, 8  ;;  %v763_v21 = vrot.slane %v4208_v17, 1 }
  0x13   : > { %v4001_v11 = vld [vmem:[%s5641_s1 + $0xd8] sm:$0xff]   ;;  %v4004_v16 = vld [vmem:[%s5641_s1 + $0xe0] sm:$0xff]   ;;  %5696 = vst [vmem:[#allocation4_spill] sm:$0xff] %v4222_v20  ;;  %v4007_v22 = vld [vmem:[%s5641_s1 + $0xe8] sm:$0xff]   ;;  %v764_v23 = vrot.slane %v4190_v13, 1  ;;  %v766_v25 = vrot.slane %v4222_v20, 1  ;;  %s4246_s22 = scalar_lea.vmem %s5640_s0, %s4224_s10  ;;  %s5507_s8 = scalar_lea.vmem %s5644_s4, %s4224_s10 }
  0x14   : > { %v4008_v24 = vld [vmem:[%s5641_s1 + $0x130] sm:$0xff]   ;;  %v4011_v28 = vld [vmem:[%s5641_s1 + $0x138] sm:$0xff]   ;;  %v4263_v30 = vld [vmem:[%s5642_s2] ss:$0 sm:$0xff]  ;;  %5697 = vst [vmem:[#allocation5_spill] sm:$0xff] %v4285_v44  ;;  %s5518_s12 = scalar_lea.vmem %s5645_s5, %s4224_s10 }
  0x15   : > { %3239 = vmatpush3.bf16.msra.mxu0 %v3995_v5  ;;  %3797 = vmatpush3.bf16.msra.mxu1 %v4159_v4  ;;  %v4240_v26 = vld [vmem:[%s5641_s1 + $0x170] sm:$0xff]   ;;  %v4257_v29 = vld [vmem:[%s5641_s1 + $0x178] sm:$0xff]   ;;  %v4268_v31 = vld [vmem:[%s5643_s3] ss:$0 sm:$0xff]  ;;  %v765_v33 = vsel %vm762_vm1, %v763_v21, %v764_v23  ;;  %v767_v34 = vsel %vm762_vm1, %v764_v23, %v766_v25 }
  0x16   : > { %3240 = vmatprep.subr.bf16.mxu0 %v3996_v6  ;;  %3790 = vmatprep.subr.bf16.mxu1 %v4171_v7  ;;  %v4010_v27 = vld [vmem:[%s5641_s1 + $0xf0] sm:$0xff]   ;;  %v295_v32 = vld [vmem:[%s4246_s22] sm:$0xff]  ;;  %v296_v35 = vld [vmem:[%s4246_s22 + $0x8] sm:$0xff]  ;;  %v4290_v48 = vpack.c.bf16 %v767_v34, %v765_v33 }
  0x17   : > { %v333_v36 = vmul.f32 %v4263_v30, %v295_v32  ;;  %v311_v37 = vld [vmem:[%s4246_s22 + $0x80] sm:$0xff]  ;;  %v312_v38 = vld [vmem:[%s4246_s22 + $0x88] sm:$0xff]  ;;  %v334_v39 = vmul.f32 %v4263_v30, %v296_v35  ;;  %v313_v42 = vld [vmem:[%s4246_s22 + $0x90] sm:$0xff] }
  0x18   : > { %v349_v40 = vmul.f32 %v4263_v30, %v311_v37  ;;  %v350_v41 = vmul.f32 %v4263_v30, %v312_v38  ;;  %v314_v43 = vld [vmem:[%s4246_s22 + $0x98] sm:$0xff]  ;;  %v351_v46 = vmul.f32 %v4263_v30, %v313_v42  ;;  %5698 = vst [vmem:[#allocation6_spill] sm:$0xff] %v4290_v48  ;;  %v4014_v56 = vld [vmem:[%s5641_s1 + $0x40] sm:$0xff]   ;;  %v297_v21 = vld [vmem:[%s4246_s22 + $0x10] sm:$0xff] }
  0x19   : > { %3241 = vmatpush3.bf16.msra.mxu0 %v3998_v8  ;;  %3798 = vmatpush3.bf16.msra.mxu1 %v4171_v7  ;;  %v371_v45 = vadd.f32 %v4268_v31, %v333_v36  ;;  %v352_v47 = vmul.f32 %v4263_v30, %v314_v43  ;;  %v4013_v49 = vld [vmem:[%s5641_s1 + $0xf8] sm:$0xff]   ;;  %v372_v50 = vadd.f32 %v4268_v31, %v334_v39  ;;  %vm2943_vm9 = vmneg %vm581_vm0  ;;  %v315_v35 = vld [vmem:[%s4246_s22 + $0xa0] sm:$0xff] }
  0x1a   : > { %3242 = vmatprep.subr.bf16.mxu0 %v3999_v9  ;;  %3791 = vmatprep.subr.bf16.mxu1 %v4184_v10  ;;  %v387_v51 = vadd.f32 %v4268_v31, %v349_v40  ;;  %v388_v52 = vadd.f32 %v4268_v31, %v350_v41  ;;  %v389_v54 = vadd.f32 %v4268_v31, %v351_v46  ;;  %vm4349_vm11 = vmpackc.low %vm4089_vm10, %vm2943_vm9 }
  0x1b   : > { %vm403_vm2 = vcmp.ge.f32.partialorder %v371_v45, 0.0  ;;  %v435_v53 = vmul.f32 0.01, %v371_v45  ;;  %v390_v55 = vadd.f32 %v4268_v31, %v352_v47  ;;  %vm404_vm4 = vcmp.ge.f32.partialorder %v372_v50, 0.0 }
  0x1c   : > { %v436_v57 = vmul.f32 0.01, %v372_v50  ;;  %vm419_vm5 = vcmp.ge.f32.partialorder %v387_v51, 0.0  ;;  %vm420_vm6 = vcmp.ge.f32.partialorder %v388_v52, 0.0  ;;  %v451_v59 = vmul.f32 0.01, %v387_v51 }
  0x1d   : > { %3243 = vmatpush3.bf16.msra.mxu0 %v4001_v11  ;;  %3799 = vmatpush3.bf16.msra.mxu1 %v4184_v10  ;;  %v467_v58 = vsel %vm403_vm2, %v371_v45, %v435_v53  ;;  %v452_v60 = vmul.f32 0.01, %v388_v52  ;;  %vm421_vm7 = vcmp.ge.f32.partialorder %v389_v54, 0.0  ;;  %vm422_vm8 = vcmp.ge.f32.partialorder %v390_v55, 0.0 }
  0x1e   : > { %3244 = vmatprep.subr.bf16.mxu0 %v4002_v14  ;;  %3792 = vmatprep.subr.bf16.mxu1 %v4200_v15  ;;  %v468_v61 = vsel %vm404_vm4, %v372_v50, %v436_v57  ;;  %v585_v62 = vrot.slane %v467_v58, 7  ;;  %v453_v63 = vmul.f32 0.01, %v389_v54  ;;  %v483_v2 = vsel %vm419_vm5, %v387_v51, %v451_v59 }
  0x1f   : > { %v586_v0 = vrot.slane %v468_v61, 7  ;;  %v484_v3 = vsel %vm420_vm6, %v388_v52, %v452_v60  ;;  %v454_v5 = vmul.f32 0.01, %v390_v55  ;;  %v4310_v8 = vrot.slane %v483_v2, 7  ;;  %v317_v60 = vld [vmem:[%s4246_s22 + $0xb0] sm:$0xff] }
  0x20   : > { %v4308_v6 = vsel %vm581_vm0, 0.0, %v585_v62  ;;  %v610_v9 = vrot.slane %v484_v3, 7  ;;  %v485_v11 = vsel %vm421_vm7, %v389_v54, %v453_v63  ;;  %v335_v45 = vmul.f32 %v4263_v30, %v297_v21  ;;  %v316_v54 = vld [vmem:[%s4246_s22 + $0xa8] sm:$0xff]  ;;  %v4015_v63 = vld [vmem:[%s5641_s1] sm:$0xff]  }
  0x21   : > { %3245 = vmatpush3.bf16.msra.mxu0 %v4004_v16  ;;  %3800 = vmatpush3.bf16.msra.mxu1 %v4200_v15  ;;  %5699 = vst [vmem:[#allocation7_spill] sm:$0xff] %v4308_v6  ;;  %v4314_v12 = vsel %vm581_vm0, %v585_v62, %v586_v0  ;;  %v4317_v14 = vsel %vm581_vm0, %v586_v0, 0.0  ;;  %v768_v16 = vrot.slane %v4308_v6, 1  ;;  %v486_v42 = vsel %vm422_vm8, %v390_v55, %v454_v5 }
  0x22   : > { %3246 = vmatprep.subr.bf16.mxu0 %v4005_v18  ;;  %3793 = vmatprep.subr.bf16.mxu1 %v4218_v19  ;;  %5700 = vst [vmem:[#allocation8_spill] sm:$0xff] %v4314_v12  ;;  %5701 = vst [vmem:[#allocation9_spill] sm:$0xff] %v4317_v14  ;;  %v771_v23 = vrot.slane %v4317_v14, 1  ;;  %v4327_v25 = vsel %vm581_vm0, %v4310_v8, %v610_v9  ;;  %v4336_v32 = vsel %vm581_vm0, %v610_v9, 0.0  ;;  %v4354_v43 = vrot.slane %v485_v11, 7  ;;  %v318_v9 = vld [vmem:[%s4246_s22 + $0xb8] sm:$0xff] }
  0x23   : > { %v936_v33 = vrot.slane %v4327_v25, 2  ;;  %v4340_v34 = vpack.c.bf16 %v4314_v12, %v585_v62  ;;  %v938_v39 = vrot.slane %v4336_v32, 2  ;;  %v373_v53 = vadd.f32 %v4268_v31, %v335_v45  ;;  %v323_v18 = vld [vmem:[%s4246_s22 + $0xe0] sm:$0xff] }
  0x24   : > { %5704 = vst [vmem:[#allocation10_spill] sm:$0xff] %v4354_v43  ;;  %v4365_v52 = vsel %vm581_vm0, 0.0, %v4354_v43  ;;  %v353_v55 = vmul.f32 %v4263_v30, %v315_v35  ;;  %v354_v3 = vmul.f32 %v4263_v30, %v316_v54  ;;  %v355_v21 = vmul.f32 %v4263_v30, %v317_v60 }
  0x25   : > { %3247 = vmatpush3.bf16.msra.mxu0 %v4007_v22  ;;  %3801 = vmatpush3.bf16.msra.mxu1 %v4218_v19  ;;  %v769_v22 = vrot.slane %v4314_v12, 1  ;;  %v939_v47 = vsel %vm889_vm3, %v936_v33, %v938_v39  ;;  %v940_v58 = vrot.slane %v4365_v52, 2  ;;  %vm405_vm12 = vcmp.ge.f32.partialorder %v373_v53, 0.0 }
  0x26   : > { %3248 = vmatprep.subr.bf16.mxu0 %v4008_v24  ;;  %3794 = vmatprep.subr.bf16.mxu1 %v4240_v26  ;;  %v437_v0 = vmul.f32 0.01, %v373_v53  ;;  %v391_v5 = vadd.f32 %v4268_v31, %v353_v55  ;;  %v392_v35 = vadd.f32 %v4268_v31, %v354_v3  ;;  %v393_v45 = vadd.f32 %v4268_v31, %v355_v21  ;;  %v4028_v55 = vld [vmem:[%s5641_s1 + $0x78] sm:$0xff]  }
  0x27   : > { %v770_v36 = vsel %vm762_vm1, %v768_v16, %v769_v22  ;;  %v772_v37 = vsel %vm762_vm1, %v769_v22, %v771_v23  ;;  %v4016_v23 = vld [vmem:[%s5641_s1 + $0x48] sm:$0xff]  }
  0x28   : > { %v4347_v40 = vpack.c.bf16 %v772_v37, %v770_v36  ;;  %vm423_vm14 = vcmp.ge.f32.partialorder %v391_v5, 0.0  ;;  %v455_v37 = vmul.f32 0.01, %v391_v5  ;;  %vm424_vm15 = vcmp.ge.f32.partialorder %v392_v35, 0.0 }
  0x29   : > { %3249 = vmatpush3.bf16.msra.mxu0 %v4010_v27  ;;  %3802 = vmatpush3.bf16.msra.mxu1 %v4240_v26  ;;  %v298_v27 = vld [vmem:[%s4246_s22 + $0x18] sm:$0xff]  ;;  %vm425_vm2 = vcmp.ge.f32.partialorder %v393_v45, 0.0  ;;  %v457_v21 = vmul.f32 0.01, %v393_v45 }
  0x2a   : > { %3250 = vmatprep.subr.bf16.mxu0 %v4011_v28  ;;  %3795 = vmatprep.subr.bf16.mxu1 %v4257_v29  ;;  %v4333_v28 = vsel %vm581_vm0, 0.0, %v4310_v8  ;;  %v336_v50 = vmul.f32 %v4263_v30, %v298_v27  ;;  %v487_v60 = vsel %vm423_vm14, %v391_v5, %v455_v37 }
  0x2b   : > { %v935_v38 = vrot.slane %v4333_v28, 2  ;;  %1343 = vmatprep.mubr.bf16.mxu0 %v4347_v40 }
  0x2c   : > { %v374_v59 = vadd.f32 %v4268_v31, %v336_v50 }
  0x2d   : > { %3251 = vmatpush3.bf16.msra.mxu0 %v4013_v49  ;;  %3803 = vmatpush3.bf16.msra.mxu1 %v4257_v29  ;;  %v937_v46 = vsel %vm889_vm3, %v935_v38, %v936_v33  ;;  %v613_v49 = vrot.slane %v486_v42, 7  ;;  %v356_v38 = vmul.f32 %v4263_v30, %v318_v9  ;;  %v456_v42 = vmul.f32 0.01, %v392_v35 }
  0x2e   : > { %3644 = vmatprep.subr.bf16.mxu0 %v4146_v1  ;;  %3372 = vmatprep.subr.bf16.mxu1 %v4014_v56  ;;  %v4361_v51 = vpack.c.bf16 %v939_v47, %v937_v46  ;;  %vm406_vm13 = vcmp.ge.f32.partialorder %v374_v59, 0.0  ;;  %v438_v2 = vmul.f32 0.01, %v374_v59  ;;  %v4017_v46 = vld [vmem:[%s5641_s1 + $0x8] sm:$0xff]   ;;  %v4442_v9 = vrot.slane %v487_v60, 7 }
  0x2f   : > { %v4375_v56 = vsel %vm581_vm0, %v4354_v43, %v613_v49  ;;  %v4378_v57 = vsel %vm581_vm0, %v613_v49, 0.0  ;;  %v320_v60 = vld [vmem:[%s4246_s22 + $0xc8] sm:$0xff] }
  0x30   : > { %5705 = vst [vmem:[#allocation11_spill] sm:$0xff] %v4361_v51  ;;  %2946 = vmatmul.mubr.msk.bf16.vlgmr.msra.gmra.mrb[0].mxu0 %vm4349_vm11, %v4340_v34  ;;  %3676 = vmatprep.mubr.bf16.mxu1 %v4361_v51  ;;  %v941_v61 = vrot.slane %v4375_v56, 2  ;;  %v943_v62 = vrot.slane %v4378_v57, 2  ;;  %v470_v27 = vsel %vm406_vm13, %v374_v59, %v438_v2  ;;  %v4018_v59 = vld [vmem:[%s5641_s1 + $0x50] sm:$0xff]   ;;  %v299_v2 = vld [vmem:[%s4246_s22 + $0x20] sm:$0xff] }
  0x31   : > { %3645 = vmatpush3.bf16.msra.mxu0 %v4146_v1  ;;  %v469_v1 = vsel %vm405_vm12, %v373_v53, %v437_v0  ;;  %v589_v36 = vrot.slane %v470_v27, 7  ;;  %v4019_v0 = vld [vmem:[%s5641_s1 + $0x10] sm:$0xff]  }
  0x32   : > { %3646 = vmatprep.subr.bf16.mxu0 %v4159_v4  ;;  %v942_v11 = vsel %vm889_vm3, %v940_v58, %v941_v61  ;;  %v944_v16 = vsel %vm889_vm3, %v941_v61, %v943_v62  ;;  %v588_v33 = vrot.slane %v469_v1, 7  ;;  %v488_v61 = vsel %vm424_vm15, %v392_v35, %v456_v42  ;;  %v4023_v58 = vld [vmem:[%s5641_s1 + $0x20] sm:$0xff]  }
  0x33   : > { %v4397_v22 = vpack.c.bf16 %v944_v16, %v942_v11  ;;  %v616_v11 = vrot.slane %v488_v61, 7  ;;  %v4020_v16 = vld [vmem:[%s5641_s1 + $0x58] sm:$0xff]  }
  0x34   : > { %v4407_v39 = vsel %vm581_vm0, 0.0, %v588_v33  ;;  %v4415_v47 = vsel %vm581_vm0, %v588_v33, %v589_v36 }
  0x35   : > { %5706 = vst [vmem:[#allocation12_spill] sm:$0xff] %v4397_v22  ;;  %3647 = vmatpush3.bf16.msra.mxu0 %v4159_v4  ;;  %3677 = vmatmul.mubr.bf16.vlgmr.msra.gmra.mrb[0].mxu1 %v4397_v22  ;;  %5707 = vst [vmem:[#allocation13_spill] sm:$0xff] %v4407_v39  ;;  %v4418_v4 = vsel %vm581_vm0, %v589_v36, 0.0  ;;  %v773_v49 = vrot.slane %v4407_v39, 1  ;;  %v774_v53 = vrot.slane %v4415_v47, 1  ;;  %v4432_v62 = vpack.c.bf16 %v4415_v47, %v588_v33 }
  0x36   : > { %3648 = vmatprep.subr.bf16.mxu0 %v4171_v7  ;;  %3373 = vmatpush3.bf16.msra.mxu1 %v4015_v63  ;;  %5708 = vst [vmem:[#allocation14_spill] sm:$0xff] %v4415_v47  ;;  %5709 = vst [vmem:[#allocation15_spill] sm:$0xff] %v4418_v4  ;;  %v776_v54 = vrot.slane %v4418_v4, 1  ;;  %v394_v63 = vadd.f32 %v4268_v31, %v356_v38  ;;  %v4454_v27 = vsel %vm581_vm0, %v4442_v9, %v616_v11 }
  0x37   : > { %3374 = vmatprep.subr.bf16.mxu1 %v4016_v23  ;;  %v775_v3 = vsel %vm762_vm1, %v773_v49, %v774_v53  ;;  %v319_v23 = vld [vmem:[%s4246_s22 + $0xc0] sm:$0xff]  ;;  %v4458_v33 = vsel %vm581_vm0, 0.0, %v4442_v9  ;;  %v4461_v35 = vsel %vm581_vm0, %v616_v11, 0.0  ;;  %v946_v38 = vrot.slane %v4454_v27, 2 }
  0x38   : > { %v777_v5 = vsel %vm762_vm1, %v774_v53, %v776_v54  ;;  %vm426_vm4 = vcmp.ge.f32.partialorder %v394_v63, 0.0  ;;  %v458_v36 = vmul.f32 0.01, %v394_v63  ;;  %v945_v37 = vrot.slane %v4458_v33, 2 }
  0x39   : > { %3649 = vmatpush3.bf16.msra.mxu0 %v4171_v7  ;;  %v4448_v1 = vpack.c.bf16 %v777_v5, %v775_v3  ;;  %v300_v7 = vld [vmem:[%s4246_s22 + $0x28] sm:$0xff]  ;;  %v948_v42 = vrot.slane %v4461_v35, 2  ;;  %v337_v54 = vmul.f32 %v4263_v30, %v299_v2  ;;  %v357_v3 = vmul.f32 %v4263_v30, %v319_v23 }
  0x3a   : > { %3650 = vmatprep.subr.bf16.mxu0 %v4184_v10  ;;  %3375 = vmatpush3.bf16.msra.mxu1 %v4017_v46  ;;  %v489_v46 = vsel %vm425_vm2, %v393_v45, %v457_v21  ;;  %v490_v49 = vsel %vm426_vm4, %v394_v63, %v458_v36  ;;  %v947_v61 = vsel %vm889_vm3, %v945_v37, %v946_v38  ;;  %v4021_v63 = vld [vmem:[%s5641_s1 + $0x18] sm:$0xff]  }
  0x3b   : > { %3376 = vmatprep.subr.bf16.mxu1 %v4018_v59  ;;  %1351 = vmatprep.mubr.bf16.mxu0 %v4448_v1  ;;  %v4472_v53 = vrot.slane %v489_v46, 7  ;;  %v338_v59 = vmul.f32 %v4263_v30, %v300_v7  ;;  %v619_v45 = vrot.slane %v490_v49, 7  ;;  %v375_v11 = vadd.f32 %v4268_v31, %v337_v54 }
  0x3c   : > { %2950 = vmatmul.mubr.msk.bf16.gmra.mrb[4].mxu0 %vm4349_vm11, %v4432_v62  ;;  %v358_v37 = vmul.f32 %v4263_v30, %v320_v60 }
  0x3d   : > { %3651 = vmatpush3.bf16.msra.mxu0 %v4184_v10  ;;  %v949_v10 = vsel %vm889_vm3, %v946_v38, %v948_v42  ;;  %v4488_v5 = vsel %vm581_vm0, 0.0, %v4472_v53  ;;  %v376_v21 = vadd.f32 %v4268_v31, %v338_v59  ;;  %v4497_v7 = vsel %vm581_vm0, %v4472_v53, %v619_v45  ;;  %v322_v38 = vld [vmem:[%s4246_s22 + $0xd8] sm:$0xff] }
  0x3e   : > { %3652 = vmatprep.subr.bf16.mxu0 %v4200_v15  ;;  %3377 = vmatpush3.bf16.msra.mxu1 %v4019_v0  ;;  %v4484_v2 = vpack.c.bf16 %v949_v10, %v947_v61  ;;  %v4022_v0 = vld [vmem:[%s5641_s1 + $0x60] sm:$0xff]   ;;  %v4500_v23 = vsel %vm581_vm0, %v619_v45, 0.0  ;;  %v950_v36 = vrot.slane %v4488_v5, 2  ;;  %v951_v42 = vrot.slane %v4497_v7, 2 }
  0x3f   : > { %3378 = vmatprep.subr.bf16.mxu1 %v4020_v16  ;;  %v321_v16 = vld [vmem:[%s4246_s22 + $0xd0] sm:$0xff]  ;;  %v953_v46 = vrot.slane %v4500_v23, 2  ;;  %vm407_vm5 = vcmp.ge.f32.partialorder %v375_v11, 0.0  ;;  %vm408_vm6 = vcmp.ge.f32.partialorder %v376_v21, 0.0  ;;  %v439_v49 = vmul.f32 0.01, %v375_v11 }
  0x40   : > { %5710 = vst [vmem:[#allocation16_spill] sm:$0xff] %v4484_v2  ;;  %3680 = vmatprep.mubr.bf16.mxu1 %v4484_v2  ;;  %v440_v54 = vmul.f32 0.01, %v376_v21  ;;  %v395_v59 = vadd.f32 %v4268_v31, %v357_v3  ;;  %v396_v60 = vadd.f32 %v4268_v31, %v358_v37  ;;  %v359_v10 = vmul.f32 %v4263_v30, %v321_v16 }
  0x41   : > { %3653 = vmatpush3.bf16.msra.mxu0 %v4200_v15  ;;  %v952_v15 = vsel %vm889_vm3, %v950_v36, %v951_v42  ;;  %v954_v61 = vsel %vm889_vm3, %v951_v42, %v953_v46  ;;  %v360_v45 = vmul.f32 %v4263_v30, %v322_v38  ;;  %v471_v3 = vsel %vm407_vm5, %v375_v11, %v439_v49  ;;  %v4024_v36 = vld [vmem:[%s5641_s1 + $0x68] sm:$0xff]  }
  0x42   : > { %3654 = vmatprep.subr.bf16.mxu0 %v4218_v19  ;;  %3379 = vmatpush3.bf16.msra.mxu1 %v4021_v63  ;;  %v301_v63 = vld [vmem:[%s4246_s22 + $0x30] sm:$0xff]  ;;  %v4521_v24 = vpack.c.bf16 %v954_v61, %v952_v15  ;;  %v472_v37 = vsel %vm408_vm6, %v376_v21, %v440_v54  ;;  %vm427_vm7 = vcmp.ge.f32.partialorder %v395_v59, 0.0  ;;  %v591_v16 = vrot.slane %v471_v3, 7  ;;  %v4025_v61 = vld [vmem:[%s5641_s1 + $0x28] sm:$0xff]  }
  0x43   : > { %3380 = vmatprep.subr.bf16.mxu1 %v4022_v0  ;;  %v592_v0 = vrot.slane %v472_v37, 7  ;;  %vm428_vm8 = vcmp.ge.f32.partialorder %v396_v60, 0.0  ;;  %v459_v38 = vmul.f32 0.01, %v395_v59  ;;  %v460_v42 = vmul.f32 0.01, %v396_v60 }
  0x44   : > { %5711 = vst [vmem:[#allocation17_spill] sm:$0xff] %v4521_v24  ;;  %3681 = vmatmul.mubr.bf16.gmra.mrb[4].mxu1 %v4521_v24  ;;  %v397_v11 = vadd.f32 %v4268_v31, %v359_v10  ;;  %v398_v21 = vadd.f32 %v4268_v31, %v360_v45  ;;  %v339_v46 = vmul.f32 %v4263_v30, %v301_v63  ;;  %v302_v37 = vld [vmem:[%s4246_s22 + $0x38] sm:$0xff] }
  0x45   : > { %3655 = vmatpush3.bf16.msra.mxu0 %v4218_v19  ;;  %v4535_v49 = vsel %vm581_vm0, %v591_v16, %v592_v0  ;;  %v4538_v19 = vsel %vm581_vm0, 0.0, %v591_v16  ;;  %v4541_v54 = vsel %vm581_vm0, %v592_v0, 0.0  ;;  %v491_v15 = vsel %vm427_vm7, %v395_v59, %v459_v38  ;;  %v4026_v0 = vld [vmem:[%s5641_s1 + $0x70] sm:$0xff]  }
  0x46   : > { %3656 = vmatprep.subr.bf16.mxu0 %v4240_v26  ;;  %5712 = vst [vmem:[#allocation18_spill] sm:$0xff] %v4535_v49  ;;  %5713 = vst [vmem:[#allocation19_spill] sm:$0xff] %v4538_v19  ;;  %3381 = vmatpush3.bf16.msra.mxu1 %v4023_v58  ;;  %v778_v10 = vrot.slane %v4538_v19, 1  ;;  %v779_v45 = vrot.slane %v4535_v49, 1  ;;  %v781_v63 = vrot.slane %v4541_v54, 1  ;;  %v492_v3 = vsel %vm428_vm8, %v396_v60, %v460_v42 }
  0x47   : > { %5714 = vst [vmem:[#allocation20_spill] sm:$0xff] %v4541_v54  ;;  %3382 = vmatprep.subr.bf16.mxu1 %v4024_v36  ;;  %v4556_v58 = vrot.slane %v491_v15, 7  ;;  %v622_v59 = vrot.slane %v492_v3, 7  ;;  %v4559_v38 = vpack.c.bf16 %v4535_v49, %v591_v16  ;;  %vm429_vm9 = vcmp.ge.f32.partialorder %v397_v11, 0.0 }
  0x48   : > { %v780_v60 = vsel %vm762_vm1, %v778_v10, %v779_v45  ;;  %v782_v36 = vsel %vm762_vm1, %v779_v45, %v781_v63  ;;  %vm430_vm10 = vcmp.ge.f32.partialorder %v398_v21, 0.0  ;;  %v461_v42 = vmul.f32 0.01, %v397_v11  ;;  %v324_v45 = vld [vmem:[%s4246_s22 + $0xe8] sm:$0xff] }
  0x49   : > { %3657 = vmatpush3.bf16.msra.mxu0 %v4240_v26  ;;  %5715 = vst [vmem:[#allocation21_spill] sm:$0xff] %v4559_v38  ;;  %v4027_v26 = vld [vmem:[%s5641_s1 + $0x30] sm:$0xff]   ;;  %v4568_v15 = vpack.c.bf16 %v782_v36, %v780_v60  ;;  %v4572_v16 = vsel %vm581_vm0, %v4556_v58, %v622_v59  ;;  %v4576_v3 = vsel %vm581_vm0, 0.0, %v4556_v58  ;;  %v4579_v10 = vsel %vm581_vm0, %v622_v59, 0.0 }
  0x4a   : > { %3658 = vmatprep.subr.bf16.mxu0 %v4257_v29  ;;  %3383 = vmatpush3.bf16.msra.mxu1 %v4025_v61  ;;  %v955_v63 = vrot.slane %v4576_v3, 2  ;;  %v956_v50 = vrot.slane %v4572_v16, 2  ;;  %v958_v60 = vrot.slane %v4579_v10, 2  ;;  %v462_v36 = vmul.f32 0.01, %v398_v21 }
  0x4b   : > { %3384 = vmatprep.subr.bf16.mxu1 %v4026_v0  ;;  %1359 = vmatprep.mubr.bf16.mxu0 %v4568_v15  ;;  %v493_v61 = vsel %vm429_vm9, %v397_v11, %v461_v42  ;;  %v340_v59 = vmul.f32 %v4263_v30, %v302_v37  ;;  %v377_v24 = vadd.f32 %v4268_v31, %v339_v46  ;;  %v4036_v0 = vld [vmem:[%s5641_s1 + $0x1c0] sm:$0xff]   ;;  %v325_v42 = vld [vmem:[%s4246_s22 + $0xf0] sm:$0xff] }
  0x4c   : > { %v361_v2 = vmul.f32 %v4263_v30, %v323_v18  ;;  %v957_v22 = vsel %vm889_vm3, %v955_v63, %v956_v50  ;;  %v959_v51 = vsel %vm889_vm3, %v956_v50, %v958_v60  ;;  %2954 = vmatmul.mubr.msk.bf16.gmra.mrb[8].mxu0 %vm4349_vm11, %v4559_v38  ;;  %v4603_v11 = vrot.slane %v493_v61, 7  ;;  %v4029_v50 = vld [vmem:[%s5641_s1 + $0x38] sm:$0xff]   ;;  %v4621_v60 = vld [vmem:[%s5641_s1 + $0x80] sm:$0xff]  }
  0x4d   : > { %3659 = vmatpush3.bf16.msra.mxu0 %v4257_v29  ;;  %v494_v29 = vsel %vm430_vm10, %v398_v21, %v462_v36  ;;  %v4605_v37 = vpack.c.bf16 %v959_v51, %v957_v22  ;;  %v378_v18 = vadd.f32 %v4268_v31, %v340_v59  ;;  %vm409_vm12 = vcmp.ge.f32.partialorder %v377_v24, 0.0 }
  0x4e   : > { %v625_v46 = vrot.slane %v494_v29, 7  ;;  %3385 = vmatpush3.bf16.msra.mxu1 %v4027_v26  ;;  %3508 = vmatprep.subr.bf16.mxu0 %v4036_v0  ;;  %v4614_v63 = vsel %vm581_vm0, 0.0, %v4603_v11  ;;  %v441_v21 = vmul.f32 0.01, %v377_v24  ;;  %v362_v51 = vmul.f32 %v4263_v30, %v324_v45  ;;  %v326_v45 = vld [vmem:[%s4246_s22 + $0xf8] sm:$0xff] }
  0x4f   : > { %5716 = vst [vmem:[#allocation22_spill] sm:$0xff] %v4605_v37  ;;  %v399_v22 = vadd.f32 %v4268_v31, %v361_v2  ;;  %3386 = vmatprep.subr.bf16.mxu1 %v4028_v55  ;;  %3684 = vmatprep.mubr.bf16.mxu1 %v4605_v37  ;;  %v960_v61 = vrot.slane %v4614_v63, 2  ;;  %vm410_vm13 = vcmp.ge.f32.partialorder %v378_v18, 0.0  ;;  %v442_v59 = vmul.f32 0.01, %v378_v18 }
  0x50   : > { %v4626_v26 = vsel %vm581_vm0, %v4603_v11, %v625_v46  ;;  %v4629_v36 = vsel %vm581_vm0, %v625_v46, 0.0  ;;  %v473_v0 = vsel %vm409_vm12, %v377_v24, %v441_v21  ;;  %v400_v37 = vadd.f32 %v4268_v31, %v362_v51 }
  0x51   : > { %v961_v55 = vrot.slane %v4626_v26, 2  ;;  %v963_v2 = vrot.slane %v4629_v36, 2  ;;  %v594_v29 = vrot.slane %v473_v0, 7  ;;  %vm431_vm14 = vcmp.ge.f32.partialorder %v399_v22, 0.0 }
  0x52   : > { %v463_v20 = vmul.f32 0.01, %v399_v22  ;;  %3387 = vmatpush3.bf16.msra.mxu1 %v4029_v50  ;;  %v474_v17 = vsel %vm410_vm13, %v378_v18, %v442_v59  ;;  %v363_v43 = vmul.f32 %v4263_v30, %v325_v42  ;;  %vm432_vm15 = vcmp.ge.f32.partialorder %v400_v37, 0.0  ;;  %v304_v59 = vld [vmem:[%s4246_s22 + $0x48] sm:$0xff] }
  0x53   : > { %v962_v46 = vsel %vm889_vm3, %v960_v61, %v961_v55  ;;  %v964_v13 = vsel %vm889_vm3, %v961_v55, %v963_v2  ;;  %3692 = vmatprep.subr.bf16.mxu1 %v4621_v60  ;;  %v595_v38 = vrot.slane %v474_v17, 7  ;;  %v4644_v24 = vsel %vm581_vm0, 0.0, %v594_v29  ;;  %v303_v2 = vld [vmem:[%s4246_s22 + $0x40] sm:$0xff] }
  0x54   : > { %v4641_v54 = vpack.c.bf16 %v964_v13, %v962_v46  ;;  %5718 = vst [vmem:[#allocation24_spill] sm:$0xff] %v4644_v24  ;;  %v783_v50 = vrot.slane %v4644_v24, 1  ;;  %v464_v21 = vmul.f32 0.01, %v400_v37  ;;  %v495_v51 = vsel %vm431_vm14, %v399_v22, %v463_v20 }
  0x55   : > { %v364_v61 = vmul.f32 %v4263_v30, %v326_v45  ;;  %v4650_v18 = vsel %vm581_vm0, %v594_v29, %v595_v38  ;;  %v4653_v13 = vsel %vm581_vm0, %v595_v38, 0.0  ;;  %v4655_v17 = vrot.slane %v495_v51, 7 }
  0x56   : > { %5717 = vst [vmem:[#allocation23_spill] sm:$0xff] %v4641_v54  ;;  %3685 = vmatmul.mubr.bf16.gmra.mrb[8].mxu1 %v4641_v54  ;;  %5719 = vst [vmem:[#allocation25_spill] sm:$0xff] %v4650_v18  ;;  %v401_v42 = vadd.f32 %v4268_v31, %v363_v43  ;;  %v784_v55 = vrot.slane %v4650_v18, 1  ;;  %v786_v20 = vrot.slane %v4653_v13, 1  ;;  %v496_v22 = vsel %vm432_vm15, %v400_v37, %v464_v21  ;;  %v305_v43 = vld [vmem:[%s4246_s22 + $0x50] sm:$0xff] }
  0x57   : > { %5720 = vst [vmem:[#allocation26_spill] sm:$0xff] %v4653_v13  ;;  %v4661_v45 = vpack.c.bf16 %v4650_v18, %v594_v29  ;;  %v628_v0 = vrot.slane %v496_v22, 7  ;;  %v4667_v38 = vsel %vm581_vm0, 0.0, %v4655_v17  ;;  %v402_v46 = vadd.f32 %v4268_v31, %v364_v61  ;;  %v306_v29 = vld [vmem:[%s4246_s22 + $0x58] sm:$0xff] }
  0x58   : > { %vm433_vm2 = vcmp.ge.f32.partialorder %v401_v42, 0.0  ;;  %v785_v51 = vsel %vm762_vm1, %v783_v50, %v784_v55  ;;  %v787_v54 = vsel %vm762_vm1, %v784_v55, %v786_v20  ;;  %v965_v37 = vrot.slane %v4667_v38, 2 }
  0x59   : > { %5721 = vst [vmem:[#allocation27_spill] sm:$0xff] %v4661_v45  ;;  %v465_v21 = vmul.f32 0.01, %v401_v42  ;;  %v4675_v13 = vpack.c.bf16 %v787_v54, %v785_v51  ;;  %v4679_v22 = vsel %vm581_vm0, %v4655_v17, %v628_v0  ;;  %v4682_v18 = vsel %vm581_vm0, %v628_v0, 0.0 }
  0x5a   : > { %vm434_vm4 = vcmp.ge.f32.partialorder %v402_v46, 0.0  ;;  %v966_v61 = vrot.slane %v4679_v22, 2  ;;  %v968_v50 = vrot.slane %v4682_v18, 2  ;;  %v466_v24 = vmul.f32 0.01, %v402_v46 }
  0x5b   : > { %5722 = vst [vmem:[#allocation28_spill] sm:$0xff] %v4675_v13  ;;  %v497_v55 = vsel %vm433_vm2, %v401_v42, %v465_v21  ;;  %1367 = vmatprep.mubr.bf16.mxu0 %v4675_v13  ;;  %v341_v54 = vmul.f32 %v4263_v30, %v303_v2  ;;  %v342_v51 = vmul.f32 %v4263_v30, %v304_v59 }
  0x5c   : > { %v4687_v20 = vrot.slane %v497_v55, 7  ;;  %v343_v49 = vmul.f32 %v4263_v30, %v305_v43  ;;  %v967_v0 = vsel %vm889_vm3, %v965_v37, %v966_v61  ;;  %v969_v19 = vsel %vm889_vm3, %v966_v61, %v968_v50  ;;  %2958 = vmatmul.mubr.msk.bf16.gmra.mrb[12].mxu0 %vm4349_vm11, %v4661_v45  ;;  %v307_v50 = vld [vmem:[%s4246_s22 + $0x60] sm:$0xff] }
  0x5d   : > { %v498_v42 = vsel %vm434_vm4, %v402_v46, %v466_v24  ;;  %v344_v21 = vmul.f32 %v4263_v30, %v306_v29  ;;  %v4698_v55 = vpack.c.bf16 %v969_v19, %v967_v0  ;;  %v379_v59 = vadd.f32 %v4268_v31, %v341_v54  ;;  %v308_v0 = vld [vmem:[%s4246_s22 + $0x68] sm:$0xff] }
  0x5e   : > { %5723 = vst [vmem:[#allocation29_spill] sm:$0xff] %v4687_v20  ;;  %v631_v13 = vrot.slane %v498_v42, 7  ;;  %v4702_v2 = vsel %vm581_vm0, 0.0, %v4687_v20  ;;  %v380_v37 = vadd.f32 %v4268_v31, %v342_v51  ;;  %v381_v61 = vadd.f32 %v4268_v31, %v343_v49 }
  0x5f   : > { %5724 = vst [vmem:[#allocation30_spill] sm:$0xff] %v4698_v55  ;;  %v970_v43 = vrot.slane %v4702_v2, 2  ;;  %v382_v24 = vadd.f32 %v4268_v31, %v344_v21  ;;  %3688 = vmatprep.mubr.bf16.mxu1 %v4698_v55  ;;  %vm411_vm5 = vcmp.ge.f32.partialorder %v379_v59, 0.0  ;;  %v443_v29 = vmul.f32 0.01, %v379_v59 }
  0x60   : > { %v4712_v19 = vsel %vm581_vm0, %v4687_v20, %v631_v13  ;;  %v4715_v46 = vsel %vm581_vm0, %v631_v13, 0.0  ;;  %vm412_vm6 = vcmp.ge.f32.partialorder %v380_v37, 0.0  ;;  %v444_v49 = vmul.f32 0.01, %v380_v37 }
  0x61   : > { %5725 = vst [vmem:[#allocation31_spill] sm:$0xff] %v4715_v46  ;;  %v971_v54 = vrot.slane %v4712_v19, 2  ;;  %v973_v51 = vrot.slane %v4715_v46, 2  ;;  %v475_v42 = vsel %vm411_vm5, %v379_v59, %v443_v29  ;;  %vm413_vm7 = vcmp.ge.f32.partialorder %v381_v61, 0.0  ;;  %v309_v46 = vld [vmem:[%s4246_s22 + $0x70] sm:$0xff] }
  0x62   : > { %vm414_vm8 = vcmp.ge.f32.partialorder %v382_v24, 0.0  ;;  %v445_v21 = vmul.f32 0.01, %v381_v61  ;;  %v476_v45 = vsel %vm412_vm6, %v380_v37, %v444_v49  ;;  %v597_v4 = vrot.slane %v475_v42, 7 }
  0x63   : > { %v972_v55 = vsel %vm889_vm3, %v970_v43, %v971_v54  ;;  %v974_v13 = vsel %vm889_vm3, %v971_v54, %v973_v51  ;;  %v598_v6 = vrot.slane %v476_v45, 7  ;;  %v446_v39 = vmul.f32 0.01, %v382_v24 }
  0x64   : > { %v4723_v14 = vpack.c.bf16 %v974_v13, %v972_v55  ;;  %v477_v47 = vsel %vm413_vm7, %v381_v61, %v445_v21  ;;  %v4726_v12 = vsel %vm581_vm0, 0.0, %v597_v4  ;;  %v345_v59 = vmul.f32 %v4263_v30, %v307_v50  ;;  %v310_v21 = vld [vmem:[%s4246_s22 + $0x78] sm:$0xff] }
  0x65   : > { %v600_v20 = vrot.slane %v477_v47, 7  ;;  %v346_v29 = vmul.f32 %v4263_v30, %v308_v0  ;;  %v4733_v43 = vsel %vm581_vm0, %v597_v4, %v598_v6  ;;  %v4736_v55 = vsel %vm581_vm0, %v598_v6, 0.0 }
  0x66   : > { %5726 = vst [vmem:[#allocation32_spill] sm:$0xff] %v4723_v14  ;;  %3689 = vmatmul.mubr.bf16.gmra.mrb[12].mxu1 %v4723_v14  ;;  %v788_v45 = vrot.slane %v4726_v12, 1  ;;  %v478_v37 = vsel %vm414_vm8, %v382_v24, %v446_v39  ;;  %v789_v47 = vrot.slane %v4733_v43, 1  ;;  %v791_v61 = vrot.slane %v4736_v55, 1  ;;  %v4063_v14 = vld [vmem:[%s5643_s3] ss:$0 sm:$0xff] }
  0x67   : > { %1809 = vmatprep.mubr.bf16.mxu1 %v4290_v48  ;;  %v4744_v50 = vpack.c.bf16 %v4733_v43, %v597_v4  ;;  %v601_v54 = vrot.slane %v478_v37, 7  ;;  %v4747_v51 = vsel %vm581_vm0, 0.0, %v600_v20  ;;  %v383_v6 = vadd.f32 %v4268_v31, %v345_v59 }
  0x68   : > { %v384_v49 = vadd.f32 %v4268_v31, %v346_v29  ;;  %v347_v0 = vmul.f32 %v4263_v30, %v309_v46  ;;  %v790_v39 = vsel %vm762_vm1, %v788_v45, %v789_v47  ;;  %v792_v24 = vsel %vm762_vm1, %v789_v47, %v791_v61  ;;  %v4031_v30 = vld [vmem:[%s5641_s1 + $0x88] sm:$0xff]   ;;  %v4062_v61 = vld [vmem:[%s5642_s2] ss:$0 sm:$0xff] }
  0x69   : > { %5727 = vst [vmem:[#allocation33_spill] sm:$0xff] %v4744_v50  ;;  %v4755_v42 = vsel %vm581_vm0, %v600_v20, %v601_v54  ;;  %v4758_v4 = vsel %vm581_vm0, %v601_v54, 0.0  ;;  %v4761_v13 = vpack.c.bf16 %v792_v24, %v790_v39  ;;  %v793_v37 = vrot.slane %v4747_v51, 1 }
  0x6a   : > { %v794_v59 = vrot.slane %v4755_v42, 1  ;;  %v796_v31 = vrot.slane %v4758_v4, 1  ;;  %vm415_vm9 = vcmp.ge.f32.partialorder %v383_v6, 0.0  ;;  %vm416_vm10 = vcmp.ge.f32.partialorder %v384_v49, 0.0 }
  0x6b   : > { %5728 = vst [vmem:[#allocation34_spill] sm:$0xff] %v4761_v13  ;;  %v447_v46 = vmul.f32 0.01, %v383_v6  ;;  %1375 = vmatprep.mubr.bf16.mxu0 %v4761_v13  ;;  %v448_v47 = vmul.f32 0.01, %v384_v49  ;;  %v348_v54 = vmul.f32 %v4062_v61, %v310_v21  ;;  %v809_v48 = vrot.slane %v4327_v25, 1 }
  0x6c   : > { %v795_v29 = vsel %vm762_vm1, %v793_v37, %v794_v59  ;;  %v797_v45 = vsel %vm762_vm1, %v794_v59, %v796_v31  ;;  %2962 = vmatmul.mubr.msk.bf16.gmra.mrb[16].mxu0 %vm4349_vm11, %v4744_v50  ;;  %v385_v37 = vadd.f32 %v4063_v14, %v347_v0  ;;  %v808_v59 = vrot.slane %v4333_v28, 1  ;;  %v4032_v28 = vld [vmem:[%s5641_s1 + $0x90] sm:$0xff]  }
  0x6d   : > { %v4778_v39 = vpack.c.bf16 %v797_v45, %v795_v29  ;;  %v479_v24 = vsel %vm415_vm9, %v383_v6, %v447_v46  ;;  %v480_v31 = vsel %vm416_vm10, %v384_v49, %v448_v47  ;;  %v386_v61 = vadd.f32 %v4063_v14, %v348_v54 }
  0x6e   : > { %3034 = vmatmul.mubr.msk.bf16.vlgmr.msra.gmra.mrb[16].mxu1 %vm4349_vm11, %v4285_v44  ;;  %v603_v21 = vrot.slane %v479_v24, 7  ;;  %v604_v6 = vrot.slane %v480_v31, 7  ;;  %vm417_vm12 = vcmp.ge.f32.partialorder %v385_v37, 0.0  ;;  %v449_v46 = vmul.f32 0.01, %v385_v37 }
  0x6f   : > { %5729 = vst [vmem:[#allocation35_spill] sm:$0xff] %v4778_v39  ;;  %3693 = vmatpush3.bf16.msra.mxu1 %v4621_v60  ;;  %1383 = vmatprep.mubr.bf16.mxu0 %v4778_v39  ;;  %v811_v0 = vrot.slane %v4336_v32, 1  ;;  %v4796_v49 = vpack.c.bf16 %v4755_v42, %v600_v20  ;;  %vm418_vm13 = vcmp.ge.f32.partialorder %v386_v61, 0.0  ;;  %v450_v60 = vmul.f32 0.01, %v386_v61 }
  0x70   : > { %1817 = vmatprep.mubr.bf16.mxu1 %v4347_v40  ;;  %v4799_v14 = vsel %vm581_vm0, 0.0, %v603_v21  ;;  %3694 = vmatprep.subr.bf16.mxu1 %v4031_v30  ;;  %v4802_v29 = vsel %vm581_vm0, %v603_v21, %v604_v6  ;;  %v4805_v32 = vsel %vm581_vm0, %v604_v6, 0.0  ;;  %v481_v47 = vsel %vm417_vm12, %v385_v37, %v449_v46 }
  0x71   : > { %v798_v45 = vrot.slane %v4799_v14, 1  ;;  %v799_v40 = vrot.slane %v4802_v29, 1  ;;  %v801_v20 = vrot.slane %v4805_v32, 1  ;;  %v482_v54 = vsel %vm418_vm13, %v386_v61, %v450_v60 }
  0x72   : > { %v810_v24 = vsel %vm762_vm1, %v808_v59, %v809_v48  ;;  %v4812_v31 = vpack.c.bf16 %v4802_v29, %v603_v21  ;;  %v606_v44 = vrot.slane %v481_v47, 7  ;;  %v607_v39 = vrot.slane %v482_v54, 7 }
  0x73   : > { %3695 = vmatpush3.bf16.msra.mxu1 %v4031_v30  ;;  %v812_v50 = vsel %vm762_vm1, %v809_v48, %v811_v0  ;;  %v800_v6 = vsel %vm762_vm1, %v798_v45, %v799_v40  ;;  %v802_v13 = vsel %vm762_vm1, %v799_v40, %v801_v20  ;;  %v4819_v37 = vpack.c.bf16 %v4327_v25, %v4310_v8  ;;  %v4033_v8 = vld [vmem:[%s5641_s1 + $0x98] sm:$0xff]  }
  0x74   : > { %3696 = vmatprep.subr.bf16.mxu1 %v4032_v28  ;;  %v813_v61 = vrot.slane %v4365_v52, 1  ;;  %2966 = vmatmul.mubr.msk.bf16.gmra.mrb[20].mxu0 %vm4349_vm11, %v4796_v49  ;;  %v4825_v30 = vpack.c.bf16 %v802_v13, %v800_v6  ;;  %v4828_v59 = vsel %vm581_vm0, %v606_v44, %v607_v39  ;;  %v4831_v48 = vsel %vm581_vm0, 0.0, %v606_v44 }
  0x75   : > { %v4834_v21 = vsel %vm581_vm0, %v607_v39, 0.0  ;;  %v803_v25 = vrot.slane %v4831_v48, 1  ;;  %v804_v52 = vrot.slane %v4828_v59, 1  ;;  %v4845_v46 = vpack.c.bf16 %v812_v50, %v810_v24 }
  0x76   : > { %3038 = vmatmul.mubr.msk.bf16.gmra.mrb[20].mxu1 %vm4349_vm11, %v4340_v34  ;;  %v806_v13 = vrot.slane %v4834_v21, 1  ;;  %1391 = vmatprep.mubr.bf16.mxu0 %v4825_v30  ;;  %v4850_v39 = vpack.c.bf16 %v4828_v59, %v606_v44  ;;  %v814_v0 = vrot.slane %v4375_v56, 1  ;;  %v816_v60 = vrot.slane %v4378_v57, 1 }
  0x77   : > { %1825 = vmatprep.mubr.bf16.mxu1 %v4448_v1  ;;  %v818_v34 = vrot.slane %v4458_v33, 1  ;;  %v805_v45 = vsel %vm762_vm1, %v803_v25, %v804_v52  ;;  %3697 = vmatpush3.bf16.msra.mxu1 %v4032_v28  ;;  %v819_v50 = vrot.slane %v4454_v27, 1  ;;  %v821_v40 = vrot.slane %v4461_v35, 1  ;;  %v4034_v33 = vld [vmem:[%s5641_s1 + $0xa0] sm:$0xff]  }
  0x78   : > { %v807_v47 = vsel %vm762_vm1, %v804_v52, %v806_v13  ;;  %v815_v44 = vsel %vm762_vm1, %v813_v61, %v814_v0  ;;  %v817_v54 = vsel %vm762_vm1, %v814_v0, %v816_v60  ;;  %v4865_v57 = vpack.c.bf16 %v4454_v27, %v4442_v9  ;;  %3698 = vmatprep.subr.bf16.mxu1 %v4033_v8 }
  0x79   : > { %v4859_v20 = vpack.c.bf16 %v807_v47, %v805_v45  ;;  %v4870_v28 = vpack.c.bf16 %v817_v54, %v815_v44  ;;  %v820_v24 = vsel %vm762_vm1, %v818_v34, %v819_v50  ;;  %v822_v35 = vsel %vm762_vm1, %v819_v50, %v821_v40 }
  0x7a   : > { %v823_v6 = vrot.slane %v4488_v5, 1  ;;  %v4875_v61 = vpack.c.bf16 %v822_v35, %v820_v24  ;;  %v824_v25 = vrot.slane %v4497_v7, 1  ;;  %v826_v9 = vrot.slane %v4500_v23, 1 }
  0x7b   : > { %v4881_v27 = vpack.c.bf16 %v4497_v7, %v4472_v53  ;;  %3699 = vmatpush3.bf16.msra.mxu1 %v4033_v8  ;;  %v828_v52 = vrot.slane %v4576_v3, 1  ;;  %v829_v13 = vrot.slane %v4572_v16, 1  ;;  %v831_v0 = vrot.slane %v4579_v10, 1  ;;  %v4035_v10 = vld [vmem:[%s5641_s1 + $0xa8] sm:$0xff]  }
  0x7c   : > { %v4888_v5 = vpack.c.bf16 %v4572_v16, %v4556_v58  ;;  %2970 = vmatmul.mubr.msk.bf16.gmra.mrb[24].mxu0 %vm4349_vm11, %v4812_v31  ;;  %v825_v23 = vsel %vm762_vm1, %v823_v6, %v824_v25  ;;  %v827_v53 = vsel %vm762_vm1, %v824_v25, %v826_v9  ;;  %3700 = vmatprep.subr.bf16.mxu1 %v4034_v33  ;;  %v833_v7 = vrot.slane %v4614_v63, 1  ;;  %v5731_v6 = vld [vmem:[#allocation29_spill] sm:$0xff] }
  0x7d   : > { %v834_v3 = vrot.slane %v4626_v26, 1  ;;  %1399 = vmatprep.mubr.bf16.mxu0 %v4859_v20  ;;  %v4904_v58 = vpack.c.bf16 %v827_v53, %v825_v23  ;;  %v830_v16 = vsel %vm762_vm1, %v828_v52, %v829_v13  ;;  %v832_v8 = vsel %vm762_vm1, %v829_v13, %v831_v0  ;;  %v5733_v13 = vld [vmem:[#allocation14_spill] sm:$0xff]  ;;  %v5735_v23 = vld [vmem:[#allocation13_spill] sm:$0xff] }
  0x7e   : > { %3042 = vmatmul.mubr.msk.bf16.gmra.mrb[24].mxu1 %vm4349_vm11, %v4432_v62  ;;  %v836_v63 = vrot.slane %v4629_v36, 1  ;;  %v4910_v60 = vpack.c.bf16 %v832_v8, %v830_v16  ;;  %v4915_v45 = vpack.c.bf16 %v4626_v26, %v4603_v11  ;;  %v838_v47 = vrot.slane %v4667_v38, 1  ;;  %v5730_v26 = vld [vmem:[#allocation31_spill] sm:$0xff] }
  0x7f   : > { %1833 = vmatprep.mubr.bf16.mxu1 %v4568_v15  ;;  %v835_v34 = vsel %vm762_vm1, %v833_v7, %v834_v3  ;;  %3701 = vmatpush3.bf16.msra.mxu1 %v4034_v33  ;;  %v839_v40 = vrot.slane %v4679_v22, 1  ;;  %v841_v44 = vrot.slane %v4682_v18, 1  ;;  %v4923_v36 = vpack.c.bf16 %v4679_v22, %v4655_v17  ;;  %v4038_v33 = vld [vmem:[%s5641_s1 + $0xb0] sm:$0xff]   ;;  %v5737_v16 = vld [vmem:[#allocation7_spill] sm:$0xff] }
  0x80   : > { %v837_v50 = vsel %vm762_vm1, %v834_v3, %v836_v63  ;;  %3702 = vmatprep.subr.bf16.mxu1 %v4035_v10  ;;  %v843_v24 = vrot.slane %v4702_v2, 1  ;;  %v844_v11 = vrot.slane %v4712_v19, 1  ;;  %v846_v38 = vrot.slane %v5730_v26, 1  ;;  %v5732_v22 = vld [vmem:[#allocation8_spill] sm:$0xff]  ;;  %v5739_v63 = vld [vmem:[#allocation9_spill] sm:$0xff]  ;;  %v5744_v26 = vld [vmem:[#allocation19_spill] sm:$0xff] }
  0x81   : > { %v4925_v54 = vpack.c.bf16 %v837_v50, %v835_v34  ;;  %v840_v35 = vsel %vm762_vm1, %v838_v47, %v839_v40  ;;  %v842_v18 = vsel %vm762_vm1, %v839_v40, %v841_v44  ;;  %v4937_v17 = vpack.c.bf16 %v4712_v19, %v5731_v6  ;;  %v5741_v50 = vld [vmem:[#allocation15_spill] sm:$0xff]  ;;  %v4047_v6 = vld [vmem:[%s5641_s1 + $0xb8] sm:$0xff]  }
  0x82   : > { %v896_v25 = vrot.slane %v5732_v22, 2  ;;  %v4940_v9 = vpack.c.bf16 %v842_v18, %v840_v35  ;;  %v845_v2 = vsel %vm762_vm1, %v843_v24, %v844_v11  ;;  %v847_v52 = vsel %vm762_vm1, %v844_v11, %v846_v38  ;;  %v5745_v35 = vld [vmem:[#allocation18_spill] sm:$0xff]  ;;  %v5746_v22 = vld [vmem:[#allocation21_spill] sm:$0xff] }
  0x83   : > { %v5734_v0 = vrot.slane %v5733_v13, 2  ;;  %v5736_v53 = vrot.slane %v5735_v23, 2  ;;  %3703 = vmatpush3.bf16.msra.mxu1 %v4035_v10  ;;  %v4949_v3 = vpack.c.bf16 %v847_v52, %v845_v2  ;;  %v5738_v19 = vrot.slane %v5737_v16, 2  ;;  %v5748_v52 = vld [vmem:[#allocation24_spill] sm:$0xff] }
  0x84   : > { %v5740_v34 = vrot.slane %v5739_v63, 2  ;;  %v5742_v40 = vrot.slane %v5741_v50, 2  ;;  %2974 = vmatmul.mubr.msk.bf16.gmra.mrb[28].mxu0 %vm4349_vm11, %v4850_v39  ;;  %3704 = vmatprep.subr.bf16.mxu1 %v4038_v33  ;;  %v905_v38 = vrot.slane %v5744_v26, 2  ;;  %v906_v18 = vrot.slane %v5745_v35, 2  ;;  %v5751_v16 = vld [vmem:[#allocation28_spill] sm:$0xff] }
  0x85   : > { %v902_v7 = vsel %vm889_vm3, %v5736_v53, %v5734_v0  ;;  %v897_v8 = vsel %vm889_vm3, %v5738_v19, %v896_v25  ;;  %v5743_v44 = vmov %v5734_v0  ;;  %1407 = vmatprep.mubr.bf16.mxu0 %v4845_v46  ;;  %v910_v13 = vrot.slane %v5748_v52, 2  ;;  %v5749_v0 = vld [vmem:[#allocation25_spill] sm:$0xff]  ;;  %v5750_v53 = vld [vmem:[#allocation26_spill] sm:$0xff] }
  0x86   : > { %v899_v47 = vsel %vm889_vm3, %v896_v25, %v5740_v34  ;;  %v904_v24 = vsel %vm889_vm3, %v5743_v44, %v5742_v40  ;;  %3046 = vmatmul.mubr.msk.bf16.gmra.mrb[28].mxu1 %vm4349_vm11, %v5746_v22  ;;  %v5747_v25 = vld [vmem:[#allocation20_spill] sm:$0xff]  ;;  %v911_v23 = vrot.slane %v5749_v0, 2  ;;  %v907_v19 = vsel %vm889_vm3, %v905_v38, %v906_v18  ;;  %v5009_v52 = vld [vmem:[%s5641_s1 + $0x200] sm:$0xff]  }
  0x87   : > { %v4965_v10 = vpack.c.bf16 %v899_v47, %v897_v8  ;;  %v4967_v11 = vpack.c.bf16 %v904_v24, %v902_v7  ;;  %v908_v2 = vrot.slane %v5747_v25, 2  ;;  %v913_v7 = vrot.slane %v5750_v53, 2  ;;  %1841 = vmatprep.mubr.bf16.mxu1 %v5751_v16  ;;  %3705 = vmatpush3.bf16.msra.mxu1 %v4038_v33  ;;  %v5753_v0 = vld [vmem:[#allocation34_spill] sm:$0xff] }
  0x88   : > { %v915_v8 = vrot.slane %v4726_v12, 2  ;;  %v916_v63 = vrot.slane %v4733_v43, 2  ;;  %v918_v34 = vrot.slane %v4736_v55, 2  ;;  %v912_v50 = vsel %vm889_vm3, %v910_v13, %v911_v23  ;;  %3706 = vmatprep.subr.bf16.mxu1 %v4047_v6  ;;  %v5754_v53 = vld [vmem:[#allocation10_spill] sm:$0xff] }
  0x89   : > { %v909_v47 = vsel %vm889_vm3, %v906_v18, %v908_v2  ;;  %v914_v40 = vsel %vm889_vm3, %v911_v23, %v913_v7  ;;  %v920_v44 = vrot.slane %v4747_v51, 2  ;;  %v921_v55 = vrot.slane %v4755_v42, 2 }
  0x8a   : > { %v4991_v24 = vpack.c.bf16 %v909_v47, %v907_v19  ;;  %v4993_v26 = vpack.c.bf16 %v914_v40, %v912_v50  ;;  %v917_v38 = vsel %vm889_vm3, %v915_v8, %v916_v63  ;;  %v919_v12 = vsel %vm889_vm3, %v916_v63, %v918_v34  ;;  %v5755_v19 = vld [vmem:[#allocation33_spill] sm:$0xff]  ;;  %v5756_v8 = vld [vmem:[#allocation35_spill] sm:$0xff]  ;;  %v4041_v47 = vld [vmem:[%s5641_s1 + $0x1d0] sm:$0xff]  }
  0x8b   : > { %v4997_v43 = vpack.c.bf16 %v919_v12, %v917_v38  ;;  %v923_v33 = vrot.slane %v4758_v4, 2  ;;  %v925_v35 = vrot.slane %v4799_v14, 2  ;;  %v926_v18 = vrot.slane %v4802_v29, 2  ;;  %3707 = vmatpush3.bf16.msra.mxu1 %v4047_v6  ;;  %v4039_v63 = vld [vmem:[%s5641_s1 + $0x1c8] sm:$0xff]   ;;  %v4042_v50 = vld [vmem:[%s5641_s1 + $0x190] sm:$0xff]   ;;  %v4043_v40 = vld [vmem:[%s5641_s1 + $0x1d8] sm:$0xff]  }
  0x8c   : > { %v928_v51 = vrot.slane %v4805_v32, 2  ;;  %v930_v25 = vrot.slane %v4831_v48, 2  ;;  %v931_v2 = vrot.slane %v4828_v59, 2  ;;  %v922_v13 = vsel %vm889_vm3, %v920_v44, %v921_v55  ;;  %2978 = vmatmul.mubr.msk.bf16.gmra.mrb[32].mxu0 %vm4349_vm11, %v4819_v37  ;;  %v5752_v48 = vld [vmem:[#allocation27_spill] sm:$0xff]  ;;  %3740 = vmatprep.subr.bf16.mxu1 %v5009_v52  ;;  %v4044_v44 = vld [vmem:[%s5641_s1 + $0x198] sm:$0xff]   ;;  %v4045_v38 = vld [vmem:[%s5641_s1 + $0x1e0] sm:$0xff]  }
  0x8d   : > { %v924_v42 = vsel %vm889_vm3, %v921_v55, %v923_v33  ;;  %v933_v4 = vrot.slane %v4834_v21, 2  ;;  %v927_v29 = vsel %vm889_vm3, %v925_v35, %v926_v18  ;;  %1415 = vmatprep.mubr.bf16.mxu0 %v4870_v28  ;;  %v5035_v7 = vpack.c.bf16 %v4375_v56, %v5754_v53  ;;  %v4037_v56 = vld [vmem:[%s5641_s1 + $0x180] sm:$0xff]   ;;  %v4040_v34 = vld [vmem:[%s5641_s1 + $0x188] sm:$0xff]   ;;  %v4053_v53 = vld [vmem:[%s5641_s1 + $0x1b8] sm:$0xff]  }
  0x8e   : > { %v5017_v14 = vpack.c.bf16 %v924_v42, %v922_v13  ;;  %v929_v32 = vsel %vm889_vm3, %v926_v18, %v928_v51  ;;  %v932_v59 = vsel %vm889_vm3, %v930_v25, %v931_v2  ;;  %3050 = vmatmul.mubr.msk.bf16.gmra.mrb[32].mxu1 %vm4349_vm11, %v5752_v48  ;;  %v4046_v12 = vld [vmem:[%s5641_s1 + $0x1a0] sm:$0xff]   ;;  %v4048_v55 = vld [vmem:[%s5641_s1 + $0x1e8] sm:$0xff]   ;;  %v5759_v25 = vld [vmem:[#allocation4_spill] sm:$0xff] }
  0x8f   : > { %v5026_v6 = vpack.c.bf16 %v929_v32, %v927_v29  ;;  %v934_v21 = vsel %vm889_vm3, %v931_v2, %v933_v4  ;;  %1849 = vmatprep.mubr.bf16.mxu1 %v5753_v0  ;;  %v5757_v33 = vld [vmem:[#allocation3_spill] sm:$0xff]  ;;  %v5758_v18 = vld [vmem:[#allocation2_spill] sm:$0xff]  ;;  %v893_v2 = vrot.slane %v5759_v25, 2  ;;  %v4050_v42 = vld [vmem:[%s5641_s1 + $0x1f0] sm:$0xff]  }
  0x90   : > { %v5030_v23 = vpack.c.bf16 %v934_v21, %v932_v59  ;;  %v890_v35 = vrot.slane %v5757_v33, 2  ;;  %v891_v51 = vrot.slane %v5758_v18, 2  ;;  %v4049_v13 = vld [vmem:[%s5641_s1 + $0x1a8] sm:$0xff]   ;;  %v4051_v32 = vld [vmem:[%s5641_s1 + $0x1b0] sm:$0xff]   ;;  %v4052_v59 = vld [vmem:[%s5641_s1 + $0x1f8] sm:$0xff]  }
  0x91   : > { %v5762_v33 = vld [vmem:[#allocation16_spill] sm:$0xff] }
  0x92   : > { %v892_v4 = vsel %vm889_vm3, %v890_v35, %v891_v51  ;;  %v894_v29 = vsel %vm889_vm3, %v891_v51, %v893_v2  ;;  %v5765_v35 = vld [vmem:[#allocation23_spill] sm:$0xff] }
  0x93   : > { %v5158_v21 = vpack.c.bf16 %v894_v29, %v892_v4 }
  0x94   : > { %2982 = vmatmul.mubr.msk.bf16.gmra.mrb[36].mxu0 %vm4349_vm11, %v5035_v7 }
  0x95   : > { %1423 = vmatprep.mubr.bf16.mxu0 %v4875_v61 }
  0x96   : > { %3054 = vmatmul.mubr.msk.bf16.gmra.mrb[36].mxu1 %vm4349_vm11, %v5755_v19 }
  0x97   : > { %1857 = vmatprep.mubr.bf16.mxu1 %v5756_v8 }
  0x9c   : > { %2986 = vmatmul.mubr.msk.bf16.gmra.mrb[40].mxu0 %vm4349_vm11, %v4865_v57 }
  0x9d   : > { %1431 = vmatprep.mubr.bf16.mxu0 %v4904_v58 }
  0x9e   : > { %3058 = vmatmul.mubr.msk.bf16.gmra.mrb[40].mxu1 %vm4349_vm11, %v4796_v49 }
  0x9f   : > { %1865 = vmatprep.mubr.bf16.mxu1 %v4825_v30 }
  0xa4   : > { %2990 = vmatmul.mubr.msk.bf16.gmra.mrb[44].mxu0 %vm4349_vm11, %v4881_v27 }
  0xa5   : > { %1439 = vmatprep.mubr.bf16.mxu0 %v4910_v60 }
  0xa6   : > { %3062 = vmatmul.mubr.msk.bf16.gmra.mrb[44].mxu1 %vm4349_vm11, %v4812_v31 }
  0xa7   : > { %1873 = vmatprep.mubr.bf16.mxu1 %v4859_v20 }
  0xac   : > { %2994 = vmatmul.mubr.msk.bf16.gmra.mrb[48].mxu0 %vm4349_vm11, %v4888_v5 }
  0xad   : > { %1447 = vmatprep.mubr.bf16.mxu0 %v4925_v54 }
  0xae   : > { %3066 = vmatmul.mubr.msk.bf16.gmra.mrb[48].mxu1 %vm4349_vm11, %v4850_v39 }
  0xaf   : > { %1881 = vmatprep.mubr.bf16.mxu1 %v4845_v46 }
  0xb4   : > { %2998 = vmatmul.mubr.msk.bf16.gmra.mrb[52].mxu0 %vm4349_vm11, %v4915_v45 }
  0xb5   : > { %1455 = vmatprep.mubr.bf16.mxu0 %v4940_v9 }
  0xb6   : > { %3070 = vmatmul.mubr.msk.bf16.gmra.mrb[52].mxu1 %vm4349_vm11, %v4819_v37 }
  0xb7   : > { %1889 = vmatprep.mubr.bf16.mxu1 %v4870_v28 }
  0xbc   : > { %3002 = vmatmul.mubr.msk.bf16.gmra.mrb[56].mxu0 %vm4349_vm11, %v4923_v36 }
  0xbd   : > { %1463 = vmatprep.mubr.bf16.mxu0 %v4949_v3 }
  0xbe   : > { %3074 = vmatmul.mubr.msk.bf16.gmra.mrb[56].mxu1 %vm4349_vm11, %v5035_v7 }
  0xbf   : > { %1897 = vmatprep.mubr.bf16.mxu1 %v4875_v61 }
  0xc4   : > { %3006 = vmatmul.mubr.msk.bf16.gmra.mrb[60].mxu0 %vm4349_vm11, %v4937_v17 }
  0xc5   : > { %3660 = vmatprep.mubr.bf16.mxu0 %v4965_v10 }
  0xc6   : > { %3078 = vmatmul.mubr.msk.bf16.gmra.mrb[60].mxu1 %vm4349_vm11, %v4865_v57 }
  0xc7   : > { %1905 = vmatprep.mubr.bf16.mxu1 %v4904_v58 }
  0xcc   : > { %3661 = vmatmul.mubr.bf16.vlgmr.msra.gmra.mrb[64].mxu0 %v4967_v11 }
  0xcd   : > { %3509 = vmatpush3.bf16.msra.mxu0 %v4037_v56  ;;  %3664 = vmatprep.mubr.bf16.mxu0 %v4991_v24  ;;  %v4055_v56 = vld [vmem:[%s5641_s1 + $0x208] sm:$0xff]  }
  0xce   : > { %3082 = vmatmul.mubr.msk.bf16.gmra.mrb[64].mxu1 %vm4349_vm11, %v4881_v27  ;;  %3510 = vmatprep.subr.bf16.mxu0 %v4039_v63  ;;  %v4057_v63 = vld [vmem:[%s5641_s1 + $0x218] sm:$0xff]  }
  0xcf   : > { %1913 = vmatprep.mubr.bf16.mxu1 %v4910_v60 }
  0xd1   : > { %3511 = vmatpush3.bf16.msra.mxu0 %v4040_v34 }
  0xd2   : > { %3512 = vmatprep.subr.bf16.mxu0 %v4041_v47 }
  0xd4   : > { %3665 = vmatmul.mubr.bf16.gmra.mrb[68].mxu0 %v4993_v26 }
  0xd5   : > { %3513 = vmatpush3.bf16.msra.mxu0 %v4042_v50  ;;  %3668 = vmatprep.mubr.bf16.mxu0 %v4997_v43  ;;  %v5760_v50 = vld [vmem:[#allocation11_spill] sm:$0xff] }
  0xd6   : > { %3086 = vmatmul.mubr.msk.bf16.gmra.mrb[68].mxu1 %vm4349_vm11, %v4888_v5  ;;  %3514 = vmatprep.subr.bf16.mxu0 %v4043_v40 }
  0xd7   : > { %1921 = vmatprep.mubr.bf16.mxu1 %v4925_v54 }
  0xd9   : > { %3515 = vmatpush3.bf16.msra.mxu0 %v4044_v44 }
  0xda   : > { %3516 = vmatprep.subr.bf16.mxu0 %v4045_v38 }
  0xdc   : > { %3669 = vmatmul.mubr.bf16.gmra.mrb[72].mxu0 %v5017_v14 }
  0xdd   : > { %3517 = vmatpush3.bf16.msra.mxu0 %v4046_v12  ;;  %3672 = vmatprep.mubr.bf16.mxu0 %v5026_v6 }
  0xde   : > { %3090 = vmatmul.mubr.msk.bf16.gmra.mrb[72].mxu1 %vm4349_vm11, %v4915_v45  ;;  %3518 = vmatprep.subr.bf16.mxu0 %v4048_v55 }
  0xdf   : > { %1929 = vmatprep.mubr.bf16.mxu1 %v4940_v9 }
  0xe1   : > { %3519 = vmatpush3.bf16.msra.mxu0 %v4049_v13 }
  0xe2   : > { %3520 = vmatprep.subr.bf16.mxu0 %v4050_v42 }
  0xe4   : > { %3673 = vmatmul.mubr.bf16.gmra.mrb[76].mxu0 %v5030_v23 }
  0xe5   : > { %3521 = vmatpush3.bf16.msra.mxu0 %v4051_v32  ;;  %2324 = vmatprep.mubr.bf16.mxu0 %v4448_v1  ;;  %v4056_v1 = vld [vmem:[%s5641_s1 + $0x210] sm:$0xff]  }
  0xe6   : > { %3094 = vmatmul.mubr.msk.bf16.gmra.mrb[76].mxu1 %vm4349_vm11, %v4923_v36  ;;  %3522 = vmatprep.subr.bf16.mxu0 %v4052_v59 }
  0xe7   : > { %3708 = vmatprep.mubr.bf16.mxu1 %v5158_v21 }
  0xe9   : > { %3523 = vmatpush3.bf16.msra.mxu0 %v4053_v53 }
  0xec   : > { %3170 = vmatmul.mubr.msk.bf16.vlgmr.msra.gmra.mrb[80].mxu0 %vm4349_vm11, %v4432_v62  ;;  %v4058_v62 = vld [vmem:[%s5641_s1 + $0x220] sm:$0xff]  }
  0xed   : > { %2332 = vmatprep.mubr.bf16.mxu0 %v4568_v15  ;;  %v4059_v15 = vld [vmem:[%s5641_s1 + $0x228] sm:$0xff]  }
  0xee   : > { %3709 = vmatmul.mubr.bf16.vlgmr.msra.gmra.mrb[80].mxu1 %v4965_v10  ;;  %v4060_v10 = vld [vmem:[%s5641_s1 + $0x230] sm:$0xff]  }
  0xef   : > { %3741 = vmatpush3.bf16.msra.mxu1 %v5009_v52  ;;  %3712 = vmatprep.mubr.bf16.mxu1 %v4967_v11 }
  0xf0   : > { %3742 = vmatprep.subr.bf16.mxu1 %v4055_v56 }
  0xf3   : > { %3743 = vmatpush3.bf16.msra.mxu1 %v4055_v56 }
  0xf4   : > { %3744 = vmatprep.subr.bf16.mxu1 %v4056_v1  ;;  %3174 = vmatmul.mubr.msk.bf16.gmra.mrb[84].mxu0 %vm4349_vm11, %v5746_v22 }
  0xf5   : > { %2340 = vmatprep.mubr.bf16.mxu0 %v5751_v16 }
  0xf6   : > { %3713 = vmatmul.mubr.bf16.gmra.mrb[84].mxu1 %v4991_v24 }
  0xf7   : > { %3716 = vmatprep.mubr.bf16.mxu1 %v4993_v26  ;;  %3745 = vmatpush3.bf16.msra.mxu1 %v4056_v1 }
  0xf8   : > { %3746 = vmatprep.subr.bf16.mxu1 %v4057_v63 }
  0xfb   : > { %3747 = vmatpush3.bf16.msra.mxu1 %v4057_v63 }
  0xfc   : > { %3748 = vmatprep.subr.bf16.mxu1 %v4058_v62  ;;  %3178 = vmatmul.mubr.msk.bf16.gmra.mrb[88].mxu0 %vm4349_vm11, %v5752_v48 }
  0xfd   : > { %2348 = vmatprep.mubr.bf16.mxu0 %v5753_v0  ;;  %v4061_v0 = vld [vmem:[%s5641_s1 + $0x238] sm:$0xff]  }
  0xfe   : > { %3717 = vmatmul.mubr.bf16.gmra.mrb[88].mxu1 %v4997_v43 }
  0xff   : > { %3720 = vmatprep.mubr.bf16.mxu1 %v5017_v14  ;;  %3749 = vmatpush3.bf16.msra.mxu1 %v4058_v62 }
 0x100   : > { %3750 = vmatprep.subr.bf16.mxu1 %v4059_v15 }
 0x103   : > { %v3252_v22 = vpop.f32.mrb[0].mxu0  ;;  %3751 = vmatpush3.bf16.msra.mxu1 %v4059_v15 }
 0x104   : > { %v3253_v16 = vpop.f32.mrb[1].mxu0  ;;  %3752 = vmatprep.subr.bf16.mxu1 %v4060_v10  ;;  %3182 = vmatmul.mubr.msk.bf16.gmra.mrb[92].mxu0 %vm4349_vm11, %v5755_v19  ;;  %v5761_v19 = vld [vmem:[#allocation12_spill] sm:$0xff] }
 0x105   : > { %v5206_v52 = vadd.f32 %v3253_v16, %v3252_v22  ;;  %v3255_v34 = vpop.f32.mrb[2].mxu0  ;;  %2356 = vmatprep.mubr.bf16.mxu0 %v5756_v8 }
 0x106   : > { %v3256_v48 = vpop.f32.mrb[3].mxu0  ;;  %3721 = vmatmul.mubr.bf16.gmra.mrb[92].mxu1 %v5026_v6 }
 0x107   : > { %v5214_v47 = vadd.f32 %v3256_v48, %v3255_v34  ;;  %3724 = vmatprep.mubr.bf16.mxu1 %v5030_v23  ;;  %3753 = vmatpush3.bf16.msra.mxu1 %v4060_v10 }
 0x108   : > { %3754 = vmatprep.subr.bf16.mxu1 %v4061_v0 }
 0x10b   : > { %3755 = vmatpush3.bf16.msra.mxu1 %v4061_v0 }
 0x10c   : > { %3186 = vmatmul.mubr.msk.bf16.gmra.mrb[96].mxu0 %vm4349_vm11, %v4796_v49  ;;  %v5763_v49 = vld [vmem:[#allocation17_spill] sm:$0xff] }
 0x10d   : > { %2364 = vmatprep.mubr.bf16.mxu0 %v4825_v30  ;;  %v5764_v30 = vld [vmem:[#allocation22_spill] sm:$0xff] }
 0x10e   : > { %3725 = vmatmul.mubr.bf16.gmra.mrb[0].mxu1 %v5760_v50 }
 0x10f   : > { %3728 = vmatprep.mubr.bf16.mxu1 %v5761_v19  ;;  %v3258_v40 = vpop.f32.mrb[4].mxu0 }
 0x110   : > { %v3259_v44 = vpop.f32.mrb[5].mxu0 }
 0x111   : > { %v5225_v38 = vadd.f32 %v3259_v44, %v3258_v40  ;;  %v3261_v8 = vpop.f32.mrb[6].mxu0 }
 0x112   : > { %v3262_v12 = vpop.f32.mrb[7].mxu0 }
 0x113   : > { %v5227_v55 = vadd.f32 %v3262_v12, %v3261_v8 }
 0x114   : > { %3190 = vmatmul.mubr.msk.bf16.gmra.mrb[100].mxu0 %vm4349_vm11, %v4812_v31 }
 0x115   : > { %2372 = vmatprep.mubr.bf16.mxu0 %v4859_v20  ;;  %v5766_v20 = vld [vmem:[#allocation30_spill] sm:$0xff] }
 0x116   : > { %3729 = vmatmul.mubr.bf16.gmra.mrb[4].mxu1 %v5762_v33 }
 0x117   : > { %3732 = vmatprep.mubr.bf16.mxu1 %v5763_v49 }
 0x11c   : > { %3194 = vmatmul.mubr.msk.bf16.gmra.mrb[104].mxu0 %vm4349_vm11, %v4850_v39 }
 0x11d   : > { %2380 = vmatprep.mubr.bf16.mxu0 %v4845_v46 }
 0x11e   : > { %3733 = vmatmul.mubr.bf16.gmra.mrb[8].mxu1 %v5764_v30 }
 0x11f   : > { %3736 = vmatprep.mubr.bf16.mxu1 %v5765_v35  ;;  %v3264_v18 = vpop.f32.mrb[8].mxu0 }
 0x120   : > { %v3265_v51 = vpop.f32.mrb[9].mxu0 }
 0x121   : > { %v5241_v25 = vadd.f32 %v3265_v51, %v3264_v18  ;;  %v3267_v31 = vpop.f32.mrb[10].mxu0 }
 0x122   : > { %v3268_v2 = vpop.f32.mrb[11].mxu0 }
 0x123   : > { %v5243_v13 = vadd.f32 %v3268_v2, %v3267_v31 }
 0x124   : > { %3198 = vmatmul.mubr.msk.bf16.gmra.mrb[108].mxu0 %vm4349_vm11, %v4819_v37 }
 0x125   : > { %2388 = vmatprep.mubr.bf16.mxu0 %v4870_v28 }
 0x126   : > { %3737 = vmatmul.mubr.bf16.gmra.mrb[12].mxu1 %v5766_v20 }
 0x127   : > { %3756 = vmatprep.mubr.bf16.mxu1 %v4967_v11 }
 0x12c   : > { %3202 = vmatmul.mubr.msk.bf16.gmra.mrb[112].mxu0 %vm4349_vm11, %v5035_v7 }
 0x12d   : > { %2396 = vmatprep.mubr.bf16.mxu0 %v4875_v61 }
 0x12e   : > { %3757 = vmatmul.mubr.bf16.vlgmr.msra.gmra.mrb[80].mxu1 %v4991_v24 }
 0x12f   : > { %3760 = vmatprep.mubr.bf16.mxu1 %v4993_v26  ;;  %v3270_v46 = vpop.f32.mrb[12].mxu0 }
 0x130   : > { %v3271_v39 = vpop.f32.mrb[13].mxu0 }
 0x131   : > { %v5257_v42 = vadd.f32 %v3271_v39, %v3270_v46  ;;  %v3273_v37 = vpop.f32.mrb[14].mxu0 }
 0x132   : > { %v3274_v4 = vpop.f32.mrb[15].mxu0 }
 0x133   : > { %v5259_v29 = vadd.f32 %v3274_v4, %v3273_v37 }
 0x134   : > { %3206 = vmatmul.mubr.msk.bf16.gmra.mrb[116].mxu0 %vm4349_vm11, %v4865_v57 }
 0x135   : > { %2404 = vmatprep.mubr.bf16.mxu0 %v4904_v58 }
 0x136   : > { %3761 = vmatmul.mubr.bf16.gmra.mrb[84].mxu1 %v4997_v43 }
 0x137   : > { %3764 = vmatprep.mubr.bf16.mxu1 %v5017_v14 }
 0x13c   : > { %3210 = vmatmul.mubr.msk.bf16.gmra.mrb[120].mxu0 %vm4349_vm11, %v4881_v27 }
 0x13d   : > { %2412 = vmatprep.mubr.bf16.mxu0 %v4910_v60 }
 0x13e   : > { %3765 = vmatmul.mubr.bf16.gmra.mrb[88].mxu1 %v5026_v6 }
 0x13f   : > { %3768 = vmatprep.mubr.bf16.mxu1 %v5030_v23  ;;  %v3276_v28 = vpop.f32.mrb[16].mxu0 }
 0x140   : > { %v3277_v61 = vpop.f32.mrb[17].mxu0 }
 0x141   : > { %v3388_v11 = vpop.f32.mrb[16].mxu1  ;;  %v5273_v57 = vadd.f32 %v3277_v61, %v3276_v28  ;;  %v3279_v24 = vpop.f32.mrb[18].mxu0 }
 0x142   : > { %v3389_v26 = vpop.f32.mrb[17].mxu1  ;;  %v3280_v58 = vpop.f32.mrb[19].mxu0 }
 0x143   : > { %v5275_v43 = vadd.f32 %v3389_v26, %v3388_v11  ;;  %v3391_v14 = vpop.f32.mrb[18].mxu1  ;;  %v5277_v7 = vadd.f32 %v3280_v58, %v3279_v24 }
 0x144   : > { %v3392_v27 = vpop.f32.mrb[19].mxu1  ;;  %3214 = vmatmul.mubr.msk.bf16.gmra.mrb[124].mxu0 %vm4349_vm11, %v4888_v5 }
 0x145   : > { %v5279_v32 = vadd.f32 %v3392_v27, %v3391_v14  ;;  %2420 = vmatprep.mubr.bf16.mxu0 %v4925_v54 }
 0x146   : > { %3769 = vmatmul.mubr.bf16.gmra.mrb[92].mxu1 %v5760_v50 }
 0x147   : > { %3772 = vmatprep.mubr.bf16.mxu1 %v5761_v19  ;;  %v3282_v60 = vpop.f32.mrb[20].mxu0 }
 0x148   : > { %v3283_v6 = vpop.f32.mrb[21].mxu0 }
 0x149   : > { %v3394_v23 = vpop.f32.mrb[20].mxu1  ;;  %v5287_v59 = vadd.f32 %v3283_v6, %v3282_v60  ;;  %v3285_v53 = vpop.f32.mrb[22].mxu0 }
 0x14a   : > { %v3395_v56 = vpop.f32.mrb[21].mxu1  ;;  %v3286_v1 = vpop.f32.mrb[23].mxu0 }
 0x14b   : > { %v5289_v63 = vadd.f32 %v3395_v56, %v3394_v23  ;;  %v3397_v62 = vpop.f32.mrb[22].mxu1  ;;  %v5291_v15 = vadd.f32 %v3286_v1, %v3285_v53 }
 0x14c   : > { %v3398_v5 = vpop.f32.mrb[23].mxu1  ;;  %3218 = vmatmul.mubr.msk.bf16.gmra.mrb[128].mxu0 %vm4349_vm11, %v4915_v45 }
 0x14d   : > { %v5293_v10 = vadd.f32 %v3398_v5, %v3397_v62  ;;  %2428 = vmatprep.mubr.bf16.mxu0 %v4940_v9 }
 0x14e   : > { %3773 = vmatmul.mubr.bf16.gmra.mrb[0].mxu1 %v5762_v33 }
 0x14f   : > { %3776 = vmatprep.mubr.bf16.mxu1 %v5763_v49  ;;  %v3288_v54 = vpop.f32.mrb[24].mxu0 }
 0x150   : > { %v3289_v22 = vpop.f32.mrb[25].mxu0 }
 0x151   : > { %v3400_v16 = vpop.f32.mrb[24].mxu1  ;;  %v5301_v34 = vadd.f32 %v3289_v22, %v3288_v54  ;;  %v3291_v48 = vpop.f32.mrb[26].mxu0 }
 0x152   : > { %v3401_v0 = vpop.f32.mrb[25].mxu1  ;;  %v3292_v50 = vpop.f32.mrb[27].mxu0 }
 0x153   : > { %v5303_v19 = vadd.f32 %v3401_v0, %v3400_v16  ;;  %v3403_v40 = vpop.f32.mrb[26].mxu1  ;;  %v5305_v44 = vadd.f32 %v3292_v50, %v3291_v48 }
 0x154   : > { %v3404_v45 = vpop.f32.mrb[27].mxu1  ;;  %3222 = vmatmul.mubr.msk.bf16.gmra.mrb[132].mxu0 %vm4349_vm11, %v4923_v36 }
 0x155   : > { %v5307_v8 = vadd.f32 %v3404_v45, %v3403_v40  ;;  %2436 = vmatprep.mubr.bf16.mxu0 %v4949_v3  ;;  %v5767_v3 = vld [vmem:[#allocation6_spill] sm:$0xff] }
 0x156   : > { %3777 = vmatmul.mubr.bf16.gmra.mrb[4].mxu1 %v5764_v30  ;;  %v5768_v30 = vld [vmem:[#allocation32_spill] sm:$0xff] }
 0x157   : > { %3780 = vmatprep.mubr.bf16.mxu1 %v5765_v35  ;;  %v3294_v9 = vpop.f32.mrb[28].mxu0 }
 0x158   : > { %v3295_v12 = vpop.f32.mrb[29].mxu0 }
 0x159   : > { %v3406_v33 = vpop.f32.mrb[28].mxu1  ;;  %v5315_v49 = vadd.f32 %v3295_v12, %v3294_v9  ;;  %v3297_v18 = vpop.f32.mrb[30].mxu0 }
 0x15a   : > { %v3407_v51 = vpop.f32.mrb[29].mxu1  ;;  %v3298_v31 = vpop.f32.mrb[31].mxu0 }
 0x15b   : > { %v5317_v2 = vadd.f32 %v3407_v51, %v3406_v33  ;;  %v3409_v46 = vpop.f32.mrb[30].mxu1  ;;  %v5319_v39 = vadd.f32 %v3298_v31, %v3297_v18 }
 0x15c   : > { %v3410_v36 = vpop.f32.mrb[31].mxu1  ;;  %3226 = vmatmul.mubr.msk.bf16.gmra.mrb[136].mxu0 %vm4349_vm11, %v4937_v17  ;;  %v5769_v17 = vld [vmem:[#allocation5_spill] sm:$0xff] }
 0x15d   : > { %v5321_v37 = vadd.f32 %v3410_v36, %v3409_v46  ;;  %2444 = vmatprep.mubr.bf16.mxu0 %v5767_v3 }
 0x15e   : > { %3781 = vmatmul.mubr.bf16.gmra.mrb[8].mxu1 %v5766_v20 }
 0x15f   : > { %3784 = vmatprep.mubr.bf16.mxu1 %v5768_v30  ;;  %v3300_v35 = vpop.f32.mrb[32].mxu0 }
 0x160   : > { %v3301_v4 = vpop.f32.mrb[33].mxu0 }
 0x161   : > { %v3412_v28 = vpop.f32.mrb[32].mxu1  ;;  %v3302_v61 = vadd.f32 %v3301_v4, %v3300_v35  ;;  %v3303_v11 = vpop.f32.mrb[34].mxu0 }
 0x162   : > { %v3413_v24 = vpop.f32.mrb[33].mxu1  ;;  %v3304_v26 = vpop.f32.mrb[35].mxu0 }
 0x163   : > { %v5329_v58 = vadd.f32 %v3413_v24, %v3412_v28  ;;  %v3415_v14 = vpop.f32.mrb[34].mxu1  ;;  %v3305_v27 = vadd.f32 %v3304_v26, %v3303_v11 }
 0x164   : > { %v3416_v60 = vpop.f32.mrb[35].mxu1  ;;  %3230 = vmatmul.mubr.msk.bf16.gmra.mrb[140].mxu0 %vm4349_vm11, %v5769_v17 }
 0x165   : > { %v5331_v6 = vadd.f32 %v3416_v60, %v3415_v14 }
 0x166   : > { %3785 = vmatmul.mubr.bf16.gmra.mrb[12].mxu1 %v5158_v21 }
 0x167   : > { %v3306_v20 = vpop.f32.mrb[36].mxu0 }
 0x168   : > { %v3307_v23 = vpop.f32.mrb[37].mxu0 }
 0x169   : > { %v3418_v53 = vpop.f32.mrb[36].mxu1  ;;  %v3308_v56 = vadd.f32 %v3307_v23, %v3306_v20  ;;  %v3309_v1 = vpop.f32.mrb[38].mxu0 }
 0x16a   : > { %v3419_v62 = vpop.f32.mrb[37].mxu1  ;;  %v3310_v5 = vpop.f32.mrb[39].mxu0 }
 0x16b   : > { %v5337_v54 = vadd.f32 %v3419_v62, %v3418_v53  ;;  %v3421_v22 = vpop.f32.mrb[38].mxu1  ;;  %v3311_v16 = vadd.f32 %v3310_v5, %v3309_v1 }
 0x16c   : > { %v3422_v48 = vpop.f32.mrb[39].mxu1 }
 0x16d   : > { %v5339_v0 = vadd.f32 %v3422_v48, %v3421_v22 }
 0x16f   : > { %v3312_v50 = vpop.f32.mrb[40].mxu0 }
 0x170   : > { %v3313_v40 = vpop.f32.mrb[41].mxu0 }
 0x171   : > { %v3424_v41 = vpop.f32.mrb[40].mxu1  ;;  %v3314_v45 = vadd.f32 %v3313_v40, %v3312_v50  ;;  %v3315_v9 = vpop.f32.mrb[42].mxu0 }
 0x172   : > { %v3425_v21 = vpop.f32.mrb[41].mxu1  ;;  %v3316_v12 = vpop.f32.mrb[43].mxu0 }
 0x173   : > { %v5341_v33 = vadd.f32 %v3425_v21, %v3424_v41  ;;  %v3427_v18 = vpop.f32.mrb[42].mxu1  ;;  %v3317_v51 = vadd.f32 %v3316_v12, %v3315_v9 }
 0x174   : > { %v3428_v31 = vpop.f32.mrb[43].mxu1 }
 0x175   : > { %v5343_v46 = vadd.f32 %v3428_v31, %v3427_v18 }
 0x177   : > { %v3318_v36 = vpop.f32.mrb[44].mxu0 }
 0x178   : > { %v3319_v3 = vpop.f32.mrb[45].mxu0 }
 0x179   : > { %v3430_v30 = vpop.f32.mrb[44].mxu1  ;;  %v3320_v35 = vadd.f32 %v3319_v3, %v3318_v36  ;;  %v3321_v4 = vpop.f32.mrb[46].mxu0 }
 0x17a   : > { %v3431_v28 = vpop.f32.mrb[45].mxu1  ;;  %v3322_v11 = vpop.f32.mrb[47].mxu0 }
 0x17b   : > { %v5345_v24 = vadd.f32 %v3431_v28, %v3430_v30  ;;  %v3433_v26 = vpop.f32.mrb[46].mxu1  ;;  %v3323_v14 = vadd.f32 %v3322_v11, %v3321_v4 }
 0x17c   : > { %v3434_v60 = vpop.f32.mrb[47].mxu1 }
 0x17d   : > { %v5347_v17 = vadd.f32 %v3434_v60, %v3433_v26 }
 0x17f   : > { %v3324_v20 = vpop.f32.mrb[48].mxu0 }
 0x180   : > { %v3325_v53 = vpop.f32.mrb[49].mxu0 }
 0x181   : > { %v3436_v23 = vpop.f32.mrb[48].mxu1  ;;  %v5349_v1 = vadd.f32 %v3325_v53, %v3324_v20  ;;  %v3327_v5 = vpop.f32.mrb[50].mxu0 }
 0x182   : > { %v3437_v62 = vpop.f32.mrb[49].mxu1  ;;  %v3328_v50 = vpop.f32.mrb[51].mxu0 }
 0x183   : > { %v3438_v22 = vadd.f32 %v3437_v62, %v3436_v23  ;;  %v3439_v48 = vpop.f32.mrb[50].mxu1  ;;  %v5351_v40 = vadd.f32 %v3328_v50, %v3327_v5 }
 0x184   : > { %v3440_v41 = vpop.f32.mrb[51].mxu1 }
 0x185   : > { %v5353_v9 = vadd.f32 %v3438_v22, %v3302_v61  ;;  %v3441_v21 = vadd.f32 %v3440_v41, %v3439_v48 }
 0x187   : > { %v5355_v12 = vadd.f32 %v3441_v21, %v3305_v27  ;;  %v3330_v18 = vpop.f32.mrb[52].mxu0 }
 0x188   : > { %v3331_v36 = vpop.f32.mrb[53].mxu0 }
 0x189   : > { %v3442_v31 = vpop.f32.mrb[52].mxu1  ;;  %v5357_v3 = vadd.f32 %v3331_v36, %v3330_v18  ;;  %v3333_v4 = vpop.f32.mrb[54].mxu0 }
 0x18a   : > { %v3443_v30 = vpop.f32.mrb[53].mxu1  ;;  %v3334_v26 = vpop.f32.mrb[55].mxu0 }
 0x18b   : > { %v3444_v28 = vadd.f32 %v3443_v30, %v3442_v31  ;;  %v3445_v11 = vpop.f32.mrb[54].mxu1  ;;  %v5359_v60 = vadd.f32 %v3334_v26, %v3333_v4 }
 0x18c   : > { %v3446_v20 = vpop.f32.mrb[55].mxu1 }
 0x18d   : > { %v5361_v23 = vadd.f32 %v3444_v28, %v3308_v56  ;;  %v3447_v61 = vadd.f32 %v3446_v20, %v3445_v11 }
 0x18f   : > { %v5363_v53 = vadd.f32 %v3447_v61, %v3311_v16  ;;  %v3336_v27 = vpop.f32.mrb[56].mxu0 }
 0x190   : > { %v3337_v5 = vpop.f32.mrb[57].mxu0 }
 0x191   : > { %v3448_v62 = vpop.f32.mrb[56].mxu1  ;;  %v5365_v22 = vadd.f32 %v3337_v5, %v3336_v27  ;;  %v3339_v50 = vpop.f32.mrb[58].mxu0 }
 0x192   : > { %v3449_v48 = vpop.f32.mrb[57].mxu1  ;;  %v3340_v18 = vpop.f32.mrb[59].mxu0 }
 0x193   : > { %v3450_v41 = vadd.f32 %v3449_v48, %v3448_v62  ;;  %v3451_v21 = vpop.f32.mrb[58].mxu1  ;;  %v5367_v31 = vadd.f32 %v3340_v18, %v3339_v50 }
 0x194   : > { %v3452_v36 = vpop.f32.mrb[59].mxu1 }
 0x195   : > { %v5369_v30 = vadd.f32 %v3450_v41, %v3314_v45  ;;  %v3453_v56 = vadd.f32 %v3452_v36, %v3451_v21 }
 0x197   : > { %v5371_v4 = vadd.f32 %v3453_v56, %v3317_v51  ;;  %v3342_v16 = vpop.f32.mrb[60].mxu0 }
 0x198   : > { %v3343_v11 = vpop.f32.mrb[61].mxu0 }
 0x199   : > { %5770 = vst [vmem:[#allocation31_spill] sm:$0xff] %v5371_v4  ;;  %v3454_v28 = vpop.f32.mrb[60].mxu1  ;;  %v5373_v26 = vadd.f32 %v3343_v11, %v3342_v16  ;;  %v3345_v61 = vpop.f32.mrb[62].mxu0 }
 0x19a   : > { %v3455_v20 = vpop.f32.mrb[61].mxu1  ;;  %v3346_v62 = vpop.f32.mrb[63].mxu0 }
 0x19b   : > { %v3456_v27 = vadd.f32 %v3455_v20, %v3454_v28  ;;  %v3457_v5 = vpop.f32.mrb[62].mxu1  ;;  %v5375_v48 = vadd.f32 %v3346_v62, %v3345_v61 }
 0x19c   : > { %v3458_v50 = vpop.f32.mrb[63].mxu1 }
 0x19d   : > { %v5377_v18 = vadd.f32 %v3456_v27, %v3320_v35  ;;  %v3459_v45 = vadd.f32 %v3458_v50, %v3457_v5 }
 0x19f   : > { %v5379_v41 = vadd.f32 %v3459_v45, %v3323_v14  ;;  %v3662_v51 = vpop.f32.mrb[64].mxu0 }
 0x1a0   : > { %v1515_v21 = vadd.f32 %v3662_v51, %v5225_v38  ;;  %v1506_v56 = vpop.f32.mrb[65].mxu0 }
 0x1a1   : > { %v3460_v36 = vpop.f32.mrb[64].mxu1  ;;  %v1507_v16 = vadd.f32 %v5206_v52, %v1506_v56  ;;  %v3663_v4 = vpop.f32.mrb[66].mxu0 }
 0x1a2   : > { %v3461_v11 = vpop.f32.mrb[65].mxu1  ;;  %v5384_v28 = vadd.f32 %v5289_v63, %v1515_v21  ;;  %v1518_v61 = vadd.f32 %v3663_v4, %v5227_v55  ;;  %v1509_v27 = vpop.f32.mrb[67].mxu0 }
 0x1a3   : > { %v3462_v20 = vadd.f32 %v3461_v11, %v3460_v36  ;;  %v3463_v35 = vpop.f32.mrb[66].mxu1  ;;  %v5388_v14 = vadd.f32 %v5275_v43, %v1507_v16  ;;  %v1510_v5 = vadd.f32 %v5214_v47, %v1509_v27 }
 0x1a4   : > { %v3464_v38 = vpop.f32.mrb[67].mxu1  ;;  %v5395_v52 = vadd.f32 %v5293_v10, %v1518_v61 }
 0x1a5   : > { %v5392_v62 = vadd.f32 %v3462_v20, %v5349_v1  ;;  %v3465_v50 = vadd.f32 %v3464_v38, %v3463_v35  ;;  %v5398_v63 = vadd.f32 %v5279_v32, %v1510_v5 }
 0x1a7   : > { %v5401_v55 = vadd.f32 %v3465_v50, %v5351_v40  ;;  %v3666_v4 = vpop.f32.mrb[68].mxu0 }
 0x1a8   : > { %v1531_v43 = vadd.f32 %v3666_v4, %v5257_v42  ;;  %v1522_v51 = vpop.f32.mrb[69].mxu0 }
 0x1a9   : > { %v3466_v45 = vpop.f32.mrb[68].mxu1  ;;  %v1523_v47 = vadd.f32 %v5241_v25, %v1522_v51  ;;  %v3667_v1 = vpop.f32.mrb[70].mxu0 }
 0x1aa   : > { %v3467_v21 = vpop.f32.mrb[69].mxu1  ;;  %v5406_v36 = vadd.f32 %v5317_v2, %v1531_v43  ;;  %v1534_v56 = vadd.f32 %v3667_v1, %v5259_v29  ;;  %v1525_v16 = vpop.f32.mrb[71].mxu0 }
 0x1ab   : > { %v3468_v10 = vadd.f32 %v3467_v21, %v3466_v45  ;;  %v3469_v32 = vpop.f32.mrb[70].mxu1  ;;  %v5410_v40 = vadd.f32 %v5303_v19, %v1523_v47  ;;  %v1526_v11 = vadd.f32 %v5243_v13, %v1525_v16 }
 0x1ac   : > { %v3470_v42 = vpop.f32.mrb[71].mxu1  ;;  %v5417_v25 = vadd.f32 %v5321_v37, %v1534_v56 }
 0x1ad   : > { %v5414_v20 = vadd.f32 %v3468_v10, %v5357_v3  ;;  %v3471_v61 = vadd.f32 %v3470_v42, %v3469_v32  ;;  %v5420_v2 = vadd.f32 %v5307_v8, %v1526_v11 }
 0x1af   : > { %v5423_v29 = vadd.f32 %v3471_v61, %v5359_v60  ;;  %v3670_v35 = vpop.f32.mrb[72].mxu0 }
 0x1b0   : > { %v1547_v19 = vadd.f32 %v3670_v35, %v5287_v59  ;;  %v1538_v5 = vpop.f32.mrb[73].mxu0 }
 0x1b1   : > { %v3472_v27 = vpop.f32.mrb[72].mxu1  ;;  %v1539_v13 = vadd.f32 %v5273_v57, %v1538_v5  ;;  %v3671_v3 = vpop.f32.mrb[74].mxu0 }
 0x1b2   : > { %v3473_v38 = vpop.f32.mrb[73].mxu1  ;;  %v5428_v50 = vadd.f32 %v5337_v54, %v1547_v19  ;;  %v1550_v4 = vadd.f32 %v3671_v3, %v5291_v15  ;;  %v1541_v43 = vpop.f32.mrb[75].mxu0 }
 0x1b3   : > { %v3474_v37 = vadd.f32 %v3473_v38, %v3472_v27  ;;  %v3475_v8 = vpop.f32.mrb[74].mxu1  ;;  %v5432_v60 = vadd.f32 %v5329_v58, %v1539_v13  ;;  %v1542_v45 = vadd.f32 %v5277_v7, %v1541_v43 }
 0x1b4   : > { %v3476_v59 = vpop.f32.mrb[75].mxu1  ;;  %v5439_v57 = vadd.f32 %v5339_v0, %v1550_v4 }
 0x1b5   : > { %v5436_v51 = vadd.f32 %v3474_v37, %v5365_v22  ;;  %v3477_v47 = vadd.f32 %v3476_v59, %v3475_v8  ;;  %v1847_v54 = vadd.f32 %v5331_v6, %v1542_v45 }
 0x1b7   : > { %v5443_v21 = vadd.f32 %v3477_v47, %v5367_v31  ;;  %v3674_v15 = vpop.f32.mrb[76].mxu0 }
 0x1b8   : > { %v1563_v1 = vadd.f32 %v3674_v15, %v5315_v49  ;;  %v1554_v10 = vpop.f32.mrb[77].mxu0 }
 0x1b9   : > { %v3478_v58 = vpop.f32.mrb[76].mxu1  ;;  %v1555_v7 = vadd.f32 %v5301_v34, %v1554_v10  ;;  %v3675_v32 = vpop.f32.mrb[78].mxu0 }
 0x1ba   : > { %v3479_v56 = vpop.f32.mrb[77].mxu1  ;;  %v5448_v22 = vadd.f32 %v5345_v24, %v1563_v1  ;;  %v1566_v16 = vadd.f32 %v3675_v32, %v5319_v39  ;;  %v1557_v6 = vpop.f32.mrb[79].mxu0 }
 0x1bb   : > { %v3480_v0 = vadd.f32 %v3479_v56, %v3478_v58  ;;  %v3481_v11 = vpop.f32.mrb[78].mxu1  ;;  %v1860_v31 = vadd.f32 %v5341_v33, %v1555_v7  ;;  %v1558_v42 = vadd.f32 %v5305_v44, %v1557_v6 }
 0x1bc   : > { %v3482_v61 = vpop.f32.mrb[79].mxu1  ;;  %v5457_v34 = vadd.f32 %v5347_v17, %v1566_v16 }
 0x1bd   : > { %v5454_v49 = vadd.f32 %v3480_v0, %v5373_v26  ;;  %v3483_v35 = vadd.f32 %v3482_v61, %v3481_v11  ;;  %v1863_v24 = vadd.f32 %v5343_v46, %v1558_v42 }
 0x1bf   : > { %v5461_v19 = vadd.f32 %v3483_v35, %v5375_v48  ;;  %v3524_v39 = vpop.f32.mrb[80].mxu0 }
 0x1c0   : > { %v3525_v27 = vpop.f32.mrb[81].mxu0 }
 0x1c1   : > { %v3526_v5 = vadd.f32 %v3525_v27, %v3524_v39  ;;  %v3527_v13 = vpop.f32.mrb[82].mxu0 }
 0x1c2   : > { %v3528_v33 = vpop.f32.mrb[83].mxu0 }
 0x1c3   : > { %v3529_v38 = vadd.f32 %v3528_v33, %v3527_v13  ;;  %v5464_v44 = vadd.f32 %v3526_v5, %v5388_v14 }
 0x1c5   : > { %v5467_v26 = vadd.f32 %v3529_v38, %v5398_v63 }
 0x1c7   : > { %v3530_v17 = vpop.f32.mrb[84].mxu0 }
 0x1c8   : > { %v3531_v3 = vpop.f32.mrb[85].mxu0 }
 0x1c9   : > { %v3532_v37 = vadd.f32 %v3531_v3, %v3530_v17  ;;  %v3533_v4 = vpop.f32.mrb[86].mxu0 }
 0x1ca   : > { %v3534_v46 = vpop.f32.mrb[87].mxu0 }
 0x1cb   : > { %v3535_v8 = vadd.f32 %v3534_v46, %v3533_v4  ;;  %v3806_v48 = vadd.f32 %v3532_v37, %v5384_v28 }
 0x1cd   : > { %v5471_v43 = vadd.f32 %v3535_v8, %v5395_v52 }
 0x1cf   : > { %v3536_v45 = vpop.f32.mrb[88].mxu0 }
 0x1d0   : > { %v3537_v59 = vpop.f32.mrb[89].mxu0 }
 0x1d1   : > { %v3538_v47 = vadd.f32 %v3537_v59, %v3536_v45  ;;  %v3539_v15 = vpop.f32.mrb[90].mxu0 }
 0x1d2   : > { %v3540_v14 = vpop.f32.mrb[91].mxu0 }
 0x1d3   : > { %v3541_v1 = vadd.f32 %v3540_v14, %v3539_v15  ;;  %v5474_v63 = vadd.f32 %v3538_v47, %v5410_v40 }
 0x1d5   : > { %v5477_v58 = vadd.f32 %v3541_v1, %v5420_v2 }
 0x1d7   : > { %v3542_v10 = vpop.f32.mrb[92].mxu0 }
 0x1d8   : > { %v3543_v7 = vpop.f32.mrb[93].mxu0 }
 0x1d9   : > { %v3544_v56 = vadd.f32 %v3543_v7, %v3542_v10  ;;  %v3545_v32 = vpop.f32.mrb[94].mxu0  ;;  %v2648_v7 = vld [vmem:[%s5507_s8 + $0x10] sm:$0xff] }
 0x1da   : > { %v3546_v28 = vpop.f32.mrb[95].mxu0 }
 0x1db   : > { %v3547_v0 = vadd.f32 %v3546_v28, %v3545_v32  ;;  %v5480_v52 = vadd.f32 %v3544_v56, %v5406_v36 }
 0x1dd   : > { %v5483_v16 = vadd.f32 %v3547_v0, %v5417_v25  ;;  %v2646_v0 = vld [vmem:[%s5507_s8] sm:$0xff] }
 0x1df   : > { %v3548_v11 = vpop.f32.mrb[96].mxu0 }
 0x1e0   : > { %v3549_v6 = vpop.f32.mrb[97].mxu0 }
 0x1e1   : > { %v3550_v42 = vadd.f32 %v3549_v6, %v3548_v11  ;;  %v3551_v40 = vpop.f32.mrb[98].mxu0 }
 0x1e2   : > { %v3552_v61 = vpop.f32.mrb[99].mxu0 }
 0x1e3   : > { %v3553_v35 = vadd.f32 %v3552_v61, %v3551_v40  ;;  %v5486_v2 = vadd.f32 %v3550_v42, %v5432_v60  ;;  %v2649_v42 = vld [vmem:[%s5507_s8 + $0x18] sm:$0xff] }
 0x1e5   : > { %v5488_v39 = vadd.f32 %v3553_v35, %v1847_v54 }
 0x1e7   : > { %v3554_v27 = vpop.f32.mrb[100].mxu0 }
 0x1e8   : > { %v3555_v5 = vpop.f32.mrb[101].mxu0 }
 0x1e9   : > { %v3556_v13 = vadd.f32 %v3555_v5, %v3554_v27  ;;  %v3557_v33 = vpop.f32.mrb[102].mxu0  ;;  %v2647_v5 = vld [vmem:[%s5507_s8 + $0x8] sm:$0xff] }
 0x1ea   : > { %v3558_v36 = vpop.f32.mrb[103].mxu0 }
 0x1eb   : > { %v3559_v38 = vadd.f32 %v3558_v36, %v3557_v33  ;;  %v5491_v25 = vadd.f32 %v3556_v13, %v5428_v50 }
 0x1ed   : > { %v5494_v17 = vadd.f32 %v3559_v38, %v5439_v57 }
 0x1ef   : > { %v3560_v3 = vpop.f32.mrb[104].mxu0 }
 0x1f0   : > { %v3561_v37 = vpop.f32.mrb[105].mxu0 }
 0x1f1   : > { %v3562_v4 = vadd.f32 %v3561_v37, %v3560_v3  ;;  %v3563_v60 = vpop.f32.mrb[106].mxu0 }
 0x1f2   : > { %v3564_v46 = vpop.f32.mrb[107].mxu0 }
 0x1f3   : > { %v3565_v54 = vadd.f32 %v3564_v46, %v3563_v60  ;;  %v5496_v8 = vadd.f32 %v3562_v4, %v1860_v31  ;;  %v2652_v4 = vld [vmem:[%s5507_s8 + $0x30] sm:$0xff] }
 0x1f5   : > { %v5498_v45 = vadd.f32 %v3565_v54, %v1863_v24  ;;  %v2650_v54 = vld [vmem:[%s5507_s8 + $0x20] sm:$0xff] }
 0x1f7   : > { %v3566_v59 = vpop.f32.mrb[108].mxu0 }
 0x1f8   : > { %v3567_v47 = vpop.f32.mrb[109].mxu0 }
 0x1f9   : > { %v3568_v15 = vadd.f32 %v3567_v47, %v3566_v59  ;;  %v3569_v50 = vpop.f32.mrb[110].mxu0 }
 0x1fa   : > { %v3570_v14 = vpop.f32.mrb[111].mxu0 }
 0x1fb   : > { %v3571_v1 = vadd.f32 %v3570_v14, %v3569_v50  ;;  %v5501_v57 = vadd.f32 %v3568_v15, %v5448_v22  ;;  %v2653_v15 = vld [vmem:[%s5507_s8 + $0x38] sm:$0xff] }
 0x1fd   : > { %v5510_v31 = vadd.f32 %v3571_v1, %v5457_v34 }
 0x1ff   : > { %v3572_v24 = vpop.f32.mrb[112].mxu0 }
 0x200   : > { %v3573_v56 = vpop.f32.mrb[113].mxu0 }
 0x201   : > { %v3758_v10 = vpop.f32.mrb[80].mxu1  ;;  %v3574_v28 = vadd.f32 %v3573_v56, %v3572_v24  ;;  %v3575_v11 = vpop.f32.mrb[114].mxu0 }
 0x202   : > { %v3807_v32 = vadd.f32 %v3806_v48, %v3758_v10  ;;  %v2487_v22 = vpop.f32.mrb[81].mxu1  ;;  %v3576_v40 = vpop.f32.mrb[115].mxu0 }
 0x203   : > { %v3811_v34 = vadd.f32 %v5464_v44, %v2487_v22  ;;  %v3759_v6 = vpop.f32.mrb[82].mxu1  ;;  %v3577_v35 = vadd.f32 %v3576_v40, %v3575_v11  ;;  %v5525_v13 = vadd.f32 %v5353_v9, %v3574_v28  ;;  %v2656_v11 = vld [vmem:[%s5507_s8 + $0x50] sm:$0xff] }
 0x204   : > { %v2680_v61 = vadd.f32 %v3807_v32, %v2648_v7  ;;  %v3815_v48 = vadd.f32 %v5471_v43, %v3759_v6  ;;  %v2490_v27 = vpop.f32.mrb[83].mxu1 }
 0x205   : > { %v2678_v33 = vadd.f32 %v3811_v34, %v2646_v0  ;;  %v3819_v36 = vadd.f32 %v5467_v26, %v2490_v27  ;;  %v5530_v38 = vadd.f32 %v5355_v12, %v3577_v35 }
 0x206   : > { %2712 = vst [vmem:[%s5518_s12 + $0x10] sm:$0xff] %v2680_v61  ;;  %v2681_v44 = vadd.f32 %v3815_v48, %v2649_v42  ;;  %v2654_v42 = vld [vmem:[%s5507_s8 + $0x40] sm:$0xff]  ;;  %v2657_v48 = vld [vmem:[%s5507_s8 + $0x58] sm:$0xff] }
 0x207   : > { %2710 = vst [vmem:[%s5518_s12] sm:$0xff] %v2678_v33  ;;  %v2679_v3 = vadd.f32 %v3819_v36, %v2647_v5  ;;  %v3578_v43 = vpop.f32.mrb[116].mxu0 }
 0x208   : > { %2713 = vst [vmem:[%s5518_s12 + $0x18] sm:$0xff] %v2681_v44  ;;  %v3579_v9 = vpop.f32.mrb[117].mxu0 }
 0x209   : > { %2711 = vst [vmem:[%s5518_s12 + $0x8] sm:$0xff] %v2679_v3  ;;  %v3762_v37 = vpop.f32.mrb[84].mxu1  ;;  %v3580_v46 = vadd.f32 %v3579_v9, %v3578_v43  ;;  %v3581_v59 = vpop.f32.mrb[118].mxu0 }
 0x20a   : > { %v3823_v60 = vadd.f32 %v5480_v52, %v3762_v37  ;;  %v2503_v26 = vpop.f32.mrb[85].mxu1  ;;  %v3582_v50 = vpop.f32.mrb[119].mxu0  ;;  %v2651_v52 = vld [vmem:[%s5507_s8 + $0x28] sm:$0xff] }
 0x20b   : > { %v3827_v12 = vadd.f32 %v5474_v63, %v2503_v26  ;;  %v3763_v47 = vpop.f32.mrb[86].mxu1  ;;  %v3583_v24 = vadd.f32 %v3582_v50, %v3581_v59  ;;  %v5543_v7 = vadd.f32 %v5361_v23, %v3580_v46  ;;  %v5771_v37 = vld [vmem:[#allocation31_spill] sm:$0xff]  ;;  %v2660_v46 = vld [vmem:[%s5507_s8 + $0x70] sm:$0xff]  ;;  %v2658_v59 = vld [vmem:[%s5507_s8 + $0x60] sm:$0xff] }
 0x20c   : > { %v2684_v14 = vadd.f32 %v3823_v60, %v2652_v4  ;;  %v3831_v1 = vadd.f32 %v5483_v16, %v3763_v47  ;;  %v2506_v10 = vpop.f32.mrb[87].mxu1  ;;  %v2661_v50 = vld [vmem:[%s5507_s8 + $0x78] sm:$0xff] }
 0x20d   : > { %v2682_v56 = vadd.f32 %v3827_v12, %v2650_v54  ;;  %v3835_v32 = vadd.f32 %v5477_v58, %v2506_v10  ;;  %v5548_v28 = vadd.f32 %v5363_v53, %v3583_v24 }
 0x20e   : > { %2716 = vst [vmem:[%s5518_s12 + $0x30] sm:$0xff] %v2684_v14  ;;  %v2685_v63 = vadd.f32 %v3831_v1, %v2653_v15 }
 0x20f   : > { %2714 = vst [vmem:[%s5518_s12 + $0x20] sm:$0xff] %v2682_v56  ;;  %v2683_v22 = vadd.f32 %v3835_v32, %v2651_v52  ;;  %v3584_v16 = vpop.f32.mrb[120].mxu0 }
 0x210   : > { %2717 = vst [vmem:[%s5518_s12 + $0x38] sm:$0xff] %v2685_v63  ;;  %v3585_v23 = vpop.f32.mrb[121].mxu0 }
 0x211   : > { %2715 = vst [vmem:[%s5518_s12 + $0x28] sm:$0xff] %v2683_v22  ;;  %v3766_v0 = vpop.f32.mrb[88].mxu1  ;;  %v3586_v6 = vadd.f32 %v3585_v23, %v3584_v16  ;;  %v3587_v40 = vpop.f32.mrb[122].mxu0 }
 0x212   : > { %v3839_v34 = vadd.f32 %v5491_v25, %v3766_v0  ;;  %v2519_v58 = vpop.f32.mrb[89].mxu1  ;;  %v3588_v35 = vpop.f32.mrb[123].mxu0  ;;  %v2655_v25 = vld [vmem:[%s5507_s8 + $0x48] sm:$0xff] }
 0x213   : > { %v3843_v53 = vadd.f32 %v5486_v2, %v2519_v58  ;;  %v3767_v61 = vpop.f32.mrb[90].mxu1  ;;  %v3589_v33 = vadd.f32 %v3588_v35, %v3587_v40  ;;  %v5561_v44 = vadd.f32 %v5369_v30, %v3586_v6  ;;  %v2665_v40 = vld [vmem:[%s5507_s8 + $0x98] sm:$0xff] }
 0x214   : > { %v2688_v27 = vadd.f32 %v3839_v34, %v2656_v11  ;;  %v3847_v5 = vadd.f32 %v5494_v17, %v3767_v61  ;;  %v2522_v36 = vpop.f32.mrb[91].mxu1  ;;  %v2664_v11 = vld [vmem:[%s5507_s8 + $0x90] sm:$0xff] }
 0x215   : > { %v2686_v3 = vadd.f32 %v3843_v53, %v2654_v42  ;;  %v3851_v43 = vadd.f32 %v5488_v39, %v2522_v36  ;;  %v5566_v4 = vadd.f32 %v5771_v37, %v3589_v33 }
 0x216   : > { %2720 = vst [vmem:[%s5518_s12 + $0x50] sm:$0xff] %v2688_v27  ;;  %v2689_v2 = vadd.f32 %v3847_v5, %v2657_v48 }
 0x217   : > { %2718 = vst [vmem:[%s5518_s12 + $0x40] sm:$0xff] %v2686_v3  ;;  %v2687_v9 = vadd.f32 %v3851_v43, %v2655_v25  ;;  %v3590_v17 = vpop.f32.mrb[124].mxu0 }
 0x218   : > { %2721 = vst [vmem:[%s5518_s12 + $0x58] sm:$0xff] %v2689_v2  ;;  %v3591_v30 = vpop.f32.mrb[125].mxu0  ;;  %v2668_v2 = vld [vmem:[%s5507_s8 + $0xb0] sm:$0xff] }
 0x219   : > { %2719 = vst [vmem:[%s5518_s12 + $0x48] sm:$0xff] %v2687_v9  ;;  %v3770_v60 = vpop.f32.mrb[92].mxu1  ;;  %v3592_v54 = vadd.f32 %v3591_v30, %v3590_v17  ;;  %v3593_v12 = vpop.f32.mrb[126].mxu0  ;;  %v2669_v30 = vld [vmem:[%s5507_s8 + $0xb8] sm:$0xff] }
 0x21a   : > { %v3855_v26 = vadd.f32 %v5501_v57, %v3770_v60  ;;  %v2535_v39 = vpop.f32.mrb[93].mxu1  ;;  %v3594_v14 = vpop.f32.mrb[127].mxu0  ;;  %v2659_v57 = vld [vmem:[%s5507_s8 + $0x68] sm:$0xff]  ;;  %v2666_v60 = vld [vmem:[%s5507_s8 + $0xa0] sm:$0xff] }
 0x21b   : > { %v3859_v47 = vadd.f32 %v5496_v8, %v2535_v39  ;;  %v3771_v15 = vpop.f32.mrb[94].mxu1  ;;  %v3595_v10 = vadd.f32 %v3594_v14, %v3593_v12  ;;  %v3881_v56 = vadd.f32 %v5377_v18, %v3592_v54 }
 0x21c   : > { %v2692_v1 = vadd.f32 %v3855_v26, %v2660_v46  ;;  %v3863_v24 = vadd.f32 %v5510_v31, %v3771_v15  ;;  %v2538_v52 = vpop.f32.mrb[95].mxu1 }
 0x21d   : > { %v2690_v32 = vadd.f32 %v3859_v47, %v2658_v59  ;;  %v3867_v63 = vadd.f32 %v5498_v45, %v2538_v52  ;;  %v3887_v22 = vadd.f32 %v5379_v41, %v3595_v10  ;;  %v2662_v45 = vld [vmem:[%s5507_s8 + $0x80] sm:$0xff]  ;;  %v2667_v47 = vld [vmem:[%s5507_s8 + $0xa8] sm:$0xff] }
 0x21e   : > { %2724 = vst [vmem:[%s5518_s12 + $0x70] sm:$0xff] %v2692_v1  ;;  %v2693_v8 = vadd.f32 %v3863_v24, %v2661_v50 }
 0x21f   : > { %2722 = vst [vmem:[%s5518_s12 + $0x60] sm:$0xff] %v2690_v32  ;;  %v2691_v16 = vadd.f32 %v3867_v63, %v2659_v57  ;;  %v3596_v0 = vpop.f32.mrb[128].mxu0  ;;  %v2672_v57 = vld [vmem:[%s5507_s8 + $0xd0] sm:$0xff] }
 0x220   : > { %2725 = vst [vmem:[%s5518_s12 + $0x78] sm:$0xff] %v2693_v8  ;;  %v3597_v23 = vpop.f32.mrb[129].mxu0  ;;  %v2670_v8 = vld [vmem:[%s5507_s8 + $0xc0] sm:$0xff] }
 0x221   : > { %2723 = vst [vmem:[%s5518_s12 + $0x68] sm:$0xff] %v2691_v16  ;;  %v3774_v31 = vpop.f32.mrb[0].mxu1  ;;  %v3598_v34 = vadd.f32 %v3597_v23, %v3596_v0  ;;  %v3599_v58 = vpop.f32.mrb[130].mxu0 }
 0x222   : > { %v3870_v18 = vadd.f32 %v5543_v7, %v3774_v31  ;;  %v2551_v6 = vpop.f32.mrb[1].mxu1  ;;  %v3600_v53 = vpop.f32.mrb[131].mxu0  ;;  %v2663_v7 = vld [vmem:[%s5507_s8 + $0x88] sm:$0xff] }
 0x223   : > { %v3873_v41 = vadd.f32 %v5525_v13, %v2551_v6  ;;  %v3775_v42 = vpop.f32.mrb[2].mxu1  ;;  %v3601_v35 = vadd.f32 %v3600_v53, %v3599_v58  ;;  %v3896_v5 = vadd.f32 %v5392_v62, %v3598_v34  ;;  %v2671_v34 = vld [vmem:[%s5507_s8 + $0xc8] sm:$0xff] }
 0x224   : > { %v2696_v61 = vadd.f32 %v3870_v18, %v2664_v11  ;;  %v3876_v48 = vadd.f32 %v5548_v28, %v3775_v42  ;;  %v2554_v27 = vpop.f32.mrb[3].mxu1 }
 0x225   : > { %v2694_v33 = vadd.f32 %v3873_v41, %v2662_v45  ;;  %v3879_v36 = vadd.f32 %v5530_v38, %v2554_v27  ;;  %v3902_v25 = vadd.f32 %v5401_v55, %v3601_v35 }
 0x226   : > { %2728 = vst [vmem:[%s5518_s12 + $0x90] sm:$0xff] %v2696_v61  ;;  %v2697_v13 = vadd.f32 %v3876_v48, %v2665_v40 }
 0x227   : > { %2726 = vst [vmem:[%s5518_s12 + $0x80] sm:$0xff] %v2694_v33  ;;  %v2695_v3 = vadd.f32 %v3879_v36, %v2663_v7  ;;  %v3602_v43 = vpop.f32.mrb[132].mxu0 }
 0x228   : > { %2729 = vst [vmem:[%s5518_s12 + $0x98] sm:$0xff] %v2697_v13  ;;  %v3603_v37 = vpop.f32.mrb[133].mxu0 }
 0x229   : > { %2727 = vst [vmem:[%s5518_s12 + $0x88] sm:$0xff] %v2695_v3  ;;  %v3778_v28 = vpop.f32.mrb[4].mxu1  ;;  %v3604_v62 = vadd.f32 %v3603_v37, %v3602_v43  ;;  %v3605_v38 = vpop.f32.mrb[134].mxu0  ;;  %v2675_v3 = vld [vmem:[%s5507_s8 + $0xe8] sm:$0xff]  ;;  %v2676_v43 = vld [vmem:[%s5507_s8 + $0xf0] sm:$0xff] }
 0x22a   : > { %v3882_v9 = vadd.f32 %v3881_v56, %v3778_v28  ;;  %v2567_v17 = vpop.f32.mrb[5].mxu1  ;;  %v3606_v26 = vpop.f32.mrb[135].mxu0 }
 0x22b   : > { %v3885_v46 = vadd.f32 %v5561_v44, %v2567_v17  ;;  %v3779_v55 = vpop.f32.mrb[6].mxu1  ;;  %v3607_v59 = vadd.f32 %v3606_v26, %v3605_v38  ;;  %v3893_v15 = vadd.f32 %v5414_v20, %v3604_v62  ;;  %v2677_v62 = vld [vmem:[%s5507_s8 + $0xf8] sm:$0xff] }
 0x22c   : > { %v2700_v54 = vadd.f32 %v3882_v9, %v2668_v2  ;;  %v3888_v39 = vadd.f32 %v3887_v22, %v3779_v55  ;;  %v2570_v12 = vpop.f32.mrb[7].mxu1 }
 0x22d   : > { %v2698_v50 = vadd.f32 %v3885_v46, %v2666_v60  ;;  %v3891_v14 = vadd.f32 %v5566_v4, %v2570_v12  ;;  %v3899_v44 = vadd.f32 %v5423_v29, %v3607_v59  ;;  %v2673_v29 = vld [vmem:[%s5507_s8 + $0xd8] sm:$0xff] }
 0x22e   : > { %2732 = vst [vmem:[%s5518_s12 + $0xb0] sm:$0xff] %v2700_v54  ;;  %v2701_v1 = vadd.f32 %v3888_v39, %v2669_v30 }
 0x22f   : > { %2730 = vst [vmem:[%s5518_s12 + $0xa0] sm:$0xff] %v2698_v50  ;;  %v2699_v24 = vadd.f32 %v3891_v14, %v2667_v47  ;;  %v3608_v10 = vpop.f32.mrb[136].mxu0 }
 0x230   : > { %2733 = vst [vmem:[%s5518_s12 + $0xb8] sm:$0xff] %v2701_v1  ;;  %v3609_v56 = vpop.f32.mrb[137].mxu0 }
 0x231   : > { %2731 = vst [vmem:[%s5518_s12 + $0xa8] sm:$0xff] %v2699_v24  ;;  %v3782_v52 = vpop.f32.mrb[8].mxu1  ;;  %v3610_v20 = vadd.f32 %v3609_v56, %v3608_v10  ;;  %v3611_v4 = vpop.f32.mrb[138].mxu0 }
 0x232   : > { %v3894_v32 = vadd.f32 %v3893_v15, %v3782_v52  ;;  %v2583_v63 = vpop.f32.mrb[9].mxu1  ;;  %v3612_v0 = vpop.f32.mrb[139].mxu0 }
 0x233   : > { %v3897_v22 = vadd.f32 %v3896_v5, %v2583_v63  ;;  %v3783_v16 = vpop.f32.mrb[10].mxu1  ;;  %v3613_v23 = vadd.f32 %v3612_v0, %v3611_v4  ;;  %v3908_v6 = vadd.f32 %v5436_v51, %v3610_v20  ;;  %v2674_v51 = vld [vmem:[%s5507_s8 + $0xe0] sm:$0xff] }
 0x234   : > { %v2704_v31 = vadd.f32 %v3894_v32, %v2672_v57  ;;  %v3900_v11 = vadd.f32 %v3899_v44, %v3783_v16  ;;  %v2586_v18 = vpop.f32.mrb[11].mxu1 }
 0x235   : > { %v2702_v45 = vadd.f32 %v3897_v22, %v2670_v8  ;;  %v3903_v58 = vadd.f32 %v3902_v25, %v2586_v18  ;;  %v3914_v42 = vadd.f32 %v5443_v21, %v3613_v23 }
 0x236   : > { %2736 = vst [vmem:[%s5518_s12 + $0xd0] sm:$0xff] %v2704_v31  ;;  %v2705_v41 = vadd.f32 %v3900_v11, %v2673_v29 }
 0x237   : > { %2734 = vst [vmem:[%s5518_s12 + $0xc0] sm:$0xff] %v2702_v45  ;;  %v2703_v40 = vadd.f32 %v3903_v58, %v2671_v34  ;;  %v3614_v53 = vpop.f32.mrb[140].mxu0 }
 0x238   : > { %2737 = vst [vmem:[%s5518_s12 + $0xd8] sm:$0xff] %v2705_v41  ;;  %v3615_v48 = vpop.f32.mrb[141].mxu0 }
 0x239   : > { %2735 = vst [vmem:[%s5518_s12 + $0xc8] sm:$0xff] %v2703_v40  ;;  %v3786_v61 = vpop.f32.mrb[12].mxu1  ;;  %v3616_v35 = vadd.f32 %v3615_v48, %v3614_v53  ;;  %v3617_v7 = vpop.f32.mrb[142].mxu0 }
 0x23a   : > { %v2599_v27 = vpop.f32.mrb[13].mxu1  ;;  %v3618_v36 = vpop.f32.mrb[143].mxu0 }
 0x23b   : > { %v3909_v5 = vadd.f32 %v3908_v6, %v2599_v27  ;;  %v3787_v33 = vpop.f32.mrb[14].mxu1  ;;  %v3905_v21 = vadd.f32 %v5454_v49, %v3616_v35  ;;  %v3619_v13 = vadd.f32 %v3618_v36, %v3617_v7 }
 0x23c   : > { %v2602_v25 = vpop.f32.mrb[15].mxu1 }
 0x23d   : > { %v2706_v28 = vadd.f32 %v3909_v5, %v2674_v51  ;;  %v3915_v2 = vadd.f32 %v3914_v42, %v2602_v25  ;;  %v3906_v37 = vadd.f32 %v3905_v21, %v3786_v61  ;;  %v3911_v9 = vadd.f32 %v5461_v19, %v3619_v13 }
 0x23f   : > { %2738 = vst [vmem:[%s5518_s12 + $0xe0] sm:$0xff] %v2706_v28  ;;  %v2707_v17 = vadd.f32 %v3915_v2, %v2675_v3  ;;  %v2708_v60 = vadd.f32 %v3906_v37, %v2676_v43  ;;  %v3912_v38 = vadd.f32 %v3911_v9, %v3787_v33 }
 0x241   : > { %2739 = vst [vmem:[%s5518_s12 + $0xe8] sm:$0xff] %v2707_v17  ;;  %2740 = vst [vmem:[%s5518_s12 + $0xf0] sm:$0xff] %v2708_v60  ;;  %v2709_v46 = vadd.f32 %v3912_v38, %v2677_v62 }
 0x243   : > { %2741 = vst [vmem:[%s5518_s12 + $0xf8] sm:$0xff] %v2709_v46 }
 0x244 PF: > { %s15_s20 = sadd.s32 1, %s4086_s20   ;;  %s5772_s18 = smov %s4082_s19 }
 0x245   : > { %p12_p5 = scmp.ge.s32.totalorder %s15_s20, 4   ;;  %s5773_s19 = smov %s5775_s21 }
 0x247   :  { %14 = sbr.rel (!%p12_p5) target bundleno = 2 (0x2), region = 78 }

// kernel: res_forward.4
= control target key start
LH: loop header
LB: loop body
LE: loop exit
PB: predicated region body
PF: predicated region fallthrough
CT: control target
= control target key end

     0   :  { %s4154_s18 = smov 0   ;;  %s4156_s19 = smov 0   ;;  %s5641_s0 = inlined_call_operand.vmem [shape: f32[2,16,16,128], index: 0, kind: input, shape index: {}]   ;;  %s5642_s1 = inlined_call_operand.vmem [shape: bf16[3,384,128], index: 1, kind: input, shape index: {}]   ;;  %s5643_s2 = inlined_call_operand.vmem [shape: f32[1,1,128], index: 2, kind: input, shape index: {}]   ;;  %s5644_s3 = inlined_call_operand.vmem [shape: f32[1,1,128], index: 3, kind: input, shape index: {}]   ;;  %s5645_s4 = inlined_call_operand.vmem [shape: f32[2,16,16,128], index: 4, kind: output, shape index: {0}]   ;;  %s5646_s5 = inlined_call_operand.vmem [shape: f32[2,8,128], index: 5, kind: output, shape index: {1}]  }
   0x1   :  { %s4158_s20 = smov 0  }
   0x2 LB: > { %s28_s21 = sadd.s32 1, %s4116_s19  ;;  %p2896_p0 = scmp.ge.s32.totalorder %s4120_s20, 1  ;;  %s4120_s20 = sphi %s4158_s20, %s16_s20   ;;  %s4116_s19 = sphi %s4156_s19, %s5774_s19   ;;  %s4112_s18 = sphi %s4154_s18, %s5773_s18  }
   0x3   : > { %p30_p1 = scmp.ge.s32.totalorder %s28_s21, 2  ;;  %p206_p2 = scmp.lt.s32.totalorder %s4120_s20, 3 }
   0x5   : > { %s5776_s21 = smov (%p30_p1, %s28_s21), 0  ;;  %p207_p3 = pnand %p2896_p0, %p206_p2 }
   0x7   : > { %210 = sbr.rel (%p207_p3) target bundleno = 598 (0x256), region = 36 }
   0xe   : > { %v4024_v0 = vld [vmem:[%s5642_s1 + $0x100] sm:$0xff]   ;;  %v4027_v3 = vld [vmem:[%s5642_s1 + $0x108] sm:$0xff]   ;;  %v4030_v6 = vld [vmem:[%s5642_s1 + $0x110] sm:$0xff]   ;;  %p244_p4 = scmp.lt.s32.totalorder %s4112_s18, 1  ;;  %v4122_v12 = vmov 0.0   ;;  %vm558_vm0 = vcmask 1040384  }
   0xf   : > { %v4180_v1 = vld [vmem:[%s5642_s1 + $0x140] sm:$0xff]   ;;  %3270 = vmatprep.subr.bf16.mxu0 %v4024_v0  ;;  %v4193_v4 = vld [vmem:[%s5642_s1 + $0x148] sm:$0xff]   ;;  %v4205_v7 = vld [vmem:[%s5642_s1 + $0x150] sm:$0xff]   ;;  %v4224_v13 = vrot.slane %v4122_v12, 7  ;;  %vm739_vm1 = vcmask 1046528   ;;  %vm866_vm3 = vcmask 1045504  }
  0x10   : > { %v4026_v2 = vld [vmem:[%s5642_s1 + $0xc0] sm:$0xff]   ;;  %3822 = vmatprep.subr.bf16.mxu1 %v4180_v1  ;;  %v4029_v5 = vld [vmem:[%s5642_s1 + $0xc8] sm:$0xff]   ;;  %v4032_v8 = vld [vmem:[%s5642_s1 + $0xd0] sm:$0xff]   ;;  %s5778_s18 = smov (!%p244_p4, %s4112_s18), 1  ;;  %vm4123_vm10 = vmmov 1  }
  0x11   : > { %3271 = vmatpush3.bf16.msra.mxu0 %v4026_v2  ;;  %3830 = vmatpush3.bf16.msra.mxu1 %v4180_v1  ;;  %v4033_v9 = vld [vmem:[%s5642_s1 + $0x118] sm:$0xff]   ;;  %5695 = vst [vmem:[#allocation2_spill] sm:$0xff] %v4224_v13  ;;  %v4036_v14 = vld [vmem:[%s5642_s1 + $0x120] sm:$0xff]   ;;  %v4244_v17 = vsel %vm558_vm0, 0.0, %v4224_v13  ;;  %v4039_v18 = vld [vmem:[%s5642_s1 + $0x128] sm:$0xff]   ;;  %v4258_v20 = vsel %vm558_vm0, %v4224_v13, 0.0  ;;  %v4321_v44 = vpack.c.bf16 %v4224_v13, %v4224_v13 }
  0x12   : > { %3272 = vmatprep.subr.bf16.mxu0 %v4027_v3  ;;  %3823 = vmatprep.subr.bf16.mxu1 %v4193_v4  ;;  %v4218_v10 = vld [vmem:[%s5642_s1 + $0x158] sm:$0xff]   ;;  %v4234_v15 = vld [vmem:[%s5642_s1 + $0x160] sm:$0xff]   ;;  %5696 = vst [vmem:[#allocation3_spill] sm:$0xff] %v4244_v17  ;;  %v4254_v19 = vld [vmem:[%s5642_s1 + $0x168] sm:$0xff]   ;;  %s3268_s10 = sshll.u32 %s5778_s18, 8  ;;  %v740_v21 = vrot.slane %v4244_v17, 1 }
  0x13   : > { %v4035_v11 = vld [vmem:[%s5642_s1 + $0xd8] sm:$0xff]   ;;  %v4038_v16 = vld [vmem:[%s5642_s1 + $0xe0] sm:$0xff]   ;;  %5697 = vst [vmem:[#allocation4_spill] sm:$0xff] %v4258_v20  ;;  %v4041_v22 = vld [vmem:[%s5642_s1 + $0xe8] sm:$0xff]   ;;  %v741_v23 = vrot.slane %v4224_v13, 1  ;;  %v743_v25 = vrot.slane %v4258_v20, 1  ;;  %s4282_s23 = scalar_lea.vmem %s5641_s0, %s3268_s10  ;;  %s5545_s15 = scalar_lea.vmem %s5645_s4, %s3268_s10 }
  0x14   : > { %v4042_v24 = vld [vmem:[%s5642_s1 + $0x130] sm:$0xff]   ;;  %v4045_v28 = vld [vmem:[%s5642_s1 + $0x138] sm:$0xff]   ;;  %v4299_v30 = vld [vmem:[%s5643_s2] ss:$0 sm:$0xff]  ;;  %5698 = vst [vmem:[#allocation5_spill] sm:$0xff] %v4321_v44  ;;  %s2901_s10 = sshll.u32 %s5778_s18, 3 }
  0x15   : > { %3273 = vmatpush3.bf16.msra.mxu0 %v4029_v5  ;;  %3831 = vmatpush3.bf16.msra.mxu1 %v4193_v4  ;;  %v4275_v26 = vld [vmem:[%s5642_s1 + $0x170] sm:$0xff]   ;;  %v4293_v29 = vld [vmem:[%s5642_s1 + $0x178] sm:$0xff]   ;;  %v4304_v31 = vld [vmem:[%s5644_s3] ss:$0 sm:$0xff]  ;;  %v742_v33 = vsel %vm739_vm1, %v740_v21, %v741_v23  ;;  %v744_v34 = vsel %vm739_vm1, %v741_v23, %v743_v25  ;;  %s264_s22 = scalar_lea.vmem %s5646_s5, %s2901_s10 }
  0x16   : > { %3274 = vmatprep.subr.bf16.mxu0 %v4030_v6  ;;  %3824 = vmatprep.subr.bf16.mxu1 %v4205_v7  ;;  %v4044_v27 = vld [vmem:[%s5642_s1 + $0xf0] sm:$0xff]   ;;  %v272_v32 = vld [vmem:[%s4282_s23] sm:$0xff]  ;;  %v273_v35 = vld [vmem:[%s4282_s23 + $0x8] sm:$0xff]  ;;  %v4326_v48 = vpack.c.bf16 %v744_v34, %v742_v33 }
  0x17   : > { %v310_v36 = vmul.f32 %v4299_v30, %v272_v32  ;;  %v288_v37 = vld [vmem:[%s4282_s23 + $0x80] sm:$0xff]  ;;  %v289_v38 = vld [vmem:[%s4282_s23 + $0x88] sm:$0xff]  ;;  %v311_v39 = vmul.f32 %v4299_v30, %v273_v35  ;;  %v290_v42 = vld [vmem:[%s4282_s23 + $0x90] sm:$0xff] }
  0x18   : > { %v326_v40 = vmul.f32 %v4299_v30, %v288_v37  ;;  %v327_v41 = vmul.f32 %v4299_v30, %v289_v38  ;;  %v291_v43 = vld [vmem:[%s4282_s23 + $0x98] sm:$0xff]  ;;  %v328_v46 = vmul.f32 %v4299_v30, %v290_v42  ;;  %5699 = vst [vmem:[#allocation6_spill] sm:$0xff] %v4326_v48  ;;  %v4048_v56 = vld [vmem:[%s5642_s1 + $0x40] sm:$0xff]   ;;  %v274_v21 = vld [vmem:[%s4282_s23 + $0x10] sm:$0xff] }
  0x19   : > { %3275 = vmatpush3.bf16.msra.mxu0 %v4032_v8  ;;  %3832 = vmatpush3.bf16.msra.mxu1 %v4205_v7  ;;  %v348_v45 = vadd.f32 %v4304_v31, %v310_v36  ;;  %v329_v47 = vmul.f32 %v4299_v30, %v291_v43  ;;  %v4047_v49 = vld [vmem:[%s5642_s1 + $0xf8] sm:$0xff]   ;;  %v349_v50 = vadd.f32 %v4304_v31, %v311_v39  ;;  %vm2978_vm9 = vmneg %vm558_vm0  ;;  %v292_v35 = vld [vmem:[%s4282_s23 + $0xa0] sm:$0xff] }
  0x1a   : > { %3276 = vmatprep.subr.bf16.mxu0 %v4033_v9  ;;  %3825 = vmatprep.subr.bf16.mxu1 %v4218_v10  ;;  %v364_v51 = vadd.f32 %v4304_v31, %v326_v40  ;;  %v365_v52 = vadd.f32 %v4304_v31, %v327_v41  ;;  %v366_v54 = vadd.f32 %v4304_v31, %v328_v46  ;;  %vm4385_vm11 = vmpackc.low %vm4123_vm10, %vm2978_vm9 }
  0x1b   : > { %vm380_vm2 = vcmp.ge.f32.partialorder %v348_v45, 0.0  ;;  %v412_v53 = vmul.f32 0.01, %v348_v45  ;;  %v367_v55 = vadd.f32 %v4304_v31, %v329_v47  ;;  %vm381_vm4 = vcmp.ge.f32.partialorder %v349_v50, 0.0 }
  0x1c   : > { %v413_v57 = vmul.f32 0.01, %v349_v50  ;;  %vm396_vm5 = vcmp.ge.f32.partialorder %v364_v51, 0.0  ;;  %vm397_vm6 = vcmp.ge.f32.partialorder %v365_v52, 0.0  ;;  %v428_v59 = vmul.f32 0.01, %v364_v51 }
  0x1d   : > { %3277 = vmatpush3.bf16.msra.mxu0 %v4035_v11  ;;  %3833 = vmatpush3.bf16.msra.mxu1 %v4218_v10  ;;  %v444_v58 = vsel %vm380_vm2, %v348_v45, %v412_v53  ;;  %v429_v60 = vmul.f32 0.01, %v365_v52  ;;  %vm398_vm7 = vcmp.ge.f32.partialorder %v366_v54, 0.0  ;;  %vm399_vm8 = vcmp.ge.f32.partialorder %v367_v55, 0.0 }
  0x1e   : > { %3278 = vmatprep.subr.bf16.mxu0 %v4036_v14  ;;  %3826 = vmatprep.subr.bf16.mxu1 %v4234_v15  ;;  %v445_v61 = vsel %vm381_vm4, %v349_v50, %v413_v57  ;;  %v562_v62 = vrot.slane %v444_v58, 7  ;;  %v430_v63 = vmul.f32 0.01, %v366_v54  ;;  %v460_v2 = vsel %vm396_vm5, %v364_v51, %v428_v59 }
  0x1f   : > { %v563_v0 = vrot.slane %v445_v61, 7  ;;  %v461_v3 = vsel %vm397_vm6, %v365_v52, %v429_v60  ;;  %v431_v5 = vmul.f32 0.01, %v367_v55  ;;  %v4346_v8 = vrot.slane %v460_v2, 7  ;;  %v294_v60 = vld [vmem:[%s4282_s23 + $0xb0] sm:$0xff] }
  0x20   : > { %v4344_v6 = vsel %vm558_vm0, 0.0, %v562_v62  ;;  %v587_v9 = vrot.slane %v461_v3, 7  ;;  %v462_v11 = vsel %vm398_vm7, %v366_v54, %v430_v63  ;;  %v312_v45 = vmul.f32 %v4299_v30, %v274_v21  ;;  %v293_v54 = vld [vmem:[%s4282_s23 + $0xa8] sm:$0xff]  ;;  %v4049_v63 = vld [vmem:[%s5642_s1] sm:$0xff]  }
  0x21   : > { %3279 = vmatpush3.bf16.msra.mxu0 %v4038_v16  ;;  %3834 = vmatpush3.bf16.msra.mxu1 %v4234_v15  ;;  %5700 = vst [vmem:[#allocation7_spill] sm:$0xff] %v4344_v6  ;;  %v4350_v12 = vsel %vm558_vm0, %v562_v62, %v563_v0  ;;  %v4353_v14 = vsel %vm558_vm0, %v563_v0, 0.0  ;;  %v745_v16 = vrot.slane %v4344_v6, 1  ;;  %v463_v42 = vsel %vm399_vm8, %v367_v55, %v431_v5 }
  0x22   : > { %3280 = vmatprep.subr.bf16.mxu0 %v4039_v18  ;;  %3827 = vmatprep.subr.bf16.mxu1 %v4254_v19  ;;  %5701 = vst [vmem:[#allocation8_spill] sm:$0xff] %v4350_v12  ;;  %5702 = vst [vmem:[#allocation9_spill] sm:$0xff] %v4353_v14  ;;  %v748_v23 = vrot.slane %v4353_v14, 1  ;;  %v4363_v25 = vsel %vm558_vm0, %v4346_v8, %v587_v9  ;;  %v4372_v32 = vsel %vm558_vm0, %v587_v9, 0.0  ;;  %v4390_v43 = vrot.slane %v462_v11, 7  ;;  %v295_v9 = vld [vmem:[%s4282_s23 + $0xb8] sm:$0xff] }
  0x23   : > { %v913_v33 = vrot.slane %v4363_v25, 2  ;;  %v4376_v34 = vpack.c.bf16 %v4350_v12, %v562_v62  ;;  %v915_v39 = vrot.slane %v4372_v32, 2  ;;  %v350_v53 = vadd.f32 %v4304_v31, %v312_v45  ;;  %v300_v18 = vld [vmem:[%s4282_s23 + $0xe0] sm:$0xff] }
  0x24   : > { %5705 = vst [vmem:[#allocation10_spill] sm:$0xff] %v4390_v43  ;;  %v4401_v52 = vsel %vm558_vm0, 0.0, %v4390_v43  ;;  %v330_v55 = vmul.f32 %v4299_v30, %v292_v35  ;;  %v331_v3 = vmul.f32 %v4299_v30, %v293_v54  ;;  %v332_v21 = vmul.f32 %v4299_v30, %v294_v60 }
  0x25   : > { %3281 = vmatpush3.bf16.msra.mxu0 %v4041_v22  ;;  %3835 = vmatpush3.bf16.msra.mxu1 %v4254_v19  ;;  %v746_v22 = vrot.slane %v4350_v12, 1  ;;  %v916_v47 = vsel %vm866_vm3, %v913_v33, %v915_v39  ;;  %v917_v58 = vrot.slane %v4401_v52, 2  ;;  %vm382_vm12 = vcmp.ge.f32.partialorder %v350_v53, 0.0 }
  0x26   : > { %3282 = vmatprep.subr.bf16.mxu0 %v4042_v24  ;;  %3828 = vmatprep.subr.bf16.mxu1 %v4275_v26  ;;  %v414_v0 = vmul.f32 0.01, %v350_v53  ;;  %v368_v5 = vadd.f32 %v4304_v31, %v330_v55  ;;  %v369_v35 = vadd.f32 %v4304_v31, %v331_v3  ;;  %v370_v45 = vadd.f32 %v4304_v31, %v332_v21  ;;  %v4062_v55 = vld [vmem:[%s5642_s1 + $0x78] sm:$0xff]  }
  0x27   : > { %v747_v36 = vsel %vm739_vm1, %v745_v16, %v746_v22  ;;  %v749_v37 = vsel %vm739_vm1, %v746_v22, %v748_v23  ;;  %v4050_v23 = vld [vmem:[%s5642_s1 + $0x48] sm:$0xff]  }
  0x28   : > { %v4383_v40 = vpack.c.bf16 %v749_v37, %v747_v36  ;;  %vm400_vm14 = vcmp.ge.f32.partialorder %v368_v5, 0.0  ;;  %v432_v37 = vmul.f32 0.01, %v368_v5  ;;  %vm401_vm15 = vcmp.ge.f32.partialorder %v369_v35, 0.0 }
  0x29   : > { %3283 = vmatpush3.bf16.msra.mxu0 %v4044_v27  ;;  %3836 = vmatpush3.bf16.msra.mxu1 %v4275_v26  ;;  %v275_v27 = vld [vmem:[%s4282_s23 + $0x18] sm:$0xff]  ;;  %vm402_vm2 = vcmp.ge.f32.partialorder %v370_v45, 0.0  ;;  %v434_v21 = vmul.f32 0.01, %v370_v45 }
  0x2a   : > { %3284 = vmatprep.subr.bf16.mxu0 %v4045_v28  ;;  %3829 = vmatprep.subr.bf16.mxu1 %v4293_v29  ;;  %v4369_v28 = vsel %vm558_vm0, 0.0, %v4346_v8  ;;  %v313_v50 = vmul.f32 %v4299_v30, %v275_v27  ;;  %v464_v60 = vsel %vm400_vm14, %v368_v5, %v432_v37 }
  0x2b   : > { %v912_v38 = vrot.slane %v4369_v28, 2  ;;  %1320 = vmatprep.mubr.bf16.mxu0 %v4383_v40 }
  0x2c   : > { %v351_v59 = vadd.f32 %v4304_v31, %v313_v50 }
  0x2d   : > { %3285 = vmatpush3.bf16.msra.mxu0 %v4047_v49  ;;  %3837 = vmatpush3.bf16.msra.mxu1 %v4293_v29  ;;  %v914_v46 = vsel %vm866_vm3, %v912_v38, %v913_v33  ;;  %v590_v49 = vrot.slane %v463_v42, 7  ;;  %v333_v38 = vmul.f32 %v4299_v30, %v295_v9  ;;  %v433_v42 = vmul.f32 0.01, %v369_v35 }
  0x2e   : > { %3678 = vmatprep.subr.bf16.mxu0 %v4180_v1  ;;  %3406 = vmatprep.subr.bf16.mxu1 %v4048_v56  ;;  %v4397_v51 = vpack.c.bf16 %v916_v47, %v914_v46  ;;  %vm383_vm13 = vcmp.ge.f32.partialorder %v351_v59, 0.0  ;;  %v415_v2 = vmul.f32 0.01, %v351_v59  ;;  %v4051_v46 = vld [vmem:[%s5642_s1 + $0x8] sm:$0xff]   ;;  %v4478_v9 = vrot.slane %v464_v60, 7 }
  0x2f   : > { %v4411_v56 = vsel %vm558_vm0, %v4390_v43, %v590_v49  ;;  %v4414_v57 = vsel %vm558_vm0, %v590_v49, 0.0  ;;  %v297_v60 = vld [vmem:[%s4282_s23 + $0xc8] sm:$0xff] }
  0x30   : > { %5706 = vst [vmem:[#allocation11_spill] sm:$0xff] %v4397_v51  ;;  %2981 = vmatmul.mubr.msk.bf16.vlgmr.msra.gmra.mrb[0].mxu0 %vm4385_vm11, %v4376_v34  ;;  %3710 = vmatprep.mubr.bf16.mxu1 %v4397_v51  ;;  %v918_v61 = vrot.slane %v4411_v56, 2  ;;  %v920_v62 = vrot.slane %v4414_v57, 2  ;;  %v447_v27 = vsel %vm383_vm13, %v351_v59, %v415_v2  ;;  %v4052_v59 = vld [vmem:[%s5642_s1 + $0x50] sm:$0xff]   ;;  %v276_v2 = vld [vmem:[%s4282_s23 + $0x20] sm:$0xff] }
  0x31   : > { %3679 = vmatpush3.bf16.msra.mxu0 %v4180_v1  ;;  %v446_v1 = vsel %vm382_vm12, %v350_v53, %v414_v0  ;;  %v566_v36 = vrot.slane %v447_v27, 7  ;;  %v4053_v0 = vld [vmem:[%s5642_s1 + $0x10] sm:$0xff]  }
  0x32   : > { %3680 = vmatprep.subr.bf16.mxu0 %v4193_v4  ;;  %v919_v11 = vsel %vm866_vm3, %v917_v58, %v918_v61  ;;  %v921_v16 = vsel %vm866_vm3, %v918_v61, %v920_v62  ;;  %v565_v33 = vrot.slane %v446_v1, 7  ;;  %v465_v61 = vsel %vm401_vm15, %v369_v35, %v433_v42  ;;  %v4057_v58 = vld [vmem:[%s5642_s1 + $0x20] sm:$0xff]  }
  0x33   : > { %v4433_v22 = vpack.c.bf16 %v921_v16, %v919_v11  ;;  %v593_v11 = vrot.slane %v465_v61, 7  ;;  %v4054_v16 = vld [vmem:[%s5642_s1 + $0x58] sm:$0xff]  }
  0x34   : > { %v4443_v39 = vsel %vm558_vm0, 0.0, %v565_v33  ;;  %v4451_v47 = vsel %vm558_vm0, %v565_v33, %v566_v36 }
  0x35   : > { %5707 = vst [vmem:[#allocation12_spill] sm:$0xff] %v4433_v22  ;;  %3681 = vmatpush3.bf16.msra.mxu0 %v4193_v4  ;;  %3711 = vmatmul.mubr.bf16.vlgmr.msra.gmra.mrb[0].mxu1 %v4433_v22  ;;  %5708 = vst [vmem:[#allocation13_spill] sm:$0xff] %v4443_v39  ;;  %v4454_v4 = vsel %vm558_vm0, %v566_v36, 0.0  ;;  %v750_v49 = vrot.slane %v4443_v39, 1  ;;  %v751_v53 = vrot.slane %v4451_v47, 1  ;;  %v4468_v62 = vpack.c.bf16 %v4451_v47, %v565_v33 }
  0x36   : > { %3682 = vmatprep.subr.bf16.mxu0 %v4205_v7  ;;  %3407 = vmatpush3.bf16.msra.mxu1 %v4049_v63  ;;  %5709 = vst [vmem:[#allocation14_spill] sm:$0xff] %v4451_v47  ;;  %5710 = vst [vmem:[#allocation15_spill] sm:$0xff] %v4454_v4  ;;  %v753_v54 = vrot.slane %v4454_v4, 1  ;;  %v371_v63 = vadd.f32 %v4304_v31, %v333_v38  ;;  %v4490_v27 = vsel %vm558_vm0, %v4478_v9, %v593_v11 }
  0x37   : > { %3408 = vmatprep.subr.bf16.mxu1 %v4050_v23  ;;  %v752_v3 = vsel %vm739_vm1, %v750_v49, %v751_v53  ;;  %v296_v23 = vld [vmem:[%s4282_s23 + $0xc0] sm:$0xff]  ;;  %v4494_v33 = vsel %vm558_vm0, 0.0, %v4478_v9  ;;  %v4497_v35 = vsel %vm558_vm0, %v593_v11, 0.0  ;;  %v923_v38 = vrot.slane %v4490_v27, 2 }
  0x38   : > { %v754_v5 = vsel %vm739_vm1, %v751_v53, %v753_v54  ;;  %vm403_vm4 = vcmp.ge.f32.partialorder %v371_v63, 0.0  ;;  %v435_v36 = vmul.f32 0.01, %v371_v63  ;;  %v922_v37 = vrot.slane %v4494_v33, 2 }
  0x39   : > { %3683 = vmatpush3.bf16.msra.mxu0 %v4205_v7  ;;  %v4484_v1 = vpack.c.bf16 %v754_v5, %v752_v3  ;;  %v277_v7 = vld [vmem:[%s4282_s23 + $0x28] sm:$0xff]  ;;  %v925_v42 = vrot.slane %v4497_v35, 2  ;;  %v314_v54 = vmul.f32 %v4299_v30, %v276_v2  ;;  %v334_v3 = vmul.f32 %v4299_v30, %v296_v23 }
  0x3a   : > { %3684 = vmatprep.subr.bf16.mxu0 %v4218_v10  ;;  %3409 = vmatpush3.bf16.msra.mxu1 %v4051_v46  ;;  %v466_v46 = vsel %vm402_vm2, %v370_v45, %v434_v21  ;;  %v467_v49 = vsel %vm403_vm4, %v371_v63, %v435_v36  ;;  %v924_v61 = vsel %vm866_vm3, %v922_v37, %v923_v38  ;;  %v4055_v63 = vld [vmem:[%s5642_s1 + $0x18] sm:$0xff]  }
  0x3b   : > { %3410 = vmatprep.subr.bf16.mxu1 %v4052_v59  ;;  %1328 = vmatprep.mubr.bf16.mxu0 %v4484_v1  ;;  %v4508_v53 = vrot.slane %v466_v46, 7  ;;  %v315_v59 = vmul.f32 %v4299_v30, %v277_v7  ;;  %v596_v45 = vrot.slane %v467_v49, 7  ;;  %v352_v11 = vadd.f32 %v4304_v31, %v314_v54 }
  0x3c   : > { %2985 = vmatmul.mubr.msk.bf16.gmra.mrb[4].mxu0 %vm4385_vm11, %v4468_v62  ;;  %v335_v37 = vmul.f32 %v4299_v30, %v297_v60 }
  0x3d   : > { %3685 = vmatpush3.bf16.msra.mxu0 %v4218_v10  ;;  %v926_v10 = vsel %vm866_vm3, %v923_v38, %v925_v42  ;;  %v4524_v5 = vsel %vm558_vm0, 0.0, %v4508_v53  ;;  %v353_v21 = vadd.f32 %v4304_v31, %v315_v59  ;;  %v4533_v7 = vsel %vm558_vm0, %v4508_v53, %v596_v45  ;;  %v299_v38 = vld [vmem:[%s4282_s23 + $0xd8] sm:$0xff] }
  0x3e   : > { %3686 = vmatprep.subr.bf16.mxu0 %v4234_v15  ;;  %3411 = vmatpush3.bf16.msra.mxu1 %v4053_v0  ;;  %v4520_v2 = vpack.c.bf16 %v926_v10, %v924_v61  ;;  %v4056_v0 = vld [vmem:[%s5642_s1 + $0x60] sm:$0xff]   ;;  %v4536_v23 = vsel %vm558_vm0, %v596_v45, 0.0  ;;  %v927_v36 = vrot.slane %v4524_v5, 2  ;;  %v928_v42 = vrot.slane %v4533_v7, 2 }
  0x3f   : > { %3412 = vmatprep.subr.bf16.mxu1 %v4054_v16  ;;  %v298_v16 = vld [vmem:[%s4282_s23 + $0xd0] sm:$0xff]  ;;  %v930_v46 = vrot.slane %v4536_v23, 2  ;;  %vm384_vm5 = vcmp.ge.f32.partialorder %v352_v11, 0.0  ;;  %vm385_vm6 = vcmp.ge.f32.partialorder %v353_v21, 0.0  ;;  %v416_v49 = vmul.f32 0.01, %v352_v11 }
  0x40   : > { %5711 = vst [vmem:[#allocation16_spill] sm:$0xff] %v4520_v2  ;;  %3714 = vmatprep.mubr.bf16.mxu1 %v4520_v2  ;;  %v417_v54 = vmul.f32 0.01, %v353_v21  ;;  %v372_v59 = vadd.f32 %v4304_v31, %v334_v3  ;;  %v373_v60 = vadd.f32 %v4304_v31, %v335_v37  ;;  %v336_v10 = vmul.f32 %v4299_v30, %v298_v16 }
  0x41   : > { %3687 = vmatpush3.bf16.msra.mxu0 %v4234_v15  ;;  %v929_v15 = vsel %vm866_vm3, %v927_v36, %v928_v42  ;;  %v931_v61 = vsel %vm866_vm3, %v928_v42, %v930_v46  ;;  %v337_v45 = vmul.f32 %v4299_v30, %v299_v38  ;;  %v448_v3 = vsel %vm384_vm5, %v352_v11, %v416_v49  ;;  %v4058_v36 = vld [vmem:[%s5642_s1 + $0x68] sm:$0xff]  }
  0x42   : > { %3688 = vmatprep.subr.bf16.mxu0 %v4254_v19  ;;  %3413 = vmatpush3.bf16.msra.mxu1 %v4055_v63  ;;  %v278_v63 = vld [vmem:[%s4282_s23 + $0x30] sm:$0xff]  ;;  %v4557_v24 = vpack.c.bf16 %v931_v61, %v929_v15  ;;  %v449_v37 = vsel %vm385_vm6, %v353_v21, %v417_v54  ;;  %vm404_vm7 = vcmp.ge.f32.partialorder %v372_v59, 0.0  ;;  %v568_v16 = vrot.slane %v448_v3, 7  ;;  %v4059_v61 = vld [vmem:[%s5642_s1 + $0x28] sm:$0xff]  }
  0x43   : > { %3414 = vmatprep.subr.bf16.mxu1 %v4056_v0  ;;  %v569_v0 = vrot.slane %v449_v37, 7  ;;  %vm405_vm8 = vcmp.ge.f32.partialorder %v373_v60, 0.0  ;;  %v436_v38 = vmul.f32 0.01, %v372_v59  ;;  %v437_v42 = vmul.f32 0.01, %v373_v60 }
  0x44   : > { %5712 = vst [vmem:[#allocation17_spill] sm:$0xff] %v4557_v24  ;;  %3715 = vmatmul.mubr.bf16.gmra.mrb[4].mxu1 %v4557_v24  ;;  %v374_v11 = vadd.f32 %v4304_v31, %v336_v10  ;;  %v375_v21 = vadd.f32 %v4304_v31, %v337_v45  ;;  %v316_v46 = vmul.f32 %v4299_v30, %v278_v63  ;;  %v279_v37 = vld [vmem:[%s4282_s23 + $0x38] sm:$0xff] }
  0x45   : > { %3689 = vmatpush3.bf16.msra.mxu0 %v4254_v19  ;;  %v4571_v49 = vsel %vm558_vm0, %v568_v16, %v569_v0  ;;  %v4574_v19 = vsel %vm558_vm0, 0.0, %v568_v16  ;;  %v4577_v54 = vsel %vm558_vm0, %v569_v0, 0.0  ;;  %v468_v15 = vsel %vm404_vm7, %v372_v59, %v436_v38  ;;  %v4060_v0 = vld [vmem:[%s5642_s1 + $0x70] sm:$0xff]  }
  0x46   : > { %3690 = vmatprep.subr.bf16.mxu0 %v4275_v26  ;;  %5713 = vst [vmem:[#allocation18_spill] sm:$0xff] %v4571_v49  ;;  %5714 = vst [vmem:[#allocation19_spill] sm:$0xff] %v4574_v19  ;;  %3415 = vmatpush3.bf16.msra.mxu1 %v4057_v58  ;;  %v755_v10 = vrot.slane %v4574_v19, 1  ;;  %v756_v45 = vrot.slane %v4571_v49, 1  ;;  %v758_v63 = vrot.slane %v4577_v54, 1  ;;  %v469_v3 = vsel %vm405_vm8, %v373_v60, %v437_v42 }
  0x47   : > { %5715 = vst [vmem:[#allocation20_spill] sm:$0xff] %v4577_v54  ;;  %3416 = vmatprep.subr.bf16.mxu1 %v4058_v36  ;;  %v4592_v58 = vrot.slane %v468_v15, 7  ;;  %v599_v59 = vrot.slane %v469_v3, 7  ;;  %v4595_v38 = vpack.c.bf16 %v4571_v49, %v568_v16  ;;  %vm406_vm9 = vcmp.ge.f32.partialorder %v374_v11, 0.0 }
  0x48   : > { %v757_v60 = vsel %vm739_vm1, %v755_v10, %v756_v45  ;;  %v759_v36 = vsel %vm739_vm1, %v756_v45, %v758_v63  ;;  %vm407_vm10 = vcmp.ge.f32.partialorder %v375_v21, 0.0  ;;  %v438_v42 = vmul.f32 0.01, %v374_v11  ;;  %v301_v45 = vld [vmem:[%s4282_s23 + $0xe8] sm:$0xff] }
  0x49   : > { %3691 = vmatpush3.bf16.msra.mxu0 %v4275_v26  ;;  %5716 = vst [vmem:[#allocation21_spill] sm:$0xff] %v4595_v38  ;;  %v4061_v26 = vld [vmem:[%s5642_s1 + $0x30] sm:$0xff]   ;;  %v4604_v15 = vpack.c.bf16 %v759_v36, %v757_v60  ;;  %v4608_v16 = vsel %vm558_vm0, %v4592_v58, %v599_v59  ;;  %v4612_v3 = vsel %vm558_vm0, 0.0, %v4592_v58  ;;  %v4615_v10 = vsel %vm558_vm0, %v599_v59, 0.0 }
  0x4a   : > { %3692 = vmatprep.subr.bf16.mxu0 %v4293_v29  ;;  %3417 = vmatpush3.bf16.msra.mxu1 %v4059_v61  ;;  %v932_v63 = vrot.slane %v4612_v3, 2  ;;  %v933_v50 = vrot.slane %v4608_v16, 2  ;;  %v935_v60 = vrot.slane %v4615_v10, 2  ;;  %v439_v36 = vmul.f32 0.01, %v375_v21 }
  0x4b   : > { %3418 = vmatprep.subr.bf16.mxu1 %v4060_v0  ;;  %1336 = vmatprep.mubr.bf16.mxu0 %v4604_v15  ;;  %v470_v61 = vsel %vm406_vm9, %v374_v11, %v438_v42  ;;  %v317_v59 = vmul.f32 %v4299_v30, %v279_v37  ;;  %v354_v24 = vadd.f32 %v4304_v31, %v316_v46  ;;  %v4071_v0 = vld [vmem:[%s5642_s1 + $0x1c0] sm:$0xff]   ;;  %v302_v42 = vld [vmem:[%s4282_s23 + $0xf0] sm:$0xff] }
  0x4c   : > { %v338_v2 = vmul.f32 %v4299_v30, %v300_v18  ;;  %v934_v22 = vsel %vm866_vm3, %v932_v63, %v933_v50  ;;  %v936_v51 = vsel %vm866_vm3, %v933_v50, %v935_v60  ;;  %2989 = vmatmul.mubr.msk.bf16.gmra.mrb[8].mxu0 %vm4385_vm11, %v4595_v38  ;;  %v4639_v11 = vrot.slane %v470_v61, 7  ;;  %v4063_v50 = vld [vmem:[%s5642_s1 + $0x38] sm:$0xff]   ;;  %v4657_v60 = vld [vmem:[%s5642_s1 + $0x80] sm:$0xff]  }
  0x4d   : > { %3693 = vmatpush3.bf16.msra.mxu0 %v4293_v29  ;;  %v471_v29 = vsel %vm407_vm10, %v375_v21, %v439_v36  ;;  %v4641_v37 = vpack.c.bf16 %v936_v51, %v934_v22  ;;  %v355_v18 = vadd.f32 %v4304_v31, %v317_v59  ;;  %vm386_vm12 = vcmp.ge.f32.partialorder %v354_v24, 0.0 }
  0x4e   : > { %v602_v46 = vrot.slane %v471_v29, 7  ;;  %3419 = vmatpush3.bf16.msra.mxu1 %v4061_v26  ;;  %3542 = vmatprep.subr.bf16.mxu0 %v4071_v0  ;;  %v4650_v63 = vsel %vm558_vm0, 0.0, %v4639_v11  ;;  %v418_v21 = vmul.f32 0.01, %v354_v24  ;;  %v339_v51 = vmul.f32 %v4299_v30, %v301_v45  ;;  %v303_v45 = vld [vmem:[%s4282_s23 + $0xf8] sm:$0xff] }
  0x4f   : > { %5717 = vst [vmem:[#allocation22_spill] sm:$0xff] %v4641_v37  ;;  %v376_v22 = vadd.f32 %v4304_v31, %v338_v2  ;;  %3420 = vmatprep.subr.bf16.mxu1 %v4062_v55  ;;  %3718 = vmatprep.mubr.bf16.mxu1 %v4641_v37  ;;  %v937_v61 = vrot.slane %v4650_v63, 2  ;;  %vm387_vm13 = vcmp.ge.f32.partialorder %v355_v18, 0.0  ;;  %v419_v59 = vmul.f32 0.01, %v355_v18 }
  0x50   : > { %v4662_v26 = vsel %vm558_vm0, %v4639_v11, %v602_v46  ;;  %v4665_v36 = vsel %vm558_vm0, %v602_v46, 0.0  ;;  %v450_v0 = vsel %vm386_vm12, %v354_v24, %v418_v21  ;;  %v377_v37 = vadd.f32 %v4304_v31, %v339_v51 }
  0x51   : > { %v938_v55 = vrot.slane %v4662_v26, 2  ;;  %v940_v2 = vrot.slane %v4665_v36, 2  ;;  %v571_v29 = vrot.slane %v450_v0, 7  ;;  %vm408_vm14 = vcmp.ge.f32.partialorder %v376_v22, 0.0 }
  0x52   : > { %v440_v20 = vmul.f32 0.01, %v376_v22  ;;  %3421 = vmatpush3.bf16.msra.mxu1 %v4063_v50  ;;  %v451_v17 = vsel %vm387_vm13, %v355_v18, %v419_v59  ;;  %v340_v43 = vmul.f32 %v4299_v30, %v302_v42  ;;  %vm409_vm15 = vcmp.ge.f32.partialorder %v377_v37, 0.0  ;;  %v281_v59 = vld [vmem:[%s4282_s23 + $0x48] sm:$0xff] }
  0x53   : > { %v939_v46 = vsel %vm866_vm3, %v937_v61, %v938_v55  ;;  %v941_v13 = vsel %vm866_vm3, %v938_v55, %v940_v2  ;;  %3726 = vmatprep.subr.bf16.mxu1 %v4657_v60  ;;  %v572_v38 = vrot.slane %v451_v17, 7  ;;  %v4680_v24 = vsel %vm558_vm0, 0.0, %v571_v29  ;;  %v280_v2 = vld [vmem:[%s4282_s23 + $0x40] sm:$0xff] }
  0x54   : > { %v4677_v54 = vpack.c.bf16 %v941_v13, %v939_v46  ;;  %5719 = vst [vmem:[#allocation24_spill] sm:$0xff] %v4680_v24  ;;  %v760_v50 = vrot.slane %v4680_v24, 1  ;;  %v441_v21 = vmul.f32 0.01, %v377_v37  ;;  %v472_v51 = vsel %vm408_vm14, %v376_v22, %v440_v20 }
  0x55   : > { %v341_v61 = vmul.f32 %v4299_v30, %v303_v45  ;;  %v4686_v18 = vsel %vm558_vm0, %v571_v29, %v572_v38  ;;  %v4689_v13 = vsel %vm558_vm0, %v572_v38, 0.0  ;;  %v4691_v17 = vrot.slane %v472_v51, 7 }
  0x56   : > { %5718 = vst [vmem:[#allocation23_spill] sm:$0xff] %v4677_v54  ;;  %3719 = vmatmul.mubr.bf16.gmra.mrb[8].mxu1 %v4677_v54  ;;  %5720 = vst [vmem:[#allocation25_spill] sm:$0xff] %v4686_v18  ;;  %v378_v42 = vadd.f32 %v4304_v31, %v340_v43  ;;  %v761_v55 = vrot.slane %v4686_v18, 1  ;;  %v763_v20 = vrot.slane %v4689_v13, 1  ;;  %v473_v22 = vsel %vm409_vm15, %v377_v37, %v441_v21  ;;  %v282_v43 = vld [vmem:[%s4282_s23 + $0x50] sm:$0xff] }
  0x57   : > { %5721 = vst [vmem:[#allocation26_spill] sm:$0xff] %v4689_v13  ;;  %v4697_v45 = vpack.c.bf16 %v4686_v18, %v571_v29  ;;  %v605_v0 = vrot.slane %v473_v22, 7  ;;  %v4703_v38 = vsel %vm558_vm0, 0.0, %v4691_v17  ;;  %v379_v46 = vadd.f32 %v4304_v31, %v341_v61  ;;  %v283_v29 = vld [vmem:[%s4282_s23 + $0x58] sm:$0xff] }
  0x58   : > { %vm410_vm2 = vcmp.ge.f32.partialorder %v378_v42, 0.0  ;;  %v762_v51 = vsel %vm739_vm1, %v760_v50, %v761_v55  ;;  %v764_v54 = vsel %vm739_vm1, %v761_v55, %v763_v20  ;;  %v942_v37 = vrot.slane %v4703_v38, 2 }
  0x59   : > { %5722 = vst [vmem:[#allocation27_spill] sm:$0xff] %v4697_v45  ;;  %v442_v21 = vmul.f32 0.01, %v378_v42  ;;  %v4711_v13 = vpack.c.bf16 %v764_v54, %v762_v51  ;;  %v4715_v22 = vsel %vm558_vm0, %v4691_v17, %v605_v0  ;;  %v4718_v18 = vsel %vm558_vm0, %v605_v0, 0.0 }
  0x5a   : > { %vm411_vm4 = vcmp.ge.f32.partialorder %v379_v46, 0.0  ;;  %v943_v61 = vrot.slane %v4715_v22, 2  ;;  %v945_v50 = vrot.slane %v4718_v18, 2  ;;  %v443_v24 = vmul.f32 0.01, %v379_v46 }
  0x5b   : > { %5723 = vst [vmem:[#allocation28_spill] sm:$0xff] %v4711_v13  ;;  %v474_v55 = vsel %vm410_vm2, %v378_v42, %v442_v21  ;;  %1344 = vmatprep.mubr.bf16.mxu0 %v4711_v13  ;;  %v318_v54 = vmul.f32 %v4299_v30, %v280_v2  ;;  %v319_v51 = vmul.f32 %v4299_v30, %v281_v59 }
  0x5c   : > { %v4723_v20 = vrot.slane %v474_v55, 7  ;;  %v320_v49 = vmul.f32 %v4299_v30, %v282_v43  ;;  %v944_v0 = vsel %vm866_vm3, %v942_v37, %v943_v61  ;;  %v946_v19 = vsel %vm866_vm3, %v943_v61, %v945_v50  ;;  %2993 = vmatmul.mubr.msk.bf16.gmra.mrb[12].mxu0 %vm4385_vm11, %v4697_v45  ;;  %v284_v50 = vld [vmem:[%s4282_s23 + $0x60] sm:$0xff] }
  0x5d   : > { %v475_v42 = vsel %vm411_vm4, %v379_v46, %v443_v24  ;;  %v321_v21 = vmul.f32 %v4299_v30, %v283_v29  ;;  %v4734_v55 = vpack.c.bf16 %v946_v19, %v944_v0  ;;  %v356_v59 = vadd.f32 %v4304_v31, %v318_v54  ;;  %v285_v0 = vld [vmem:[%s4282_s23 + $0x68] sm:$0xff] }
  0x5e   : > { %5724 = vst [vmem:[#allocation29_spill] sm:$0xff] %v4723_v20  ;;  %v608_v13 = vrot.slane %v475_v42, 7  ;;  %v4738_v2 = vsel %vm558_vm0, 0.0, %v4723_v20  ;;  %v357_v37 = vadd.f32 %v4304_v31, %v319_v51  ;;  %v358_v61 = vadd.f32 %v4304_v31, %v320_v49 }
  0x5f   : > { %5725 = vst [vmem:[#allocation30_spill] sm:$0xff] %v4734_v55  ;;  %v947_v43 = vrot.slane %v4738_v2, 2  ;;  %v359_v24 = vadd.f32 %v4304_v31, %v321_v21  ;;  %3722 = vmatprep.mubr.bf16.mxu1 %v4734_v55  ;;  %vm388_vm5 = vcmp.ge.f32.partialorder %v356_v59, 0.0  ;;  %v420_v29 = vmul.f32 0.01, %v356_v59 }
  0x60   : > { %v4748_v19 = vsel %vm558_vm0, %v4723_v20, %v608_v13  ;;  %v4751_v46 = vsel %vm558_vm0, %v608_v13, 0.0  ;;  %vm389_vm6 = vcmp.ge.f32.partialorder %v357_v37, 0.0  ;;  %v421_v49 = vmul.f32 0.01, %v357_v37 }
  0x61   : > { %5726 = vst [vmem:[#allocation31_spill] sm:$0xff] %v4751_v46  ;;  %v948_v54 = vrot.slane %v4748_v19, 2  ;;  %v950_v51 = vrot.slane %v4751_v46, 2  ;;  %v452_v42 = vsel %vm388_vm5, %v356_v59, %v420_v29  ;;  %vm390_vm7 = vcmp.ge.f32.partialorder %v358_v61, 0.0  ;;  %v286_v46 = vld [vmem:[%s4282_s23 + $0x70] sm:$0xff] }
  0x62   : > { %vm391_vm8 = vcmp.ge.f32.partialorder %v359_v24, 0.0  ;;  %v422_v21 = vmul.f32 0.01, %v358_v61  ;;  %v453_v45 = vsel %vm389_vm6, %v357_v37, %v421_v49  ;;  %v574_v4 = vrot.slane %v452_v42, 7 }
  0x63   : > { %v949_v55 = vsel %vm866_vm3, %v947_v43, %v948_v54  ;;  %v951_v13 = vsel %vm866_vm3, %v948_v54, %v950_v51  ;;  %v575_v6 = vrot.slane %v453_v45, 7  ;;  %v423_v39 = vmul.f32 0.01, %v359_v24 }
  0x64   : > { %v4759_v14 = vpack.c.bf16 %v951_v13, %v949_v55  ;;  %v454_v47 = vsel %vm390_vm7, %v358_v61, %v422_v21  ;;  %v4762_v12 = vsel %vm558_vm0, 0.0, %v574_v4  ;;  %v322_v59 = vmul.f32 %v4299_v30, %v284_v50  ;;  %v287_v21 = vld [vmem:[%s4282_s23 + $0x78] sm:$0xff] }
  0x65   : > { %v577_v20 = vrot.slane %v454_v47, 7  ;;  %v323_v29 = vmul.f32 %v4299_v30, %v285_v0  ;;  %v4769_v43 = vsel %vm558_vm0, %v574_v4, %v575_v6  ;;  %v4772_v55 = vsel %vm558_vm0, %v575_v6, 0.0 }
  0x66   : > { %5727 = vst [vmem:[#allocation32_spill] sm:$0xff] %v4759_v14  ;;  %3723 = vmatmul.mubr.bf16.gmra.mrb[12].mxu1 %v4759_v14  ;;  %v765_v45 = vrot.slane %v4762_v12, 1  ;;  %v455_v37 = vsel %vm391_vm8, %v359_v24, %v423_v39  ;;  %v766_v47 = vrot.slane %v4769_v43, 1  ;;  %v768_v61 = vrot.slane %v4772_v55, 1  ;;  %v4097_v14 = vld [vmem:[%s5644_s3] ss:$0 sm:$0xff] }
  0x67   : > { %1786 = vmatprep.mubr.bf16.mxu1 %v4326_v48  ;;  %v4780_v50 = vpack.c.bf16 %v4769_v43, %v574_v4  ;;  %v578_v54 = vrot.slane %v455_v37, 7  ;;  %v4783_v51 = vsel %vm558_vm0, 0.0, %v577_v20  ;;  %v360_v6 = vadd.f32 %v4304_v31, %v322_v59 }
  0x68   : > { %v361_v49 = vadd.f32 %v4304_v31, %v323_v29  ;;  %v324_v0 = vmul.f32 %v4299_v30, %v286_v46  ;;  %v767_v39 = vsel %vm739_vm1, %v765_v45, %v766_v47  ;;  %v769_v24 = vsel %vm739_vm1, %v766_v47, %v768_v61  ;;  %v4065_v30 = vld [vmem:[%s5642_s1 + $0x88] sm:$0xff]   ;;  %v4096_v61 = vld [vmem:[%s5643_s2] ss:$0 sm:$0xff] }
  0x69   : > { %5728 = vst [vmem:[#allocation33_spill] sm:$0xff] %v4780_v50  ;;  %v4791_v42 = vsel %vm558_vm0, %v577_v20, %v578_v54  ;;  %v4794_v4 = vsel %vm558_vm0, %v578_v54, 0.0  ;;  %v4797_v13 = vpack.c.bf16 %v769_v24, %v767_v39  ;;  %v770_v37 = vrot.slane %v4783_v51, 1 }
  0x6a   : > { %v771_v59 = vrot.slane %v4791_v42, 1  ;;  %v773_v31 = vrot.slane %v4794_v4, 1  ;;  %vm392_vm9 = vcmp.ge.f32.partialorder %v360_v6, 0.0  ;;  %vm393_vm10 = vcmp.ge.f32.partialorder %v361_v49, 0.0 }
  0x6b   : > { %5729 = vst [vmem:[#allocation34_spill] sm:$0xff] %v4797_v13  ;;  %v424_v46 = vmul.f32 0.01, %v360_v6  ;;  %1352 = vmatprep.mubr.bf16.mxu0 %v4797_v13  ;;  %v425_v47 = vmul.f32 0.01, %v361_v49  ;;  %v325_v54 = vmul.f32 %v4096_v61, %v287_v21  ;;  %v786_v48 = vrot.slane %v4363_v25, 1 }
  0x6c   : > { %v772_v29 = vsel %vm739_vm1, %v770_v37, %v771_v59  ;;  %v774_v45 = vsel %vm739_vm1, %v771_v59, %v773_v31  ;;  %2997 = vmatmul.mubr.msk.bf16.gmra.mrb[16].mxu0 %vm4385_vm11, %v4780_v50  ;;  %v362_v37 = vadd.f32 %v4097_v14, %v324_v0  ;;  %v785_v59 = vrot.slane %v4369_v28, 1  ;;  %v4066_v28 = vld [vmem:[%s5642_s1 + $0x90] sm:$0xff]  }
  0x6d   : > { %v4814_v39 = vpack.c.bf16 %v774_v45, %v772_v29  ;;  %v456_v24 = vsel %vm392_vm9, %v360_v6, %v424_v46  ;;  %v457_v31 = vsel %vm393_vm10, %v361_v49, %v425_v47  ;;  %v363_v61 = vadd.f32 %v4097_v14, %v325_v54 }
  0x6e   : > { %3069 = vmatmul.mubr.msk.bf16.vlgmr.msra.gmra.mrb[16].mxu1 %vm4385_vm11, %v4321_v44  ;;  %v580_v21 = vrot.slane %v456_v24, 7  ;;  %v581_v6 = vrot.slane %v457_v31, 7  ;;  %vm394_vm12 = vcmp.ge.f32.partialorder %v362_v37, 0.0  ;;  %v426_v46 = vmul.f32 0.01, %v362_v37 }
  0x6f   : > { %5730 = vst [vmem:[#allocation35_spill] sm:$0xff] %v4814_v39  ;;  %3727 = vmatpush3.bf16.msra.mxu1 %v4657_v60  ;;  %1360 = vmatprep.mubr.bf16.mxu0 %v4814_v39  ;;  %v788_v0 = vrot.slane %v4372_v32, 1  ;;  %v4832_v49 = vpack.c.bf16 %v4791_v42, %v577_v20  ;;  %vm395_vm13 = vcmp.ge.f32.partialorder %v363_v61, 0.0  ;;  %v427_v60 = vmul.f32 0.01, %v363_v61 }
  0x70   : > { %1794 = vmatprep.mubr.bf16.mxu1 %v4383_v40  ;;  %v4835_v14 = vsel %vm558_vm0, 0.0, %v580_v21  ;;  %3728 = vmatprep.subr.bf16.mxu1 %v4065_v30  ;;  %v4838_v29 = vsel %vm558_vm0, %v580_v21, %v581_v6  ;;  %v4841_v32 = vsel %vm558_vm0, %v581_v6, 0.0  ;;  %v458_v47 = vsel %vm394_vm12, %v362_v37, %v426_v46 }
  0x71   : > { %v775_v45 = vrot.slane %v4835_v14, 1  ;;  %v776_v40 = vrot.slane %v4838_v29, 1  ;;  %v778_v20 = vrot.slane %v4841_v32, 1  ;;  %v459_v54 = vsel %vm395_vm13, %v363_v61, %v427_v60 }
  0x72   : > { %v787_v24 = vsel %vm739_vm1, %v785_v59, %v786_v48  ;;  %v4848_v31 = vpack.c.bf16 %v4838_v29, %v580_v21  ;;  %v583_v44 = vrot.slane %v458_v47, 7  ;;  %v584_v39 = vrot.slane %v459_v54, 7 }
  0x73   : > { %3729 = vmatpush3.bf16.msra.mxu1 %v4065_v30  ;;  %v789_v50 = vsel %vm739_vm1, %v786_v48, %v788_v0  ;;  %v777_v6 = vsel %vm739_vm1, %v775_v45, %v776_v40  ;;  %v779_v13 = vsel %vm739_vm1, %v776_v40, %v778_v20  ;;  %v4855_v37 = vpack.c.bf16 %v4363_v25, %v4346_v8  ;;  %v4067_v8 = vld [vmem:[%s5642_s1 + $0x98] sm:$0xff]  }
  0x74   : > { %3730 = vmatprep.subr.bf16.mxu1 %v4066_v28  ;;  %v790_v61 = vrot.slane %v4401_v52, 1  ;;  %3001 = vmatmul.mubr.msk.bf16.gmra.mrb[20].mxu0 %vm4385_vm11, %v4832_v49  ;;  %v4861_v30 = vpack.c.bf16 %v779_v13, %v777_v6  ;;  %v4864_v59 = vsel %vm558_vm0, %v583_v44, %v584_v39  ;;  %v4867_v48 = vsel %vm558_vm0, 0.0, %v583_v44 }
  0x75   : > { %v4870_v21 = vsel %vm558_vm0, %v584_v39, 0.0  ;;  %v780_v25 = vrot.slane %v4867_v48, 1  ;;  %v781_v52 = vrot.slane %v4864_v59, 1  ;;  %v4881_v46 = vpack.c.bf16 %v789_v50, %v787_v24 }
  0x76   : > { %3073 = vmatmul.mubr.msk.bf16.gmra.mrb[20].mxu1 %vm4385_vm11, %v4376_v34  ;;  %v783_v13 = vrot.slane %v4870_v21, 1  ;;  %1368 = vmatprep.mubr.bf16.mxu0 %v4861_v30  ;;  %v4886_v39 = vpack.c.bf16 %v4864_v59, %v583_v44  ;;  %v791_v0 = vrot.slane %v4411_v56, 1  ;;  %v793_v60 = vrot.slane %v4414_v57, 1 }
  0x77   : > { %1802 = vmatprep.mubr.bf16.mxu1 %v4484_v1  ;;  %v795_v34 = vrot.slane %v4494_v33, 1  ;;  %v782_v45 = vsel %vm739_vm1, %v780_v25, %v781_v52  ;;  %3731 = vmatpush3.bf16.msra.mxu1 %v4066_v28  ;;  %v796_v50 = vrot.slane %v4490_v27, 1  ;;  %v798_v40 = vrot.slane %v4497_v35, 1  ;;  %v4068_v33 = vld [vmem:[%s5642_s1 + $0xa0] sm:$0xff]  }
  0x78   : > { %v784_v47 = vsel %vm739_vm1, %v781_v52, %v783_v13  ;;  %v792_v44 = vsel %vm739_vm1, %v790_v61, %v791_v0  ;;  %v794_v54 = vsel %vm739_vm1, %v791_v0, %v793_v60  ;;  %v4901_v57 = vpack.c.bf16 %v4490_v27, %v4478_v9  ;;  %3732 = vmatprep.subr.bf16.mxu1 %v4067_v8 }
  0x79   : > { %v4895_v20 = vpack.c.bf16 %v784_v47, %v782_v45  ;;  %v4906_v28 = vpack.c.bf16 %v794_v54, %v792_v44  ;;  %v797_v24 = vsel %vm739_vm1, %v795_v34, %v796_v50  ;;  %v799_v35 = vsel %vm739_vm1, %v796_v50, %v798_v40 }
  0x7a   : > { %v800_v6 = vrot.slane %v4524_v5, 1  ;;  %v4911_v61 = vpack.c.bf16 %v799_v35, %v797_v24  ;;  %v801_v25 = vrot.slane %v4533_v7, 1  ;;  %v803_v9 = vrot.slane %v4536_v23, 1 }
  0x7b   : > { %v4917_v27 = vpack.c.bf16 %v4533_v7, %v4508_v53  ;;  %3733 = vmatpush3.bf16.msra.mxu1 %v4067_v8  ;;  %v805_v52 = vrot.slane %v4612_v3, 1  ;;  %v806_v13 = vrot.slane %v4608_v16, 1  ;;  %v808_v0 = vrot.slane %v4615_v10, 1  ;;  %v4069_v10 = vld [vmem:[%s5642_s1 + $0xa8] sm:$0xff]  }
  0x7c   : > { %v4924_v5 = vpack.c.bf16 %v4608_v16, %v4592_v58  ;;  %3005 = vmatmul.mubr.msk.bf16.gmra.mrb[24].mxu0 %vm4385_vm11, %v4848_v31  ;;  %v802_v23 = vsel %vm739_vm1, %v800_v6, %v801_v25  ;;  %v804_v53 = vsel %vm739_vm1, %v801_v25, %v803_v9  ;;  %3734 = vmatprep.subr.bf16.mxu1 %v4068_v33  ;;  %v810_v7 = vrot.slane %v4650_v63, 1  ;;  %v5732_v6 = vld [vmem:[#allocation29_spill] sm:$0xff] }
  0x7d   : > { %v811_v3 = vrot.slane %v4662_v26, 1  ;;  %1376 = vmatprep.mubr.bf16.mxu0 %v4895_v20  ;;  %v4940_v58 = vpack.c.bf16 %v804_v53, %v802_v23  ;;  %v807_v16 = vsel %vm739_vm1, %v805_v52, %v806_v13  ;;  %v809_v8 = vsel %vm739_vm1, %v806_v13, %v808_v0  ;;  %v5734_v13 = vld [vmem:[#allocation14_spill] sm:$0xff]  ;;  %v5736_v23 = vld [vmem:[#allocation13_spill] sm:$0xff] }
  0x7e   : > { %3077 = vmatmul.mubr.msk.bf16.gmra.mrb[24].mxu1 %vm4385_vm11, %v4468_v62  ;;  %v813_v63 = vrot.slane %v4665_v36, 1  ;;  %v4946_v60 = vpack.c.bf16 %v809_v8, %v807_v16  ;;  %v4951_v45 = vpack.c.bf16 %v4662_v26, %v4639_v11  ;;  %v815_v47 = vrot.slane %v4703_v38, 1  ;;  %v5731_v26 = vld [vmem:[#allocation31_spill] sm:$0xff] }
  0x7f   : > { %1810 = vmatprep.mubr.bf16.mxu1 %v4604_v15  ;;  %v812_v34 = vsel %vm739_vm1, %v810_v7, %v811_v3  ;;  %3735 = vmatpush3.bf16.msra.mxu1 %v4068_v33  ;;  %v816_v40 = vrot.slane %v4715_v22, 1  ;;  %v818_v44 = vrot.slane %v4718_v18, 1  ;;  %v4959_v36 = vpack.c.bf16 %v4715_v22, %v4691_v17  ;;  %v4070_v33 = vld [vmem:[%s5642_s1 + $0xb0] sm:$0xff]   ;;  %v5738_v16 = vld [vmem:[#allocation7_spill] sm:$0xff] }
  0x80   : > { %v814_v50 = vsel %vm739_vm1, %v811_v3, %v813_v63  ;;  %3736 = vmatprep.subr.bf16.mxu1 %v4069_v10  ;;  %v820_v24 = vrot.slane %v4738_v2, 1  ;;  %v821_v11 = vrot.slane %v4748_v19, 1  ;;  %v823_v38 = vrot.slane %v5731_v26, 1  ;;  %v5733_v22 = vld [vmem:[#allocation8_spill] sm:$0xff]  ;;  %v5740_v63 = vld [vmem:[#allocation9_spill] sm:$0xff]  ;;  %v5745_v26 = vld [vmem:[#allocation19_spill] sm:$0xff] }
  0x81   : > { %v4961_v54 = vpack.c.bf16 %v814_v50, %v812_v34  ;;  %v817_v35 = vsel %vm739_vm1, %v815_v47, %v816_v40  ;;  %v819_v18 = vsel %vm739_vm1, %v816_v40, %v818_v44  ;;  %v4973_v17 = vpack.c.bf16 %v4748_v19, %v5732_v6  ;;  %v5742_v50 = vld [vmem:[#allocation15_spill] sm:$0xff]  ;;  %v4079_v6 = vld [vmem:[%s5642_s1 + $0xb8] sm:$0xff]  }
  0x82   : > { %v873_v25 = vrot.slane %v5733_v22, 2  ;;  %v4976_v9 = vpack.c.bf16 %v819_v18, %v817_v35  ;;  %v822_v2 = vsel %vm739_vm1, %v820_v24, %v821_v11  ;;  %v824_v52 = vsel %vm739_vm1, %v821_v11, %v823_v38  ;;  %v5746_v35 = vld [vmem:[#allocation18_spill] sm:$0xff]  ;;  %v5747_v22 = vld [vmem:[#allocation21_spill] sm:$0xff] }
  0x83   : > { %v5735_v0 = vrot.slane %v5734_v13, 2  ;;  %v5737_v53 = vrot.slane %v5736_v23, 2  ;;  %3737 = vmatpush3.bf16.msra.mxu1 %v4069_v10  ;;  %v4985_v3 = vpack.c.bf16 %v824_v52, %v822_v2  ;;  %v5739_v19 = vrot.slane %v5738_v16, 2  ;;  %v5749_v52 = vld [vmem:[#allocation24_spill] sm:$0xff] }
  0x84   : > { %v5741_v34 = vrot.slane %v5740_v63, 2  ;;  %v5743_v40 = vrot.slane %v5742_v50, 2  ;;  %3009 = vmatmul.mubr.msk.bf16.gmra.mrb[28].mxu0 %vm4385_vm11, %v4886_v39  ;;  %3738 = vmatprep.subr.bf16.mxu1 %v4070_v33  ;;  %v882_v38 = vrot.slane %v5745_v26, 2  ;;  %v883_v18 = vrot.slane %v5746_v35, 2  ;;  %v5752_v16 = vld [vmem:[#allocation28_spill] sm:$0xff] }
  0x85   : > { %v879_v7 = vsel %vm866_vm3, %v5737_v53, %v5735_v0  ;;  %v874_v8 = vsel %vm866_vm3, %v5739_v19, %v873_v25  ;;  %v5744_v44 = vmov %v5735_v0  ;;  %1384 = vmatprep.mubr.bf16.mxu0 %v4881_v46  ;;  %v887_v13 = vrot.slane %v5749_v52, 2  ;;  %v5750_v0 = vld [vmem:[#allocation25_spill] sm:$0xff]  ;;  %v5751_v53 = vld [vmem:[#allocation26_spill] sm:$0xff] }
  0x86   : > { %v876_v47 = vsel %vm866_vm3, %v873_v25, %v5741_v34  ;;  %v881_v24 = vsel %vm866_vm3, %v5744_v44, %v5743_v40  ;;  %3081 = vmatmul.mubr.msk.bf16.gmra.mrb[28].mxu1 %vm4385_vm11, %v5747_v22  ;;  %v5748_v25 = vld [vmem:[#allocation20_spill] sm:$0xff]  ;;  %v888_v23 = vrot.slane %v5750_v0, 2  ;;  %v884_v19 = vsel %vm866_vm3, %v882_v38, %v883_v18  ;;  %v5045_v52 = vld [vmem:[%s5642_s1 + $0x200] sm:$0xff]  }
  0x87   : > { %v5001_v10 = vpack.c.bf16 %v876_v47, %v874_v8  ;;  %v5003_v11 = vpack.c.bf16 %v881_v24, %v879_v7  ;;  %v885_v2 = vrot.slane %v5748_v25, 2  ;;  %v890_v7 = vrot.slane %v5751_v53, 2  ;;  %1818 = vmatprep.mubr.bf16.mxu1 %v5752_v16  ;;  %3739 = vmatpush3.bf16.msra.mxu1 %v4070_v33  ;;  %v5754_v0 = vld [vmem:[#allocation34_spill] sm:$0xff] }
  0x88   : > { %v892_v8 = vrot.slane %v4762_v12, 2  ;;  %v893_v63 = vrot.slane %v4769_v43, 2  ;;  %v895_v34 = vrot.slane %v4772_v55, 2  ;;  %v889_v50 = vsel %vm866_vm3, %v887_v13, %v888_v23  ;;  %3740 = vmatprep.subr.bf16.mxu1 %v4079_v6  ;;  %v5755_v53 = vld [vmem:[#allocation10_spill] sm:$0xff] }
  0x89   : > { %v886_v47 = vsel %vm866_vm3, %v883_v18, %v885_v2  ;;  %v891_v40 = vsel %vm866_vm3, %v888_v23, %v890_v7  ;;  %v897_v44 = vrot.slane %v4783_v51, 2  ;;  %v898_v55 = vrot.slane %v4791_v42, 2 }
  0x8a   : > { %v5027_v24 = vpack.c.bf16 %v886_v47, %v884_v19  ;;  %v5029_v26 = vpack.c.bf16 %v891_v40, %v889_v50  ;;  %v894_v38 = vsel %vm866_vm3, %v892_v8, %v893_v63  ;;  %v896_v12 = vsel %vm866_vm3, %v893_v63, %v895_v34  ;;  %v5756_v19 = vld [vmem:[#allocation33_spill] sm:$0xff]  ;;  %v5757_v8 = vld [vmem:[#allocation35_spill] sm:$0xff]  ;;  %v4075_v47 = vld [vmem:[%s5642_s1 + $0x1d0] sm:$0xff]  }
  0x8b   : > { %v5033_v43 = vpack.c.bf16 %v896_v12, %v894_v38  ;;  %v900_v33 = vrot.slane %v4794_v4, 2  ;;  %v902_v35 = vrot.slane %v4835_v14, 2  ;;  %v903_v18 = vrot.slane %v4838_v29, 2  ;;  %3741 = vmatpush3.bf16.msra.mxu1 %v4079_v6  ;;  %v4073_v63 = vld [vmem:[%s5642_s1 + $0x1c8] sm:$0xff]   ;;  %v4076_v50 = vld [vmem:[%s5642_s1 + $0x190] sm:$0xff]   ;;  %v4077_v40 = vld [vmem:[%s5642_s1 + $0x1d8] sm:$0xff]  }
  0x8c   : > { %v905_v51 = vrot.slane %v4841_v32, 2  ;;  %v907_v25 = vrot.slane %v4867_v48, 2  ;;  %v908_v2 = vrot.slane %v4864_v59, 2  ;;  %v899_v13 = vsel %vm866_vm3, %v897_v44, %v898_v55  ;;  %3013 = vmatmul.mubr.msk.bf16.gmra.mrb[32].mxu0 %vm4385_vm11, %v4855_v37  ;;  %v5753_v48 = vld [vmem:[#allocation27_spill] sm:$0xff]  ;;  %3774 = vmatprep.subr.bf16.mxu1 %v5045_v52  ;;  %v4078_v44 = vld [vmem:[%s5642_s1 + $0x198] sm:$0xff]   ;;  %v4080_v38 = vld [vmem:[%s5642_s1 + $0x1e0] sm:$0xff]  }
  0x8d   : > { %v901_v42 = vsel %vm866_vm3, %v898_v55, %v900_v33  ;;  %v910_v4 = vrot.slane %v4870_v21, 2  ;;  %v904_v29 = vsel %vm866_vm3, %v902_v35, %v903_v18  ;;  %1392 = vmatprep.mubr.bf16.mxu0 %v4906_v28  ;;  %v5071_v7 = vpack.c.bf16 %v4411_v56, %v5755_v53  ;;  %v4072_v56 = vld [vmem:[%s5642_s1 + $0x180] sm:$0xff]   ;;  %v4074_v34 = vld [vmem:[%s5642_s1 + $0x188] sm:$0xff]   ;;  %v4087_v53 = vld [vmem:[%s5642_s1 + $0x1b8] sm:$0xff]  }
  0x8e   : > { %v5053_v14 = vpack.c.bf16 %v901_v42, %v899_v13  ;;  %v906_v32 = vsel %vm866_vm3, %v903_v18, %v905_v51  ;;  %v909_v59 = vsel %vm866_vm3, %v907_v25, %v908_v2  ;;  %3085 = vmatmul.mubr.msk.bf16.gmra.mrb[32].mxu1 %vm4385_vm11, %v5753_v48  ;;  %v4081_v12 = vld [vmem:[%s5642_s1 + $0x1a0] sm:$0xff]   ;;  %v4082_v55 = vld [vmem:[%s5642_s1 + $0x1e8] sm:$0xff]   ;;  %v5760_v25 = vld [vmem:[#allocation4_spill] sm:$0xff]  ;;  %vm2730_vm1 = vcmask 1041408  }
  0x8f   : > { %v5062_v6 = vpack.c.bf16 %v906_v32, %v904_v29  ;;  %v911_v21 = vsel %vm866_vm3, %v908_v2, %v910_v4  ;;  %1826 = vmatprep.mubr.bf16.mxu1 %v5754_v0  ;;  %v5758_v33 = vld [vmem:[#allocation3_spill] sm:$0xff]  ;;  %v5759_v18 = vld [vmem:[#allocation2_spill] sm:$0xff]  ;;  %v870_v2 = vrot.slane %v5760_v25, 2  ;;  %v4084_v42 = vld [vmem:[%s5642_s1 + $0x1f0] sm:$0xff]  }
  0x90   : > { %v5066_v23 = vpack.c.bf16 %v911_v21, %v909_v59  ;;  %v867_v35 = vrot.slane %v5758_v33, 2  ;;  %v868_v51 = vrot.slane %v5759_v18, 2  ;;  %v4083_v13 = vld [vmem:[%s5642_s1 + $0x1a8] sm:$0xff]   ;;  %v4085_v32 = vld [vmem:[%s5642_s1 + $0x1b0] sm:$0xff]   ;;  %v4086_v59 = vld [vmem:[%s5642_s1 + $0x1f8] sm:$0xff]  }
  0x91   : > { %v5763_v33 = vld [vmem:[#allocation16_spill] sm:$0xff] }
  0x92   : > { %v869_v4 = vsel %vm866_vm3, %v867_v35, %v868_v51  ;;  %v871_v29 = vsel %vm866_vm3, %v868_v51, %v870_v2  ;;  %v5766_v35 = vld [vmem:[#allocation23_spill] sm:$0xff] }
  0x93   : > { %v5194_v21 = vpack.c.bf16 %v871_v29, %v869_v4 }
  0x94   : > { %3017 = vmatmul.mubr.msk.bf16.gmra.mrb[36].mxu0 %vm4385_vm11, %v5071_v7 }
  0x95   : > { %1400 = vmatprep.mubr.bf16.mxu0 %v4911_v61 }
  0x96   : > { %3089 = vmatmul.mubr.msk.bf16.gmra.mrb[36].mxu1 %vm4385_vm11, %v5756_v19 }
  0x97   : > { %1834 = vmatprep.mubr.bf16.mxu1 %v5757_v8 }
  0x9c   : > { %3021 = vmatmul.mubr.msk.bf16.gmra.mrb[40].mxu0 %vm4385_vm11, %v4901_v57 }
  0x9d   : > { %1408 = vmatprep.mubr.bf16.mxu0 %v4940_v58 }
  0x9e   : > { %3093 = vmatmul.mubr.msk.bf16.gmra.mrb[40].mxu1 %vm4385_vm11, %v4832_v49 }
  0x9f   : > { %1842 = vmatprep.mubr.bf16.mxu1 %v4861_v30 }
  0xa4   : > { %3025 = vmatmul.mubr.msk.bf16.gmra.mrb[44].mxu0 %vm4385_vm11, %v4917_v27 }
  0xa5   : > { %1416 = vmatprep.mubr.bf16.mxu0 %v4946_v60 }
  0xa6   : > { %3097 = vmatmul.mubr.msk.bf16.gmra.mrb[44].mxu1 %vm4385_vm11, %v4848_v31 }
  0xa7   : > { %1850 = vmatprep.mubr.bf16.mxu1 %v4895_v20 }
  0xac   : > { %3029 = vmatmul.mubr.msk.bf16.gmra.mrb[48].mxu0 %vm4385_vm11, %v4924_v5 }
  0xad   : > { %1424 = vmatprep.mubr.bf16.mxu0 %v4961_v54 }
  0xae   : > { %3101 = vmatmul.mubr.msk.bf16.gmra.mrb[48].mxu1 %vm4385_vm11, %v4886_v39 }
  0xaf   : > { %1858 = vmatprep.mubr.bf16.mxu1 %v4881_v46 }
  0xb4   : > { %3033 = vmatmul.mubr.msk.bf16.gmra.mrb[52].mxu0 %vm4385_vm11, %v4951_v45 }
  0xb5   : > { %1432 = vmatprep.mubr.bf16.mxu0 %v4976_v9 }
  0xb6   : > { %3105 = vmatmul.mubr.msk.bf16.gmra.mrb[52].mxu1 %vm4385_vm11, %v4855_v37 }
  0xb7   : > { %1866 = vmatprep.mubr.bf16.mxu1 %v4906_v28 }
  0xbc   : > { %3037 = vmatmul.mubr.msk.bf16.gmra.mrb[56].mxu0 %vm4385_vm11, %v4959_v36 }
  0xbd   : > { %1440 = vmatprep.mubr.bf16.mxu0 %v4985_v3 }
  0xbe   : > { %3109 = vmatmul.mubr.msk.bf16.gmra.mrb[56].mxu1 %vm4385_vm11, %v5071_v7 }
  0xbf   : > { %1874 = vmatprep.mubr.bf16.mxu1 %v4911_v61 }
  0xc4   : > { %3041 = vmatmul.mubr.msk.bf16.gmra.mrb[60].mxu0 %vm4385_vm11, %v4973_v17 }
  0xc5   : > { %3694 = vmatprep.mubr.bf16.mxu0 %v5001_v10 }
  0xc6   : > { %3113 = vmatmul.mubr.msk.bf16.gmra.mrb[60].mxu1 %vm4385_vm11, %v4901_v57 }
  0xc7   : > { %1882 = vmatprep.mubr.bf16.mxu1 %v4940_v58 }
  0xcc   : > { %3695 = vmatmul.mubr.bf16.vlgmr.msra.gmra.mrb[64].mxu0 %v5003_v11 }
  0xcd   : > { %3543 = vmatpush3.bf16.msra.mxu0 %v4072_v56  ;;  %3698 = vmatprep.mubr.bf16.mxu0 %v5027_v24  ;;  %v4089_v56 = vld [vmem:[%s5642_s1 + $0x208] sm:$0xff]  }
  0xce   : > { %3117 = vmatmul.mubr.msk.bf16.gmra.mrb[64].mxu1 %vm4385_vm11, %v4917_v27  ;;  %3544 = vmatprep.subr.bf16.mxu0 %v4073_v63  ;;  %v4091_v63 = vld [vmem:[%s5642_s1 + $0x218] sm:$0xff]  }
  0xcf   : > { %1890 = vmatprep.mubr.bf16.mxu1 %v4946_v60 }
  0xd1   : > { %3545 = vmatpush3.bf16.msra.mxu0 %v4074_v34 }
  0xd2   : > { %3546 = vmatprep.subr.bf16.mxu0 %v4075_v47 }
  0xd4   : > { %3699 = vmatmul.mubr.bf16.gmra.mrb[68].mxu0 %v5029_v26 }
  0xd5   : > { %3547 = vmatpush3.bf16.msra.mxu0 %v4076_v50  ;;  %3702 = vmatprep.mubr.bf16.mxu0 %v5033_v43  ;;  %v5761_v50 = vld [vmem:[#allocation11_spill] sm:$0xff] }
  0xd6   : > { %3121 = vmatmul.mubr.msk.bf16.gmra.mrb[68].mxu1 %vm4385_vm11, %v4924_v5  ;;  %3548 = vmatprep.subr.bf16.mxu0 %v4077_v40 }
  0xd7   : > { %1898 = vmatprep.mubr.bf16.mxu1 %v4961_v54 }
  0xd9   : > { %3549 = vmatpush3.bf16.msra.mxu0 %v4078_v44 }
  0xda   : > { %3550 = vmatprep.subr.bf16.mxu0 %v4080_v38 }
  0xdc   : > { %3703 = vmatmul.mubr.bf16.gmra.mrb[72].mxu0 %v5053_v14 }
  0xdd   : > { %3551 = vmatpush3.bf16.msra.mxu0 %v4081_v12  ;;  %3706 = vmatprep.mubr.bf16.mxu0 %v5062_v6 }
  0xde   : > { %3125 = vmatmul.mubr.msk.bf16.gmra.mrb[72].mxu1 %vm4385_vm11, %v4951_v45  ;;  %3552 = vmatprep.subr.bf16.mxu0 %v4082_v55 }
  0xdf   : > { %1906 = vmatprep.mubr.bf16.mxu1 %v4976_v9 }
  0xe1   : > { %3553 = vmatpush3.bf16.msra.mxu0 %v4083_v13 }
  0xe2   : > { %3554 = vmatprep.subr.bf16.mxu0 %v4084_v42 }
  0xe4   : > { %3707 = vmatmul.mubr.bf16.gmra.mrb[76].mxu0 %v5066_v23 }
  0xe5   : > { %3555 = vmatpush3.bf16.msra.mxu0 %v4085_v32  ;;  %2301 = vmatprep.mubr.bf16.mxu0 %v4484_v1  ;;  %v4090_v1 = vld [vmem:[%s5642_s1 + $0x210] sm:$0xff]  }
  0xe6   : > { %3129 = vmatmul.mubr.msk.bf16.gmra.mrb[76].mxu1 %vm4385_vm11, %v4959_v36  ;;  %3556 = vmatprep.subr.bf16.mxu0 %v4086_v59 }
  0xe7   : > { %3742 = vmatprep.mubr.bf16.mxu1 %v5194_v21 }
  0xe9   : > { %3557 = vmatpush3.bf16.msra.mxu0 %v4087_v53 }
  0xec   : > { %3205 = vmatmul.mubr.msk.bf16.vlgmr.msra.gmra.mrb[80].mxu0 %vm4385_vm11, %v4468_v62  ;;  %v4092_v62 = vld [vmem:[%s5642_s1 + $0x220] sm:$0xff]  }
  0xed   : > { %2309 = vmatprep.mubr.bf16.mxu0 %v4604_v15  ;;  %v4093_v15 = vld [vmem:[%s5642_s1 + $0x228] sm:$0xff]  }
  0xee   : > { %3743 = vmatmul.mubr.bf16.vlgmr.msra.gmra.mrb[80].mxu1 %v5001_v10  ;;  %v4094_v10 = vld [vmem:[%s5642_s1 + $0x230] sm:$0xff]  }
  0xef   : > { %3775 = vmatpush3.bf16.msra.mxu1 %v5045_v52  ;;  %3746 = vmatprep.mubr.bf16.mxu1 %v5003_v11 }
  0xf0   : > { %3776 = vmatprep.subr.bf16.mxu1 %v4089_v56 }
  0xf3   : > { %3777 = vmatpush3.bf16.msra.mxu1 %v4089_v56 }
  0xf4   : > { %3778 = vmatprep.subr.bf16.mxu1 %v4090_v1  ;;  %3209 = vmatmul.mubr.msk.bf16.gmra.mrb[84].mxu0 %vm4385_vm11, %v5747_v22 }
  0xf5   : > { %2317 = vmatprep.mubr.bf16.mxu0 %v5752_v16 }
  0xf6   : > { %3747 = vmatmul.mubr.bf16.gmra.mrb[84].mxu1 %v5027_v24 }
  0xf7   : > { %3750 = vmatprep.mubr.bf16.mxu1 %v5029_v26  ;;  %3779 = vmatpush3.bf16.msra.mxu1 %v4090_v1 }
  0xf8   : > { %3780 = vmatprep.subr.bf16.mxu1 %v4091_v63 }
  0xfb   : > { %3781 = vmatpush3.bf16.msra.mxu1 %v4091_v63 }
  0xfc   : > { %3782 = vmatprep.subr.bf16.mxu1 %v4092_v62  ;;  %3213 = vmatmul.mubr.msk.bf16.gmra.mrb[88].mxu0 %vm4385_vm11, %v5753_v48 }
  0xfd   : > { %2325 = vmatprep.mubr.bf16.mxu0 %v5754_v0  ;;  %v4095_v0 = vld [vmem:[%s5642_s1 + $0x238] sm:$0xff]  }
  0xfe   : > { %3751 = vmatmul.mubr.bf16.gmra.mrb[88].mxu1 %v5033_v43 }
  0xff   : > { %3754 = vmatprep.mubr.bf16.mxu1 %v5053_v14  ;;  %3783 = vmatpush3.bf16.msra.mxu1 %v4092_v62 }
 0x100   : > { %3784 = vmatprep.subr.bf16.mxu1 %v4093_v15 }
 0x103   : > { %v3286_v22 = vpop.f32.mrb[0].mxu0  ;;  %3785 = vmatpush3.bf16.msra.mxu1 %v4093_v15 }
 0x104   : > { %v3287_v16 = vpop.f32.mrb[1].mxu0  ;;  %3786 = vmatprep.subr.bf16.mxu1 %v4094_v10  ;;  %3217 = vmatmul.mubr.msk.bf16.gmra.mrb[92].mxu0 %vm4385_vm11, %v5756_v19  ;;  %v5762_v19 = vld [vmem:[#allocation12_spill] sm:$0xff] }
 0x105   : > { %v5242_v52 = vadd.f32 %v3287_v16, %v3286_v22  ;;  %v3289_v34 = vpop.f32.mrb[2].mxu0  ;;  %2333 = vmatprep.mubr.bf16.mxu0 %v5757_v8 }
 0x106   : > { %v3290_v48 = vpop.f32.mrb[3].mxu0  ;;  %3755 = vmatmul.mubr.bf16.gmra.mrb[92].mxu1 %v5062_v6 }
 0x107   : > { %v5250_v47 = vadd.f32 %v3290_v48, %v3289_v34  ;;  %3758 = vmatprep.mubr.bf16.mxu1 %v5066_v23  ;;  %3787 = vmatpush3.bf16.msra.mxu1 %v4094_v10 }
 0x108   : > { %3788 = vmatprep.subr.bf16.mxu1 %v4095_v0 }
 0x10b   : > { %3789 = vmatpush3.bf16.msra.mxu1 %v4095_v0 }
 0x10c   : > { %3221 = vmatmul.mubr.msk.bf16.gmra.mrb[96].mxu0 %vm4385_vm11, %v4832_v49  ;;  %v5764_v49 = vld [vmem:[#allocation17_spill] sm:$0xff] }
 0x10d   : > { %2341 = vmatprep.mubr.bf16.mxu0 %v4861_v30  ;;  %v5765_v30 = vld [vmem:[#allocation22_spill] sm:$0xff] }
 0x10e   : > { %3759 = vmatmul.mubr.bf16.gmra.mrb[0].mxu1 %v5761_v50 }
 0x10f   : > { %3762 = vmatprep.mubr.bf16.mxu1 %v5762_v19  ;;  %v3292_v40 = vpop.f32.mrb[4].mxu0 }
 0x110   : > { %v3293_v44 = vpop.f32.mrb[5].mxu0 }
 0x111   : > { %v5261_v38 = vadd.f32 %v3293_v44, %v3292_v40  ;;  %v3295_v8 = vpop.f32.mrb[6].mxu0 }
 0x112   : > { %v3296_v12 = vpop.f32.mrb[7].mxu0 }
 0x113   : > { %v5263_v55 = vadd.f32 %v3296_v12, %v3295_v8 }
 0x114   : > { %3225 = vmatmul.mubr.msk.bf16.gmra.mrb[100].mxu0 %vm4385_vm11, %v4848_v31 }
 0x115   : > { %2349 = vmatprep.mubr.bf16.mxu0 %v4895_v20  ;;  %v5767_v20 = vld [vmem:[#allocation30_spill] sm:$0xff] }
 0x116   : > { %3763 = vmatmul.mubr.bf16.gmra.mrb[4].mxu1 %v5763_v33 }
 0x117   : > { %3766 = vmatprep.mubr.bf16.mxu1 %v5764_v49 }
 0x11c   : > { %3229 = vmatmul.mubr.msk.bf16.gmra.mrb[104].mxu0 %vm4385_vm11, %v4886_v39 }
 0x11d   : > { %2357 = vmatprep.mubr.bf16.mxu0 %v4881_v46 }
 0x11e   : > { %3767 = vmatmul.mubr.bf16.gmra.mrb[8].mxu1 %v5765_v30 }
 0x11f   : > { %3770 = vmatprep.mubr.bf16.mxu1 %v5766_v35  ;;  %v3298_v18 = vpop.f32.mrb[8].mxu0 }
 0x120   : > { %v3299_v51 = vpop.f32.mrb[9].mxu0 }
 0x121   : > { %v5277_v25 = vadd.f32 %v3299_v51, %v3298_v18  ;;  %v3301_v31 = vpop.f32.mrb[10].mxu0 }
 0x122   : > { %v3302_v2 = vpop.f32.mrb[11].mxu0 }
 0x123   : > { %v5279_v13 = vadd.f32 %v3302_v2, %v3301_v31 }
 0x124   : > { %3233 = vmatmul.mubr.msk.bf16.gmra.mrb[108].mxu0 %vm4385_vm11, %v4855_v37 }
 0x125   : > { %2365 = vmatprep.mubr.bf16.mxu0 %v4906_v28 }
 0x126   : > { %3771 = vmatmul.mubr.bf16.gmra.mrb[12].mxu1 %v5767_v20 }
 0x127   : > { %3790 = vmatprep.mubr.bf16.mxu1 %v5003_v11 }
 0x12c   : > { %3237 = vmatmul.mubr.msk.bf16.gmra.mrb[112].mxu0 %vm4385_vm11, %v5071_v7 }
 0x12d   : > { %2373 = vmatprep.mubr.bf16.mxu0 %v4911_v61 }
 0x12e   : > { %3791 = vmatmul.mubr.bf16.vlgmr.msra.gmra.mrb[80].mxu1 %v5027_v24 }
 0x12f   : > { %3794 = vmatprep.mubr.bf16.mxu1 %v5029_v26  ;;  %v3304_v46 = vpop.f32.mrb[12].mxu0 }
 0x130   : > { %v3305_v39 = vpop.f32.mrb[13].mxu0 }
 0x131   : > { %v5293_v42 = vadd.f32 %v3305_v39, %v3304_v46  ;;  %v3307_v37 = vpop.f32.mrb[14].mxu0 }
 0x132   : > { %v3308_v4 = vpop.f32.mrb[15].mxu0 }
 0x133   : > { %v5295_v29 = vadd.f32 %v3308_v4, %v3307_v37 }
 0x134   : > { %3241 = vmatmul.mubr.msk.bf16.gmra.mrb[116].mxu0 %vm4385_vm11, %v4901_v57 }
 0x135   : > { %2381 = vmatprep.mubr.bf16.mxu0 %v4940_v58 }
 0x136   : > { %3795 = vmatmul.mubr.bf16.gmra.mrb[84].mxu1 %v5033_v43 }
 0x137   : > { %3798 = vmatprep.mubr.bf16.mxu1 %v5053_v14 }
 0x13c   : > { %3245 = vmatmul.mubr.msk.bf16.gmra.mrb[120].mxu0 %vm4385_vm11, %v4917_v27 }
 0x13d   : > { %2389 = vmatprep.mubr.bf16.mxu0 %v4946_v60 }
 0x13e   : > { %3799 = vmatmul.mubr.bf16.gmra.mrb[88].mxu1 %v5062_v6 }
 0x13f   : > { %3802 = vmatprep.mubr.bf16.mxu1 %v5066_v23  ;;  %v3310_v28 = vpop.f32.mrb[16].mxu0 }
 0x140   : > { %v3311_v11 = vpop.f32.mrb[17].mxu0 }
 0x141   : > { %v3422_v61 = vpop.f32.mrb[16].mxu1  ;;  %v5309_v57 = vadd.f32 %v3311_v11, %v3310_v28  ;;  %v3313_v26 = vpop.f32.mrb[18].mxu0 }
 0x142   : > { %v3423_v24 = vpop.f32.mrb[17].mxu1  ;;  %v3314_v14 = vpop.f32.mrb[19].mxu0 }
 0x143   : > { %v5311_v58 = vadd.f32 %v3423_v24, %v3422_v61  ;;  %v3425_v43 = vpop.f32.mrb[18].mxu1  ;;  %v5313_v7 = vadd.f32 %v3314_v14, %v3313_v26 }
 0x144   : > { %v3426_v27 = vpop.f32.mrb[19].mxu1  ;;  %3249 = vmatmul.mubr.msk.bf16.gmra.mrb[124].mxu0 %vm4385_vm11, %v4924_v5 }
 0x145   : > { %v5315_v32 = vadd.f32 %v3426_v27, %v3425_v43  ;;  %2397 = vmatprep.mubr.bf16.mxu0 %v4961_v54 }
 0x146   : > { %3803 = vmatmul.mubr.bf16.gmra.mrb[92].mxu1 %v5761_v50 }
 0x147   : > { %3806 = vmatprep.mubr.bf16.mxu1 %v5762_v19  ;;  %v3316_v60 = vpop.f32.mrb[20].mxu0 }
 0x148   : > { %v3317_v23 = vpop.f32.mrb[21].mxu0 }
 0x149   : > { %v3428_v6 = vpop.f32.mrb[20].mxu1  ;;  %v5323_v59 = vadd.f32 %v3317_v23, %v3316_v60  ;;  %v3319_v56 = vpop.f32.mrb[22].mxu0 }
 0x14a   : > { %v3429_v53 = vpop.f32.mrb[21].mxu1  ;;  %v3320_v62 = vpop.f32.mrb[23].mxu0 }
 0x14b   : > { %v5325_v1 = vadd.f32 %v3429_v53, %v3428_v6  ;;  %v3431_v63 = vpop.f32.mrb[22].mxu1  ;;  %v5327_v15 = vadd.f32 %v3320_v62, %v3319_v56 }
 0x14c   : > { %v3432_v5 = vpop.f32.mrb[23].mxu1  ;;  %3253 = vmatmul.mubr.msk.bf16.gmra.mrb[128].mxu0 %vm4385_vm11, %v4951_v45 }
 0x14d   : > { %v5329_v10 = vadd.f32 %v3432_v5, %v3431_v63  ;;  %2405 = vmatprep.mubr.bf16.mxu0 %v4976_v9 }
 0x14e   : > { %3807 = vmatmul.mubr.bf16.gmra.mrb[0].mxu1 %v5763_v33 }
 0x14f   : > { %3810 = vmatprep.mubr.bf16.mxu1 %v5764_v49  ;;  %v3322_v54 = vpop.f32.mrb[24].mxu0 }
 0x150   : > { %v3323_v16 = vpop.f32.mrb[25].mxu0 }
 0x151   : > { %v3434_v22 = vpop.f32.mrb[24].mxu1  ;;  %v5337_v34 = vadd.f32 %v3323_v16, %v3322_v54  ;;  %v3325_v0 = vpop.f32.mrb[26].mxu0 }
 0x152   : > { %v3435_v48 = vpop.f32.mrb[25].mxu1  ;;  %v3326_v40 = vpop.f32.mrb[27].mxu0 }
 0x153   : > { %v5339_v50 = vadd.f32 %v3435_v48, %v3434_v22  ;;  %v3437_v19 = vpop.f32.mrb[26].mxu1  ;;  %v5341_v44 = vadd.f32 %v3326_v40, %v3325_v0 }
 0x154   : > { %v3438_v45 = vpop.f32.mrb[27].mxu1  ;;  %3257 = vmatmul.mubr.msk.bf16.gmra.mrb[132].mxu0 %vm4385_vm11, %v4959_v36 }
 0x155   : > { %v5343_v8 = vadd.f32 %v3438_v45, %v3437_v19  ;;  %2413 = vmatprep.mubr.bf16.mxu0 %v4985_v3  ;;  %v5768_v3 = vld [vmem:[#allocation6_spill] sm:$0xff] }
 0x156   : > { %3811 = vmatmul.mubr.bf16.gmra.mrb[4].mxu1 %v5765_v30  ;;  %v5769_v30 = vld [vmem:[#allocation32_spill] sm:$0xff] }
 0x157   : > { %3814 = vmatprep.mubr.bf16.mxu1 %v5766_v35  ;;  %v3328_v9 = vpop.f32.mrb[28].mxu0 }
 0x158   : > { %v3329_v33 = vpop.f32.mrb[29].mxu0 }
 0x159   : > { %v3440_v12 = vpop.f32.mrb[28].mxu1  ;;  %v5351_v49 = vadd.f32 %v3329_v33, %v3328_v9  ;;  %v3331_v51 = vpop.f32.mrb[30].mxu0 }
 0x15a   : > { %v3441_v18 = vpop.f32.mrb[29].mxu1  ;;  %v3332_v46 = vpop.f32.mrb[31].mxu0 }
 0x15b   : > { %v5353_v31 = vadd.f32 %v3441_v18, %v3440_v12  ;;  %v3443_v2 = vpop.f32.mrb[30].mxu1  ;;  %v5355_v39 = vadd.f32 %v3332_v46, %v3331_v51 }
 0x15c   : > { %v3444_v36 = vpop.f32.mrb[31].mxu1  ;;  %3261 = vmatmul.mubr.msk.bf16.gmra.mrb[136].mxu0 %vm4385_vm11, %v4973_v17  ;;  %v5770_v17 = vld [vmem:[#allocation5_spill] sm:$0xff] }
 0x15d   : > { %v5357_v37 = vadd.f32 %v3444_v36, %v3443_v2  ;;  %2421 = vmatprep.mubr.bf16.mxu0 %v5768_v3 }
 0x15e   : > { %3815 = vmatmul.mubr.bf16.gmra.mrb[8].mxu1 %v5767_v20 }
 0x15f   : > { %3818 = vmatprep.mubr.bf16.mxu1 %v5769_v30  ;;  %v3334_v35 = vpop.f32.mrb[32].mxu0 }
 0x160   : > { %v3335_v28 = vpop.f32.mrb[33].mxu0 }
 0x161   : > { %v3446_v4 = vpop.f32.mrb[32].mxu1  ;;  %v3336_v61 = vadd.f32 %v3335_v28, %v3334_v35  ;;  %v3337_v24 = vpop.f32.mrb[34].mxu0 }
 0x162   : > { %v3447_v11 = vpop.f32.mrb[33].mxu1  ;;  %v3338_v14 = vpop.f32.mrb[35].mxu0 }
 0x163   : > { %v5365_v26 = vadd.f32 %v3447_v11, %v3446_v4  ;;  %v3449_v43 = vpop.f32.mrb[34].mxu1  ;;  %v3339_v27 = vadd.f32 %v3338_v14, %v3337_v24 }
 0x164   : > { %v3450_v60 = vpop.f32.mrb[35].mxu1  ;;  %3265 = vmatmul.mubr.msk.bf16.gmra.mrb[140].mxu0 %vm4385_vm11, %v5770_v17 }
 0x165   : > { %v5367_v6 = vadd.f32 %v3450_v60, %v3449_v43 }
 0x166   : > { %3819 = vmatmul.mubr.bf16.gmra.mrb[12].mxu1 %v5194_v21 }
 0x167   : > { %v3340_v20 = vpop.f32.mrb[36].mxu0 }
 0x168   : > { %v3341_v53 = vpop.f32.mrb[37].mxu0 }
 0x169   : > { %v3452_v23 = vpop.f32.mrb[36].mxu1  ;;  %v3342_v56 = vadd.f32 %v3341_v53, %v3340_v20  ;;  %v3343_v62 = vpop.f32.mrb[38].mxu0 }
 0x16a   : > { %v3453_v63 = vpop.f32.mrb[37].mxu1  ;;  %v3344_v22 = vpop.f32.mrb[39].mxu0 }
 0x16b   : > { %v5373_v5 = vadd.f32 %v3453_v63, %v3452_v23  ;;  %v3455_v54 = vpop.f32.mrb[38].mxu1  ;;  %v3345_v16 = vadd.f32 %v3344_v22, %v3343_v62 }
 0x16c   : > { %v3456_v48 = vpop.f32.mrb[39].mxu1 }
 0x16d   : > { %v5375_v0 = vadd.f32 %v3456_v48, %v3455_v54 }
 0x16f   : > { %v3346_v19 = vpop.f32.mrb[40].mxu0 }
 0x170   : > { %v3347_v41 = vpop.f32.mrb[41].mxu0 }
 0x171   : > { %v3458_v40 = vpop.f32.mrb[40].mxu1  ;;  %v3348_v45 = vadd.f32 %v3347_v41, %v3346_v19  ;;  %v3349_v21 = vpop.f32.mrb[42].mxu0 }
 0x172   : > { %v3459_v9 = vpop.f32.mrb[41].mxu1  ;;  %v3350_v18 = vpop.f32.mrb[43].mxu0 }
 0x173   : > { %v5377_v12 = vadd.f32 %v3459_v9, %v3458_v40  ;;  %v3461_v33 = vpop.f32.mrb[42].mxu1  ;;  %v3351_v51 = vadd.f32 %v3350_v18, %v3349_v21 }
 0x174   : > { %v3462_v2 = vpop.f32.mrb[43].mxu1 }
 0x175   : > { %v5379_v46 = vadd.f32 %v3462_v2, %v3461_v33 }
 0x177   : > { %v3352_v36 = vpop.f32.mrb[44].mxu0 }
 0x178   : > { %v3353_v30 = vpop.f32.mrb[45].mxu0 }
 0x179   : > { %v3464_v3 = vpop.f32.mrb[44].mxu1  ;;  %v3354_v35 = vadd.f32 %v3353_v30, %v3352_v36  ;;  %v3355_v28 = vpop.f32.mrb[46].mxu0 }
 0x17a   : > { %v3465_v4 = vpop.f32.mrb[45].mxu1  ;;  %v3356_v43 = vpop.f32.mrb[47].mxu0 }
 0x17b   : > { %v5381_v11 = vadd.f32 %v3465_v4, %v3464_v3  ;;  %v3467_v24 = vpop.f32.mrb[46].mxu1  ;;  %v3357_v14 = vadd.f32 %v3356_v43, %v3355_v28 }
 0x17c   : > { %v3468_v60 = vpop.f32.mrb[47].mxu1 }
 0x17d   : > { %v5383_v17 = vadd.f32 %v3468_v60, %v3467_v24 }
 0x17f   : > { %v3358_v20 = vpop.f32.mrb[48].mxu0 }
 0x180   : > { %v3359_v53 = vpop.f32.mrb[49].mxu0 }
 0x181   : > { %v3470_v23 = vpop.f32.mrb[48].mxu1  ;;  %v5385_v63 = vadd.f32 %v3359_v53, %v3358_v20  ;;  %v3361_v54 = vpop.f32.mrb[50].mxu0 }
 0x182   : > { %v3471_v62 = vpop.f32.mrb[49].mxu1  ;;  %v3362_v19 = vpop.f32.mrb[51].mxu0 }
 0x183   : > { %v3472_v22 = vadd.f32 %v3471_v62, %v3470_v23  ;;  %v3473_v48 = vpop.f32.mrb[50].mxu1  ;;  %v5387_v40 = vadd.f32 %v3362_v19, %v3361_v54 }
 0x184   : > { %v3474_v41 = vpop.f32.mrb[51].mxu1 }
 0x185   : > { %v5389_v9 = vadd.f32 %v3472_v22, %v3336_v61  ;;  %v3475_v21 = vadd.f32 %v3474_v41, %v3473_v48 }
 0x187   : > { %v5391_v33 = vadd.f32 %v3475_v21, %v3339_v27  ;;  %v3364_v18 = vpop.f32.mrb[52].mxu0 }
 0x188   : > { %v3365_v36 = vpop.f32.mrb[53].mxu0 }
 0x189   : > { %v3476_v2 = vpop.f32.mrb[52].mxu1  ;;  %v5393_v3 = vadd.f32 %v3365_v36, %v3364_v18  ;;  %v3367_v4 = vpop.f32.mrb[54].mxu0 }
 0x18a   : > { %v3477_v30 = vpop.f32.mrb[53].mxu1  ;;  %v3368_v43 = vpop.f32.mrb[55].mxu0 }
 0x18b   : > { %v3478_v28 = vadd.f32 %v3477_v30, %v3476_v2  ;;  %v3479_v24 = vpop.f32.mrb[54].mxu1  ;;  %v5395_v60 = vadd.f32 %v3368_v43, %v3367_v4 }
 0x18c   : > { %v3480_v20 = vpop.f32.mrb[55].mxu1 }
 0x18d   : > { %v5397_v23 = vadd.f32 %v3478_v28, %v3342_v56  ;;  %v3481_v61 = vadd.f32 %v3480_v20, %v3479_v24 }
 0x18f   : > { %v5399_v53 = vadd.f32 %v3481_v61, %v3345_v16  ;;  %v3370_v27 = vpop.f32.mrb[56].mxu0 }
 0x190   : > { %v3371_v54 = vpop.f32.mrb[57].mxu0 }
 0x191   : > { %v3482_v62 = vpop.f32.mrb[56].mxu1  ;;  %v5401_v22 = vadd.f32 %v3371_v54, %v3370_v27  ;;  %v3373_v19 = vpop.f32.mrb[58].mxu0 }
 0x192   : > { %v3483_v48 = vpop.f32.mrb[57].mxu1  ;;  %v3374_v18 = vpop.f32.mrb[59].mxu0 }
 0x193   : > { %v3484_v41 = vadd.f32 %v3483_v48, %v3482_v62  ;;  %v3485_v21 = vpop.f32.mrb[58].mxu1  ;;  %v5403_v2 = vadd.f32 %v3374_v18, %v3373_v19 }
 0x194   : > { %v3486_v36 = vpop.f32.mrb[59].mxu1 }
 0x195   : > { %v5405_v30 = vadd.f32 %v3484_v41, %v3348_v45  ;;  %v3487_v56 = vadd.f32 %v3486_v36, %v3485_v21 }
 0x197   : > { %v5407_v4 = vadd.f32 %v3487_v56, %v3351_v51  ;;  %v3376_v16 = vpop.f32.mrb[60].mxu0 }
 0x198   : > { %v3377_v24 = vpop.f32.mrb[61].mxu0 }
 0x199   : > { %5771 = vst [vmem:[#allocation31_spill] sm:$0xff] %v5407_v4  ;;  %v3488_v28 = vpop.f32.mrb[60].mxu1  ;;  %v5409_v43 = vadd.f32 %v3377_v24, %v3376_v16  ;;  %v3379_v61 = vpop.f32.mrb[62].mxu0 }
 0x19a   : > { %v3489_v20 = vpop.f32.mrb[61].mxu1  ;;  %v3380_v62 = vpop.f32.mrb[63].mxu0 }
 0x19b   : > { %v3490_v27 = vadd.f32 %v3489_v20, %v3488_v28  ;;  %v3491_v54 = vpop.f32.mrb[62].mxu1  ;;  %v5411_v48 = vadd.f32 %v3380_v62, %v3379_v61 }
 0x19c   : > { %v3492_v19 = vpop.f32.mrb[63].mxu1 }
 0x19d   : > { %v5413_v18 = vadd.f32 %v3490_v27, %v3354_v35  ;;  %v3493_v45 = vadd.f32 %v3492_v19, %v3491_v54 }
 0x19f   : > { %v5415_v41 = vadd.f32 %v3493_v45, %v3357_v14  ;;  %v3696_v51 = vpop.f32.mrb[64].mxu0 }
 0x1a0   : > { %v1492_v21 = vadd.f32 %v3696_v51, %v5261_v38  ;;  %v1483_v56 = vpop.f32.mrb[65].mxu0 }
 0x1a1   : > { %v3494_v36 = vpop.f32.mrb[64].mxu1  ;;  %v1484_v16 = vadd.f32 %v5242_v52, %v1483_v56  ;;  %v3697_v4 = vpop.f32.mrb[66].mxu0 }
 0x1a2   : > { %v3495_v24 = vpop.f32.mrb[65].mxu1  ;;  %v5420_v28 = vadd.f32 %v5325_v1, %v1492_v21  ;;  %v1495_v61 = vadd.f32 %v3697_v4, %v5263_v55  ;;  %v1486_v27 = vpop.f32.mrb[67].mxu0 }
 0x1a3   : > { %v3496_v20 = vadd.f32 %v3495_v24, %v3494_v36  ;;  %v3497_v35 = vpop.f32.mrb[66].mxu1  ;;  %v5424_v14 = vadd.f32 %v5311_v58, %v1484_v16  ;;  %v1487_v54 = vadd.f32 %v5250_v47, %v1486_v27 }
 0x1a4   : > { %v3498_v38 = vpop.f32.mrb[67].mxu1  ;;  %v5431_v52 = vadd.f32 %v5329_v10, %v1495_v61 }
 0x1a5   : > { %v5428_v62 = vadd.f32 %v3496_v20, %v5385_v63  ;;  %v3499_v19 = vadd.f32 %v3498_v38, %v3497_v35  ;;  %v5434_v1 = vadd.f32 %v5315_v32, %v1487_v54 }
 0x1a7   : > { %v5437_v55 = vadd.f32 %v3499_v19, %v5387_v40  ;;  %v3700_v4 = vpop.f32.mrb[68].mxu0 }
 0x1a8   : > { %v1508_v58 = vadd.f32 %v3700_v4, %v5293_v42  ;;  %v1499_v51 = vpop.f32.mrb[69].mxu0 }
 0x1a9   : > { %v3500_v45 = vpop.f32.mrb[68].mxu1  ;;  %v1500_v47 = vadd.f32 %v5277_v25, %v1499_v51  ;;  %v3701_v63 = vpop.f32.mrb[70].mxu0 }
 0x1aa   : > { %v3501_v21 = vpop.f32.mrb[69].mxu1  ;;  %v5442_v36 = vadd.f32 %v5353_v31, %v1508_v58  ;;  %v1511_v56 = vadd.f32 %v3701_v63, %v5295_v29  ;;  %v1502_v16 = vpop.f32.mrb[71].mxu0 }
 0x1ab   : > { %v3502_v10 = vadd.f32 %v3501_v21, %v3500_v45  ;;  %v3503_v32 = vpop.f32.mrb[70].mxu1  ;;  %v5446_v40 = vadd.f32 %v5339_v50, %v1500_v47  ;;  %v1503_v24 = vadd.f32 %v5279_v13, %v1502_v16 }
 0x1ac   : > { %v3504_v42 = vpop.f32.mrb[71].mxu1  ;;  %v5453_v25 = vadd.f32 %v5357_v37, %v1511_v56 }
 0x1ad   : > { %v5450_v20 = vadd.f32 %v3502_v10, %v5393_v3  ;;  %v3505_v61 = vadd.f32 %v3504_v42, %v3503_v32  ;;  %v5456_v31 = vadd.f32 %v5343_v8, %v1503_v24 }
 0x1af   : > { %v5459_v29 = vadd.f32 %v3505_v61, %v5395_v60  ;;  %v3704_v35 = vpop.f32.mrb[72].mxu0 }
 0x1b0   : > { %v1524_v50 = vadd.f32 %v3704_v35, %v5323_v59  ;;  %v1515_v54 = vpop.f32.mrb[73].mxu0 }
 0x1b1   : > { %v3506_v27 = vpop.f32.mrb[72].mxu1  ;;  %v1516_v13 = vadd.f32 %v5309_v57, %v1515_v54  ;;  %v3705_v3 = vpop.f32.mrb[74].mxu0 }
 0x1b2   : > { %v3507_v38 = vpop.f32.mrb[73].mxu1  ;;  %v5464_v19 = vadd.f32 %v5373_v5, %v1524_v50  ;;  %v1527_v4 = vadd.f32 %v3705_v3, %v5327_v15  ;;  %v1518_v58 = vpop.f32.mrb[75].mxu0 }
 0x1b3   : > { %v3508_v37 = vadd.f32 %v3507_v38, %v3506_v27  ;;  %v3509_v8 = vpop.f32.mrb[74].mxu1  ;;  %v5468_v60 = vadd.f32 %v5365_v26, %v1516_v13  ;;  %v1519_v45 = vadd.f32 %v5313_v7, %v1518_v58 }
 0x1b4   : > { %v3510_v59 = vpop.f32.mrb[75].mxu1  ;;  %v5475_v57 = vadd.f32 %v5375_v0, %v1527_v4 }
 0x1b5   : > { %v5472_v51 = vadd.f32 %v3508_v37, %v5401_v22  ;;  %v3511_v47 = vadd.f32 %v3510_v59, %v3509_v8  ;;  %v1824_v5 = vadd.f32 %v5367_v6, %v1519_v45 }
 0x1b7   : > { %v5479_v21 = vadd.f32 %v3511_v47, %v5403_v2  ;;  %v3708_v15 = vpop.f32.mrb[76].mxu0 }
 0x1b8   : > { %v1540_v63 = vadd.f32 %v3708_v15, %v5351_v49  ;;  %v1531_v10 = vpop.f32.mrb[77].mxu0 }
 0x1b9   : > { %v3512_v26 = vpop.f32.mrb[76].mxu1  ;;  %v1532_v7 = vadd.f32 %v5337_v34, %v1531_v10  ;;  %v3709_v32 = vpop.f32.mrb[78].mxu0 }
 0x1ba   : > { %v3513_v56 = vpop.f32.mrb[77].mxu1  ;;  %v5484_v22 = vadd.f32 %v5381_v11, %v1540_v63  ;;  %v1543_v16 = vadd.f32 %v3709_v32, %v5355_v39  ;;  %v1534_v6 = vpop.f32.mrb[79].mxu0 }
 0x1bb   : > { %v3514_v0 = vadd.f32 %v3513_v56, %v3512_v26  ;;  %v3515_v24 = vpop.f32.mrb[78].mxu1  ;;  %v1837_v2 = vadd.f32 %v5377_v12, %v1532_v7  ;;  %v1535_v42 = vadd.f32 %v5341_v44, %v1534_v6 }
 0x1bc   : > { %v3516_v61 = vpop.f32.mrb[79].mxu1  ;;  %v5493_v34 = vadd.f32 %v5383_v17, %v1543_v16 }
 0x1bd   : > { %v5490_v49 = vadd.f32 %v3514_v0, %v5409_v43  ;;  %v3517_v35 = vadd.f32 %v3516_v61, %v3515_v24  ;;  %v1840_v11 = vadd.f32 %v5379_v46, %v1535_v42 }
 0x1bf   : > { %v5497_v50 = vadd.f32 %v3517_v35, %v5411_v48  ;;  %v3558_v39 = vpop.f32.mrb[80].mxu0 }
 0x1c0   : > { %v3559_v27 = vpop.f32.mrb[81].mxu0 }
 0x1c1   : > { %v3560_v54 = vadd.f32 %v3559_v27, %v3558_v39  ;;  %v3561_v13 = vpop.f32.mrb[82].mxu0 }
 0x1c2   : > { %v3562_v12 = vpop.f32.mrb[83].mxu0 }
 0x1c3   : > { %v3563_v38 = vadd.f32 %v3562_v12, %v3561_v13  ;;  %v5500_v44 = vadd.f32 %v3560_v54, %v5424_v14 }
 0x1c5   : > { %v5503_v43 = vadd.f32 %v3563_v38, %v5434_v1 }
 0x1c7   : > { %v3564_v17 = vpop.f32.mrb[84].mxu0 }
 0x1c8   : > { %v3565_v3 = vpop.f32.mrb[85].mxu0 }
 0x1c9   : > { %v3566_v37 = vadd.f32 %v3565_v3, %v3564_v17  ;;  %v3567_v4 = vpop.f32.mrb[86].mxu0 }
 0x1ca   : > { %v3568_v46 = vpop.f32.mrb[87].mxu0 }
 0x1cb   : > { %v3569_v8 = vadd.f32 %v3568_v46, %v3567_v4  ;;  %v3840_v48 = vadd.f32 %v3566_v37, %v5420_v28 }
 0x1cd   : > { %v3848_v58 = vadd.f32 %v3569_v8, %v5431_v52 }
 0x1cf   : > { %v3570_v45 = vpop.f32.mrb[88].mxu0 }
 0x1d0   : > { %v3571_v59 = vpop.f32.mrb[89].mxu0 }
 0x1d1   : > { %v3572_v47 = vadd.f32 %v3571_v59, %v3570_v45  ;;  %v3573_v15 = vpop.f32.mrb[90].mxu0 }
 0x1d2   : > { %v3574_v63 = vpop.f32.mrb[91].mxu0 }
 0x1d3   : > { %v3575_v14 = vadd.f32 %v3574_v63, %v3573_v15  ;;  %v5508_v26 = vadd.f32 %v3572_v47, %v5446_v40 }
 0x1d5   : > { %v5511_v1 = vadd.f32 %v3575_v14, %v5456_v31 }
 0x1d7   : > { %v3576_v10 = vpop.f32.mrb[92].mxu0 }
 0x1d8   : > { %v3577_v7 = vpop.f32.mrb[93].mxu0 }
 0x1d9   : > { %v3578_v56 = vadd.f32 %v3577_v7, %v3576_v10  ;;  %v3579_v32 = vpop.f32.mrb[94].mxu0 }
 0x1da   : > { %v3580_v0 = vpop.f32.mrb[95].mxu0 }
 0x1db   : > { %v3581_v28 = vadd.f32 %v3580_v0, %v3579_v32  ;;  %v5514_v52 = vadd.f32 %v3578_v56, %v5442_v36 }
 0x1dd   : > { %v5517_v16 = vadd.f32 %v3581_v28, %v5453_v25 }
 0x1df   : > { %v3582_v24 = vpop.f32.mrb[96].mxu0 }
 0x1e0   : > { %v3583_v6 = vpop.f32.mrb[97].mxu0 }
 0x1e1   : > { %v3584_v42 = vadd.f32 %v3583_v6, %v3582_v24  ;;  %v3585_v40 = vpop.f32.mrb[98].mxu0 }
 0x1e2   : > { %v3586_v61 = vpop.f32.mrb[99].mxu0 }
 0x1e3   : > { %v3587_v35 = vadd.f32 %v3586_v61, %v3585_v40  ;;  %v5520_v31 = vadd.f32 %v3584_v42, %v5468_v60 }
 0x1e5   : > { %v5522_v39 = vadd.f32 %v3587_v35, %v1824_v5 }
 0x1e7   : > { %v3588_v27 = vpop.f32.mrb[100].mxu0 }
 0x1e8   : > { %v3589_v54 = vpop.f32.mrb[101].mxu0 }
 0x1e9   : > { %v3590_v13 = vadd.f32 %v3589_v54, %v3588_v27  ;;  %v3591_v12 = vpop.f32.mrb[102].mxu0 }
 0x1ea   : > { %v3592_v36 = vpop.f32.mrb[103].mxu0 }
 0x1eb   : > { %v3593_v38 = vadd.f32 %v3592_v36, %v3591_v12  ;;  %v5525_v25 = vadd.f32 %v3590_v13, %v5464_v19 }
 0x1ed   : > { %v5528_v17 = vadd.f32 %v3593_v38, %v5475_v57 }
 0x1ef   : > { %v3594_v3 = vpop.f32.mrb[104].mxu0 }
 0x1f0   : > { %v3595_v37 = vpop.f32.mrb[105].mxu0 }
 0x1f1   : > { %v3596_v4 = vadd.f32 %v3595_v37, %v3594_v3  ;;  %v3597_v60 = vpop.f32.mrb[106].mxu0 }
 0x1f2   : > { %v3598_v46 = vpop.f32.mrb[107].mxu0 }
 0x1f3   : > { %v3599_v5 = vadd.f32 %v3598_v46, %v3597_v60  ;;  %v5530_v8 = vadd.f32 %v3596_v4, %v1837_v2 }
 0x1f5   : > { %v5532_v45 = vadd.f32 %v3599_v5, %v1840_v11 }
 0x1f7   : > { %v3600_v59 = vpop.f32.mrb[108].mxu0 }
 0x1f8   : > { %v3601_v47 = vpop.f32.mrb[109].mxu0 }
 0x1f9   : > { %v3602_v15 = vadd.f32 %v3601_v47, %v3600_v59  ;;  %v3603_v63 = vpop.f32.mrb[110].mxu0 }
 0x1fa   : > { %v3604_v19 = vpop.f32.mrb[111].mxu0 }
 0x1fb   : > { %v3605_v14 = vadd.f32 %v3604_v19, %v3603_v63  ;;  %v5535_v57 = vadd.f32 %v3602_v15, %v5484_v22 }
 0x1fd   : > { %v5538_v10 = vadd.f32 %v3605_v14, %v5493_v34 }
 0x1ff   : > { %v3606_v7 = vpop.f32.mrb[112].mxu0 }
 0x200   : > { %v3607_v11 = vpop.f32.mrb[113].mxu0 }
 0x201   : > { %v3792_v2 = vpop.f32.mrb[80].mxu1  ;;  %v3608_v32 = vadd.f32 %v3607_v11, %v3606_v7  ;;  %v3609_v22 = vpop.f32.mrb[114].mxu0 }
 0x202   : > { %v3841_v56 = vadd.f32 %v3840_v48, %v3792_v2  ;;  %v2464_v0 = vpop.f32.mrb[81].mxu1  ;;  %v3610_v24 = vpop.f32.mrb[115].mxu0 }
 0x203   : > { %v3845_v34 = vadd.f32 %v5500_v44, %v2464_v0  ;;  %v3793_v28 = vpop.f32.mrb[82].mxu1  ;;  %v3611_v42 = vadd.f32 %v3610_v24, %v3609_v22  ;;  %v5550_v61 = vadd.f32 %v5389_v9, %v3608_v32 }
 0x204   : > { %2735 = vst [vmem:[%s5545_s15 + $0x10] sm:$0xff] %v3841_v56  ;;  %v3849_v6 = vadd.f32 %v3848_v58, %v3793_v28  ;;  %v2467_v40 = vpop.f32.mrb[83].mxu1  ;;  %v2662_v12 = vmul.f32 %v3841_v56, %v3841_v56 }
 0x205   : > { %2733 = vst [vmem:[%s5545_s15] sm:$0xff] %v3845_v34  ;;  %v3853_v35 = vadd.f32 %v5503_v43, %v2467_v40  ;;  %v5556_v48 = vadd.f32 %v5391_v33, %v3611_v42  ;;  %v2660_v27 = vmul.f32 %v3845_v34, %v3845_v34 }
 0x206   : > { %2736 = vst [vmem:[%s5545_s15 + $0x18] sm:$0xff] %v3849_v6  ;;  %v2663_v60 = vmul.f32 %v3849_v6, %v3849_v6 }
 0x207   : > { %v2623_v54 = vadd.f32 %v3853_v35, %v3845_v34  ;;  %v2661_v13 = vmul.f32 %v3853_v35, %v3853_v35  ;;  %2734 = vst [vmem:[%s5545_s15 + $0x8] sm:$0xff] %v3853_v35  ;;  %v3612_v44 = vpop.f32.mrb[116].mxu0 }
 0x208   : > { %v3613_v3 = vpop.f32.mrb[117].mxu0 }
 0x209   : > { %v2624_v58 = vadd.f32 %v3841_v56, %v2623_v54  ;;  %v2692_v36 = vadd.f32 %v2661_v13, %v2660_v27  ;;  %v3796_v38 = vpop.f32.mrb[84].mxu1  ;;  %v3614_v37 = vadd.f32 %v3613_v3, %v3612_v44  ;;  %v3615_v43 = vpop.f32.mrb[118].mxu0 }
 0x20a   : > { %v3857_v9 = vadd.f32 %v5514_v52, %v3796_v38  ;;  %v2480_v4 = vpop.f32.mrb[85].mxu1  ;;  %v3616_v47 = vpop.f32.mrb[119].mxu0 }
 0x20b   : > { %v2693_v33 = vadd.f32 %v2692_v36, %v2662_v12  ;;  %v3861_v46 = vadd.f32 %v5508_v26, %v2480_v4  ;;  %v2625_v5 = vadd.f32 %v3849_v6, %v2624_v58  ;;  %v3797_v59 = vpop.f32.mrb[86].mxu1  ;;  %v3617_v63 = vadd.f32 %v3616_v47, %v3615_v43 }
 0x20c   : > { %2739 = vst [vmem:[%s5545_s15 + $0x30] sm:$0xff] %v3857_v9  ;;  %v3865_v15 = vadd.f32 %v5517_v16, %v3797_v59  ;;  %v2483_v19 = vpop.f32.mrb[87].mxu1  ;;  %v5564_v52 = vadd.f32 %v5397_v23, %v3614_v37  ;;  %v2666_v22 = vmul.f32 %v3857_v9, %v3857_v9 }
 0x20d   : > { %v2626_v14 = vadd.f32 %v3861_v46, %v2625_v5  ;;  %v2664_v7 = vmul.f32 %v3861_v46, %v3861_v46  ;;  %v2694_v2 = vadd.f32 %v2693_v33, %v2663_v60  ;;  %2737 = vst [vmem:[%s5545_s15 + $0x20] sm:$0xff] %v3861_v46  ;;  %v3869_v11 = vadd.f32 %v5511_v1, %v2483_v19 }
 0x20e   : > { %2740 = vst [vmem:[%s5545_s15 + $0x38] sm:$0xff] %v3865_v15  ;;  %v5570_v26 = vadd.f32 %v5399_v53, %v3617_v63  ;;  %v2667_v35 = vmul.f32 %v3865_v15, %v3865_v15 }
 0x20f   : > { %v2695_v56 = vadd.f32 %v2694_v2, %v2664_v7  ;;  %v2627_v32 = vadd.f32 %v3869_v11, %v2626_v14  ;;  %v2665_v0 = vmul.f32 %v3869_v11, %v3869_v11  ;;  %2738 = vst [vmem:[%s5545_s15 + $0x28] sm:$0xff] %v3869_v11  ;;  %v3618_v16 = vpop.f32.mrb[120].mxu0 }
 0x210   : > { %v3619_v24 = vpop.f32.mrb[121].mxu0 }
 0x211   : > { %v2628_v34 = vadd.f32 %v3857_v9, %v2627_v32  ;;  %v2696_v23 = vadd.f32 %v2695_v56, %v2665_v0  ;;  %v3800_v28 = vpop.f32.mrb[88].mxu1  ;;  %v3620_v42 = vadd.f32 %v3619_v24, %v3618_v16  ;;  %v3621_v1 = vpop.f32.mrb[122].mxu0 }
 0x212   : > { %v3873_v6 = vadd.f32 %v5525_v25, %v3800_v28  ;;  %v2496_v40 = vpop.f32.mrb[89].mxu1  ;;  %v3622_v44 = vpop.f32.mrb[123].mxu0 }
 0x213   : > { %v2697_v53 = vadd.f32 %v2696_v23, %v2666_v22  ;;  %v3877_v27 = vadd.f32 %v5520_v31, %v2496_v40  ;;  %v2629_v54 = vadd.f32 %v3865_v15, %v2628_v34  ;;  %v3801_v13 = vpop.f32.mrb[90].mxu1  ;;  %v3623_v58 = vadd.f32 %v3622_v44, %v3621_v1  ;;  %v5772_v31 = vld [vmem:[#allocation31_spill] sm:$0xff] }
 0x214   : > { %2743 = vst [vmem:[%s5545_s15 + $0x50] sm:$0xff] %v3873_v6  ;;  %v3881_v12 = vadd.f32 %v5528_v17, %v3801_v13  ;;  %v2499_v36 = vpop.f32.mrb[91].mxu1  ;;  %v5578_v25 = vadd.f32 %v5405_v30, %v3620_v42  ;;  %v2670_v46 = vmul.f32 %v3873_v6, %v3873_v6 }
 0x215   : > { %v2630_v38 = vadd.f32 %v3877_v27, %v2629_v54  ;;  %v2668_v3 = vmul.f32 %v3877_v27, %v3877_v27  ;;  %v2698_v9 = vadd.f32 %v2697_v53, %v2667_v35  ;;  %2741 = vst [vmem:[%s5545_s15 + $0x40] sm:$0xff] %v3877_v27  ;;  %v3885_v37 = vadd.f32 %v5522_v39, %v2499_v36 }
 0x216   : > { %2744 = vst [vmem:[%s5545_s15 + $0x58] sm:$0xff] %v3881_v12  ;;  %v5584_v4 = vadd.f32 %v5772_v31, %v3623_v58  ;;  %v2671_v14 = vmul.f32 %v3881_v12, %v3881_v12 }
 0x217   : > { %v2699_v43 = vadd.f32 %v2698_v9, %v2668_v3  ;;  %v2631_v60 = vadd.f32 %v3885_v37, %v2630_v38  ;;  %v2669_v33 = vmul.f32 %v3885_v37, %v3885_v37  ;;  %2742 = vst [vmem:[%s5545_s15 + $0x48] sm:$0xff] %v3885_v37  ;;  %v3624_v17 = vpop.f32.mrb[124].mxu0 }
 0x218   : > { %v3625_v47 = vpop.f32.mrb[125].mxu0 }
 0x219   : > { %v2632_v5 = vadd.f32 %v3873_v6, %v2631_v60  ;;  %v2700_v30 = vadd.f32 %v2699_v43, %v2669_v33  ;;  %v3804_v59 = vpop.f32.mrb[92].mxu1  ;;  %v3626_v63 = vadd.f32 %v3625_v47, %v3624_v17  ;;  %v3627_v39 = vpop.f32.mrb[126].mxu0 }
 0x21a   : > { %v3889_v15 = vadd.f32 %v5535_v57, %v3804_v59  ;;  %v2512_v19 = vpop.f32.mrb[93].mxu1  ;;  %v3628_v32 = vpop.f32.mrb[127].mxu0 }
 0x21b   : > { %v2701_v7 = vadd.f32 %v2700_v30, %v2670_v46  ;;  %v3893_v2 = vadd.f32 %v5530_v8, %v2512_v19  ;;  %v2633_v11 = vadd.f32 %v3881_v12, %v2632_v5  ;;  %v3805_v56 = vpop.f32.mrb[94].mxu1  ;;  %v3629_v16 = vadd.f32 %v3628_v32, %v3627_v39 }
 0x21c   : > { %2747 = vst [vmem:[%s5545_s15 + $0x70] sm:$0xff] %v3889_v15  ;;  %v3897_v0 = vadd.f32 %v5538_v10, %v3805_v56  ;;  %v2515_v22 = vpop.f32.mrb[95].mxu1  ;;  %v3915_v57 = vadd.f32 %v5413_v18, %v3626_v63  ;;  %v2674_v10 = vmul.f32 %v3889_v15, %v3889_v15 }
 0x21d   : > { %v2634_v34 = vadd.f32 %v3893_v2, %v2633_v11  ;;  %v2672_v23 = vmul.f32 %v3893_v2, %v3893_v2  ;;  %v2702_v28 = vadd.f32 %v2701_v7, %v2671_v14  ;;  %2745 = vst [vmem:[%s5545_s15 + $0x60] sm:$0xff] %v3893_v2  ;;  %v3901_v24 = vadd.f32 %v5532_v45, %v2515_v22 }
 0x21e   : > { %2748 = vst [vmem:[%s5545_s15 + $0x78] sm:$0xff] %v3897_v0  ;;  %v3921_v8 = vadd.f32 %v5415_v41, %v3629_v16  ;;  %v2675_v12 = vmul.f32 %v3897_v0, %v3897_v0 }
 0x21f   : > { %v2703_v6 = vadd.f32 %v2702_v28, %v2672_v23  ;;  %v2635_v42 = vadd.f32 %v3901_v24, %v2634_v34  ;;  %v2673_v40 = vmul.f32 %v3901_v24, %v3901_v24  ;;  %2746 = vst [vmem:[%s5545_s15 + $0x68] sm:$0xff] %v3901_v24  ;;  %v3630_v1 = vpop.f32.mrb[128].mxu0 }
 0x220   : > { %v3631_v18 = vpop.f32.mrb[129].mxu0 }
 0x221   : > { %v2636_v35 = vadd.f32 %v3889_v15, %v2635_v42  ;;  %v2704_v53 = vadd.f32 %v2703_v6, %v2673_v40  ;;  %v3808_v27 = vpop.f32.mrb[0].mxu1  ;;  %v3632_v13 = vadd.f32 %v3631_v18, %v3630_v1  ;;  %v3633_v45 = vpop.f32.mrb[130].mxu0 }
 0x222   : > { %v3904_v54 = vadd.f32 %v5564_v52, %v3808_v27  ;;  %v2528_v44 = vpop.f32.mrb[1].mxu1  ;;  %v3634_v3 = vpop.f32.mrb[131].mxu0 }
 0x223   : > { %v2705_v41 = vadd.f32 %v2704_v53, %v2674_v10  ;;  %v3907_v58 = vadd.f32 %v5550_v61, %v2528_v44  ;;  %v2637_v36 = vadd.f32 %v3897_v0, %v2636_v35  ;;  %v3809_v38 = vpop.f32.mrb[2].mxu1  ;;  %v3635_v37 = vadd.f32 %v3634_v3, %v3633_v45 }
 0x224   : > { %2751 = vst [vmem:[%s5545_s15 + $0x90] sm:$0xff] %v3904_v54  ;;  %v3910_v9 = vadd.f32 %v5570_v26, %v3809_v38  ;;  %v2531_v31 = vpop.f32.mrb[3].mxu1  ;;  %v3930_v52 = vadd.f32 %v5428_v62, %v3632_v13  ;;  %v2678_v26 = vmul.f32 %v3904_v54, %v3904_v54 }
 0x225   : > { %v2638_v43 = vadd.f32 %v3907_v58, %v2637_v36  ;;  %v2676_v60 = vmul.f32 %v3907_v58, %v3907_v58  ;;  %v2706_v33 = vadd.f32 %v2705_v41, %v2675_v12  ;;  %2749 = vst [vmem:[%s5545_s15 + $0x80] sm:$0xff] %v3907_v58  ;;  %v3913_v17 = vadd.f32 %v5556_v48, %v2531_v31 }
 0x226   : > { %2752 = vst [vmem:[%s5545_s15 + $0x98] sm:$0xff] %v3910_v9  ;;  %v3936_v61 = vadd.f32 %v5437_v55, %v3635_v37  ;;  %v2679_v48 = vmul.f32 %v3910_v9, %v3910_v9 }
 0x227   : > { %v2707_v46 = vadd.f32 %v2706_v33, %v2676_v60  ;;  %v2639_v5 = vadd.f32 %v3913_v17, %v2638_v43  ;;  %v2677_v30 = vmul.f32 %v3913_v17, %v3913_v17  ;;  %2750 = vst [vmem:[%s5545_s15 + $0x88] sm:$0xff] %v3913_v17  ;;  %v3636_v59 = vpop.f32.mrb[132].mxu0 }
 0x228   : > { %v3637_v62 = vpop.f32.mrb[133].mxu0 }
 0x229   : > { %v2640_v47 = vadd.f32 %v3904_v54, %v2639_v5  ;;  %v2708_v15 = vadd.f32 %v2707_v46, %v2677_v30  ;;  %v3812_v63 = vpop.f32.mrb[4].mxu1  ;;  %v3638_v39 = vadd.f32 %v3637_v62, %v3636_v59  ;;  %v3639_v7 = vpop.f32.mrb[134].mxu0 }
 0x22a   : > { %v3916_v19 = vadd.f32 %v3915_v57, %v3812_v63  ;;  %v2544_v14 = vpop.f32.mrb[5].mxu1  ;;  %v3640_v32 = vpop.f32.mrb[135].mxu0 }
 0x22b   : > { %v2709_v2 = vadd.f32 %v2708_v15, %v2678_v26  ;;  %v3919_v55 = vadd.f32 %v5578_v25, %v2544_v14  ;;  %v2641_v11 = vadd.f32 %v3910_v9, %v2640_v47  ;;  %v3813_v56 = vpop.f32.mrb[6].mxu1  ;;  %v3641_v16 = vadd.f32 %v3640_v32, %v3639_v7 }
 0x22c   : > { %2755 = vst [vmem:[%s5545_s15 + $0xb0] sm:$0xff] %v3916_v19  ;;  %v3922_v0 = vadd.f32 %v3921_v8, %v3813_v56  ;;  %v2547_v22 = vpop.f32.mrb[7].mxu1  ;;  %v3927_v34 = vadd.f32 %v5450_v20, %v3638_v39  ;;  %v2682_v8 = vmul.f32 %v3916_v19, %v3916_v19 }
 0x22d   : > { %v2642_v57 = vadd.f32 %v3919_v55, %v2641_v11  ;;  %v2680_v23 = vmul.f32 %v3919_v55, %v3919_v55  ;;  %v2710_v28 = vadd.f32 %v2709_v2, %v2679_v48  ;;  %2753 = vst [vmem:[%s5545_s15 + $0xa0] sm:$0xff] %v3919_v55  ;;  %v3925_v24 = vadd.f32 %v5584_v4, %v2547_v22 }
 0x22e   : > { %2756 = vst [vmem:[%s5545_s15 + $0xb8] sm:$0xff] %v3922_v0  ;;  %v3933_v6 = vadd.f32 %v5459_v29, %v3641_v16  ;;  %v2683_v4 = vmul.f32 %v3922_v0, %v3922_v0 }
 0x22f   : > { %v2711_v25 = vadd.f32 %v2710_v28, %v2680_v23  ;;  %v2643_v42 = vadd.f32 %v3925_v24, %v2642_v57  ;;  %v2681_v40 = vmul.f32 %v3925_v24, %v3925_v24  ;;  %2754 = vst [vmem:[%s5545_s15 + $0xa8] sm:$0xff] %v3925_v24  ;;  %v3642_v1 = vpop.f32.mrb[136].mxu0 }
 0x230   : > { %v3643_v20 = vpop.f32.mrb[137].mxu0 }
 0x231   : > { %v2644_v10 = vadd.f32 %v3916_v19, %v2643_v42  ;;  %v2712_v35 = vadd.f32 %v2711_v25, %v2681_v40  ;;  %v3816_v53 = vpop.f32.mrb[8].mxu1  ;;  %v3644_v18 = vadd.f32 %v3643_v20, %v3642_v1  ;;  %v3645_v13 = vpop.f32.mrb[138].mxu0 }
 0x232   : > { %v3928_v27 = vadd.f32 %v3927_v34, %v3816_v53  ;;  %v2560_v54 = vpop.f32.mrb[9].mxu1  ;;  %v3646_v41 = vpop.f32.mrb[139].mxu0 }
 0x233   : > { %v2713_v44 = vadd.f32 %v2712_v35, %v2682_v8  ;;  %v3931_v29 = vadd.f32 %v3930_v52, %v2560_v54  ;;  %v2645_v45 = vadd.f32 %v3922_v0, %v2644_v10  ;;  %v3817_v12 = vpop.f32.mrb[10].mxu1  ;;  %v3647_v36 = vadd.f32 %v3646_v41, %v3645_v13 }
 0x234   : > { %2759 = vst [vmem:[%s5545_s15 + $0xd0] sm:$0xff] %v3928_v27  ;;  %v3934_v58 = vadd.f32 %v3933_v6, %v3817_v12  ;;  %v2563_v38 = vpop.f32.mrb[11].mxu1  ;;  %v3942_v3 = vadd.f32 %v5472_v51, %v3644_v18  ;;  %v2686_v5 = vmul.f32 %v3928_v27, %v3928_v27 }
 0x235   : > { %v2646_v9 = vadd.f32 %v3931_v29, %v2645_v45  ;;  %v2684_v37 = vmul.f32 %v3931_v29, %v3931_v29  ;;  %v2714_v31 = vadd.f32 %v2713_v44, %v2683_v4  ;;  %2757 = vst [vmem:[%s5545_s15 + $0xc0] sm:$0xff] %v3931_v29  ;;  %v3937_v43 = vadd.f32 %v3936_v61, %v2563_v38 }
 0x236   : > { %2760 = vst [vmem:[%s5545_s15 + $0xd8] sm:$0xff] %v3934_v58  ;;  %v3948_v60 = vadd.f32 %v5479_v21, %v3647_v36  ;;  %v2687_v62 = vmul.f32 %v3934_v58, %v3934_v58 }
 0x237   : > { %v2715_v33 = vadd.f32 %v2714_v31, %v2684_v37  ;;  %v2647_v52 = vadd.f32 %v3937_v43, %v2646_v9  ;;  %v2685_v17 = vmul.f32 %v3937_v43, %v3937_v43  ;;  %2758 = vst [vmem:[%s5545_s15 + $0xc8] sm:$0xff] %v3937_v43  ;;  %v3648_v46 = vpop.f32.mrb[140].mxu0 }
 0x238   : > { %v3649_v47 = vpop.f32.mrb[141].mxu0 }
 0x239   : > { %v2648_v30 = vadd.f32 %v3928_v27, %v2647_v52  ;;  %v2716_v59 = vadd.f32 %v2715_v33, %v2685_v17  ;;  %v3820_v26 = vpop.f32.mrb[12].mxu1  ;;  %v3650_v51 = vadd.f32 %v3649_v47, %v3648_v46  ;;  %v3651_v63 = vpop.f32.mrb[142].mxu0 }
 0x23a   : > { %v2576_v15 = vpop.f32.mrb[13].mxu1  ;;  %v3652_v14 = vpop.f32.mrb[143].mxu0 }
 0x23b   : > { %v2717_v19 = vadd.f32 %v2716_v59, %v2686_v5  ;;  %v3943_v61 = vadd.f32 %v3942_v3, %v2576_v15  ;;  %v2649_v39 = vadd.f32 %v3934_v58, %v2648_v30  ;;  %v3821_v21 = vpop.f32.mrb[14].mxu1  ;;  %v3939_v7 = vadd.f32 %v5490_v49, %v3650_v51 }
 0x23c   : > { %v3653_v48 = vadd.f32 %v3652_v14, %v3651_v63  ;;  %v2579_v2 = vpop.f32.mrb[15].mxu1 }
 0x23d   : > { %v2650_v55 = vadd.f32 %v3943_v61, %v2649_v39  ;;  %v2688_v11 = vmul.f32 %v3943_v61, %v3943_v61  ;;  %v2718_v56 = vadd.f32 %v2717_v19, %v2687_v62  ;;  %2761 = vst [vmem:[%s5545_s15 + $0xe0] sm:$0xff] %v3943_v61  ;;  %v3949_v32 = vadd.f32 %v3948_v60, %v2579_v2 }
 0x23e   : > { %v3940_v0 = vadd.f32 %v3939_v7, %v3820_v26  ;;  %v3945_v16 = vadd.f32 %v5497_v50, %v3653_v48 }
 0x23f   : > { %v2719_v22 = vadd.f32 %v2718_v56, %v2688_v11  ;;  %v2651_v34 = vadd.f32 %v3949_v32, %v2650_v55  ;;  %v2689_v57 = vmul.f32 %v3949_v32, %v3949_v32  ;;  %2762 = vst [vmem:[%s5545_s15 + $0xe8] sm:$0xff] %v3949_v32 }
 0x240   : > { %v2690_v23 = vmul.f32 %v3940_v0, %v3940_v0  ;;  %2763 = vst [vmem:[%s5545_s15 + $0xf0] sm:$0xff] %v3940_v0  ;;  %v3946_v28 = vadd.f32 %v3945_v16, %v3821_v21 }
 0x241   : > { %v2652_v24 = vadd.f32 %v3940_v0, %v2651_v34  ;;  %v2720_v49 = vadd.f32 %v2719_v22, %v2689_v57 }
 0x242   : > { %v2691_v6 = vmul.f32 %v3946_v28, %v3946_v28  ;;  %2764 = vst [vmem:[%s5545_s15 + $0xf8] sm:$0xff] %v3946_v28 }
 0x243   : > { %v2653_v25 = vadd.f32 %v3946_v28, %v2652_v24  ;;  %v2721_v42 = vadd.f32 %v2720_v49, %v2690_v23 }
 0x245   : > { %v2654_v40 = vrot.slane %v2653_v25, 4  ;;  %v2722_v1 = vadd.f32 %v2721_v42, %v2691_v6 }
 0x247   : > { %v2655_v8 = vadd.f32 %v2654_v40, %v2653_v25  ;;  %v2723_v10 = vrot.slane %v2722_v1, 4 }
 0x249   : > { %v2656_v35 = vrot.slane %v2655_v8, 2  ;;  %v2724_v50 = vadd.f32 %v2723_v10, %v2722_v1 }
 0x24b   : > { %v2657_v53 = vadd.f32 %v2656_v35, %v2655_v8  ;;  %v2725_v20 = vrot.slane %v2724_v50, 2 }
 0x24d   : > { %v2658_v27 = vrot.slane %v2657_v53, 1  ;;  %v2726_v18 = vadd.f32 %v2725_v20, %v2724_v50 }
 0x24f   : > { %v2727_v54 = vrot.slane %v2726_v18, 1  ;;  %v2659_v13 = vadd.f32 %v2658_v27, %v2657_v53 }
 0x251   : > { %v2728_v4 = vadd.f32 %v2727_v54, %v2726_v18 }
 0x253   : > { %v2729_v44 = vsel %vm558_vm0, %v2659_v13, %v2728_v4 }
 0x254   : > { %v2731_v29 = vsel %vm2730_vm1, %v2729_v44, 0.0 }
 0x255   : > { %2732 = vst [vmem:[%s264_s22] sm:$0xff] %v2731_v29 }
 0x256 PF: > { %s16_s20 = sadd.s32 1, %s4120_s20   ;;  %s5773_s18 = smov %s4116_s19 }
 0x257   : > { %p13_p5 = scmp.ge.s32.totalorder %s16_s20, 4   ;;  %s5774_s19 = smov %s5776_s21 }
 0x259   :  { %15 = sbr.rel (!%p13_p5) target bundleno = 2 (0x2), region = 83 }

</bundles_post_ra>
